<compile_context>
chip_gen: v5e
topology: v5e:2x2
jax: 0.10.0
libtpu: 0.0.40
codegen_flags: <defaults>
</compile_context>

<pallas_src>
import functools

import numpy as np
import jax
import jax.numpy as jnp
from jax import lax
from jax.experimental import pallas as pl
from jax.experimental.pallas import tpu as pltpu


# (Cin, Cout, kernel, stride, pad) for the four conv blocks, as in the PyTorch module.
_CONV_CFG = [
    (1, 8, 5, 2, 2),
    (8, 16, 3, 2, 1),
    (16, 32, 3, 2, 1),
    (32, 64, 3, 2, 1),
]
_BN_EPS = 1e-5
_LANES = 128          # every layer's (Wo * Cout) column width for a 32x32 mono input
_NUM_CLASSES = 10


def _out_size(s, k, stride, pad):
    return (s + 2 * pad - k) // stride + 1


# ----------------------------------------------------------------------------
# The fused Pallas kernel
# ----------------------------------------------------------------------------
def _fused_kernel(x_ref, g1_ref, m1_ref, g2_ref, m2_ref, g3_ref, m3_ref,
                  g4_ref, m4_ref, aff_ref, pool_ref, wh_ref, bh_ref, o_ref,
                  *, meta):
    """meta[l] = (kh, rows, cout, count) with rows = N*Ho and count = N*Ho*Wo."""

    def channel_allreduce(row, cout):
        # row: (1, 128) f32 laid out as (wo, c), c fastest, with Wo*Cout == 128.
        # Circular roll-and-add over the Wo groups: log2(Wo) XLU rolls + VPU adds.
        # Result: per-channel sum, already broadcast to every (wo, c) column.
        s = cout
        while s < _LANES:
            row = row + pltpu.roll(row, s, 1)
            s *= 2
        return row

    def conv_bn(xb, g_ref, m_ref, layer):
        kh, rows, cout, count = meta[layer]
        # (1) single selection matmul: all kh H-taps (stride-2 + zero pad) stacked on M.
        t = jnp.dot(g_ref[...], xb, preferred_element_type=jnp.float32)
        t = t.astype(jnp.bfloat16)                        # exact: G is a 0/1 selection
        # (2) lane-aligned concat of the kh 128-wide tap blocks -> one wide-K matmul.
        z = jnp.concatenate([t[i * rows:(i + 1) * rows, :] for i in range(kh)], axis=1)
        acc = jnp.dot(z, m_ref[...], preferred_element_type=jnp.float32)   # (rows, 128)
        # Epilogue in f32: bias + ReLU + BatchNorm (training-mode batch statistics).
        aff = aff_ref[layer]                              # (3, 128): bias / gamma / beta
        y = jnp.maximum(acc + aff[0:1, :], 0.0)
        inv_cnt = 1.0 / count
        mean = channel_allreduce(jnp.sum(y, axis=0, keepdims=True), cout) * inv_cnt
        d = y - mean                                      # centered -> stable variance
        var = channel_allreduce(jnp.sum(d * d, axis=0, keepdims=True), cout) * inv_cnt
        inv_std = lax.rsqrt(var + _BN_EPS)
        out = d * (aff[1:2, :] * inv_std) + aff[2:3, :]
        return out.astype(jnp.bfloat16)                   # next layer's MXU operand

    xb = x_ref[...]
    xb = conv_bn(xb, g1_ref, m1_ref, 0)
    xb = conv_bn(xb, g2_ref, m2_ref, 1)
    xb = conv_bn(xb, g3_ref, m3_ref, 2)
    xb = conv_bn(xb, g4_ref, m4_ref, 3)
    # AdaptiveAvgPool2d(1) + Linear(64 -> 10), folded into two tail matmuls.
    pooled = jnp.dot(pool_ref[...], xb, preferred_element_type=jnp.float32)
    logits = jnp.dot(pooled.astype(jnp.bfloat16), wh_ref[...],
                     preferred_element_type=jnp.float32)
    o_ref[...] = logits + bh_ref[...]                     # lane-aligned (N, 128) store


# ----------------------------------------------------------------------------
# One-time weight repacking into matmul-friendly operands (outside the jit)
# ----------------------------------------------------------------------------
def preprocess_params(params, n, h, w):
    g_list, m_list, aff_rows = [], [], []
    cur_h, cur_w, cur_cin = h, w, 1
    for li, (cin, cout, k, stride, pad) in enumerate(_CONV_CFG):
        assert cin == cur_cin
        ho = _out_size(cur_h, k, stride, pad)
        wo = _out_size(cur_w, k, stride, pad)
        assert wo * cout == _LANES and cur_w * cin <= _LANES, (
            "kernel assumes a 32x32 single-channel input (128-lane layers)")
        # G (0/1): stride + zero-pad row selection along H, kh taps stacked along M.
        g = np.zeros((k, n * ho, n * cur_h), np.float32)
        for i in range(k):
            for b in range(n):
                for r in range(ho):
                    src = stride * r + i - pad
                    if 0 <= src < cur_h:
                        g[i, b * ho + r, b * cur_h + src] = 1.0
        g_list.append(jnp.asarray(g.reshape(k * n * ho, n * cur_h), jnp.bfloat16))
        # W-selection (stride + zero pad) folded into the conv weights.
        sel = np.zeros((k, cur_w, wo), np.float32)
        for j in range(k):
            for c in range(wo):
                src = stride * c + j - pad
                if 0 <= src < cur_w:
                    sel[j, src, c] = 1.0
        wconv = np.asarray(params[f"conv{li + 1}_w"], np.float32)     # (Cout, Cin, k, k)
        m = np.einsum("jwv,ocij->iwcvo", sel, wconv).reshape(k, cur_w * cin, wo * cout)
        m_pad = np.zeros((k, _LANES, wo * cout), np.float32)          # pad K to 128/tap
        m_pad[:, :cur_w * cin, :] = m
        m_list.append(jnp.asarray(m_pad.reshape(k * _LANES, wo * cout), jnp.bfloat16))
        # bias / gamma / beta tiled to the (wo, c) column layout; stays f32.
        aff_rows.append(np.stack([
            np.tile(np.asarray(params[f"conv{li + 1}_b"], np.float32), wo),
            np.tile(np.asarray(params[f"bn{li + 1}_gamma"], np.float32), wo),
            np.tile(np.asarray(params[f"bn{li + 1}_beta"], np.float32), wo),
        ]))
        cur_h, cur_w, cur_cin = ho, wo, cout

    aff = jnp.asarray(np.stack(aff_rows), jnp.float32)                # (4, 3, 128)
    h4, w4 = cur_h, cur_w
    pool = np.kron(np.eye(n, dtype=np.float32), np.ones((1, h4), np.float32))  # (N, N*H4)
    lin_w = np.asarray(params["lin_w"], np.float32)                   # (64, 10)
    wh = np.zeros((w4 * 64, _LANES), np.float32)                      # pad classes to 128
    wh[:, :lin_w.shape[1]] = np.tile(lin_w, (w4, 1)) / float(h4 * w4)
    bh = np.zeros((1, _LANES), np.float32)
    bh[0, :lin_w.shape[1]] = np.asarray(params["lin_b"], np.float32)
    return {"g": g_list, "m": m_list, "aff": aff,
            "pool": jnp.asarray(pool, jnp.bfloat16),
            "wh": jnp.asarray(wh, jnp.bfloat16),
            "bh": jnp.asarray(bh, jnp.float32)}


# ----------------------------------------------------------------------------
# Forward pass: reshape/pad/cast + one pallas_call
# ----------------------------------------------------------------------------
def _full_spec(shape):
    return pl.BlockSpec(shape, lambda: (0,) * len(shape))


@jax.jit
def audio_classifier_forward(x_nchw, prepped):
    n, _, h, w = x_nchw.shape
    # Cin == 1: NCHW -> (N*H, W) is a pure reshape (no relayout); pad W to 128 lanes
    # and cast to bf16 for the MXU.  All epilogue math stays in f32 inside the kernel.
    xp = jnp.pad(x_nchw.reshape(n * h, w).astype(jnp.bfloat16),
                 ((0, 0), (0, _LANES - w)))

    meta, cur_h, cur_w = [], h, w
    for (_, cout, k, stride, pad) in _CONV_CFG:
        ho = _out_size(cur_h, k, stride, pad)
        wo = _out_size(cur_w, k, stride, pad)
        meta.append((k, n * ho, cout, float(n * ho * wo)))
        cur_h, cur_w = ho, wo
    meta = tuple(meta)

    g, m = prepped["g"], prepped["m"]
    operands = (xp, g[0], m[0], g[1], m[1], g[2], m[2], g[3], m[3],
                prepped["aff"], prepped["pool"], prepped["wh"], prepped["bh"])
    out = pl.pallas_call(
        functools.partial(_fused_kernel, meta=meta),
        out_shape=jax.ShapeDtypeStruct((n, _LANES), jnp.float32),
        in_specs=[_full_spec(op.shape) for op in operands],
        out_specs=_full_spec((n, _LANES)),
        compiler_params=pltpu.CompilerParams(vmem_limit_bytes=8 * 1024 * 1024),
    )(*operands)
    return out[:, :_NUM_CLASSES]


# ----------------------------------------------------------------------------
# Parameter init (deterministic, mimics the PyTorch __init__)
# ----------------------------------------------------------------------------
def kaiming_normal(key, shape, a=0.1):
    fan_in = shape[1] * shape[2] * shape[3]
    gain = (2.0 / (1.0 + a * a)) ** 0.5
    std = gain / (fan_in ** 0.5)
    return std * jax.random.normal(key, shape, dtype=jnp.float32)


def init_params(key):
    ks = jax.random.split(key, 6)
    params = {}
    conv_shapes = [(8, 1, 5, 5), (16, 8, 3, 3), (32, 16, 3, 3), (64, 32, 3, 3)]
    for i, shp in enumerate(conv_shapes, start=1):
        cout = shp[0]
        params[f"conv{i}_w"] = kaiming_normal(ks[i - 1], shp, a=0.1)
        params[f"conv{i}_b"] = jnp.zeros((cout,), jnp.float32)      # bias.data.zero_()
        params[f"bn{i}_gamma"] = jnp.ones((cout,), jnp.float32)     # fresh BatchNorm2d
        params[f"bn{i}_beta"] = jnp.zeros((cout,), jnp.float32)
    bound = 1.0 / (64.0 ** 0.5)
    params["lin_w"] = jax.random.uniform(ks[4], (64, _NUM_CLASSES), jnp.float32,
                                         -bound, bound)
    params["lin_b"] = jax.random.uniform(ks[5], (_NUM_CLASSES,), jnp.float32,
                                         -bound, bound)
    return params


if __name__ == "__main__":
    key = jax.random.PRNGKey(0)
    k_param, k_input = jax.random.split(key)
    params = init_params(k_param)
    # Spectrogram-like input: batch=8 (>= 8 rows at every layer), 1 channel, 32x32 NCHW.
    n, h, w = 8, 32, 32
    x = jax.random.normal(k_input, (n, 1, h, w), dtype=jnp.float32)
    prepped = preprocess_params(params, n=n, h=h, w=w)
    out = audio_classifier_forward(x, prepped)
    out = jax.block_until_ready(out)
    assert out.shape == (n, _NUM_CLASSES), out.shape
    assert bool(jnp.all(jnp.isfinite(out))), "non-finite logits"
    print("KERNEL_OK")
</pallas_src>

<mosaic_0001>
module attributes {stable_mosaic.version = 11 : i64} {
  func.func @_fused_kernel(%arg0: memref<256x128xbf16, #tpu.memory_space<vmem>>, %arg1: memref<640x256xbf16, #tpu.memory_space<vmem>>, %arg2: memref<640x128xbf16, #tpu.memory_space<vmem>>, %arg3: memref<192x128xbf16, #tpu.memory_space<vmem>>, %arg4: memref<384x128xbf16, #tpu.memory_space<vmem>>, %arg5: memref<96x64xbf16, #tpu.memory_space<vmem>>, %arg6: memref<384x128xbf16, #tpu.memory_space<vmem>>, %arg7: memref<48x32xbf16, #tpu.memory_space<vmem>>, %arg8: memref<384x128xbf16, #tpu.memory_space<vmem>>, %arg9: memref<4x3x128xf32, #tpu.memory_space<vmem>>, %arg10: memref<8x16xbf16, #tpu.memory_space<vmem>>, %arg11: memref<128x128xbf16, #tpu.memory_space<vmem>>, %arg12: memref<1x128xf32, #tpu.memory_space<vmem>>, %arg13: memref<8x128xf32, #tpu.memory_space<vmem>>) attributes {dimension_semantics = [], scalar_prefetch = 0 : i64, scratch_operands = 0 : i64, tpu.core_type = #tpu.core_type<tc>} {
    %c0 = arith.constant 0 : index
    %c0_0 = arith.constant 0 : index
    %0 = vector.load %arg0[%c0, %c0_0] : memref<256x128xbf16, #tpu.memory_space<vmem>>, vector<256x128xbf16>
    %c0_1 = arith.constant 0 : index
    %c0_2 = arith.constant 0 : index
    %1 = vector.load %arg1[%c0_1, %c0_2] : memref<640x256xbf16, #tpu.memory_space<vmem>>, vector<640x256xbf16>
    %cst = arith.constant dense<0.000000e+00> : vector<640x128xf32>
    %2 = tpu.matmul %1, %0, %cst {dimension_numbers = #tpu.dot_dimension_numbers<[1], [0], [0], [1], [0, 0, 1, 1], [], []>} : vector<640x256xbf16>, vector<256x128xbf16>, vector<640x128xf32> -> vector<640x128xf32>
    %3 = arith.truncf %2 : vector<640x128xf32> to vector<640x128xbf16>
    %4 = vector.extract_strided_slice %3 {offsets = [0, 0], sizes = [128, 128], strides = [1, 1]} : vector<640x128xbf16> to vector<128x128xbf16>
    %5 = vector.extract_strided_slice %3 {offsets = [128, 0], sizes = [128, 128], strides = [1, 1]} : vector<640x128xbf16> to vector<128x128xbf16>
    %6 = vector.extract_strided_slice %3 {offsets = [256, 0], sizes = [128, 128], strides = [1, 1]} : vector<640x128xbf16> to vector<128x128xbf16>
    %7 = vector.extract_strided_slice %3 {offsets = [384, 0], sizes = [128, 128], strides = [1, 1]} : vector<640x128xbf16> to vector<128x128xbf16>
    %8 = vector.extract_strided_slice %3 {offsets = [512, 0], sizes = [128, 128], strides = [1, 1]} : vector<640x128xbf16> to vector<128x128xbf16>
    %9 = tpu.concatenate %4, %5, %6, %7, %8 in 1 : vector<128x128xbf16>, vector<128x128xbf16>, vector<128x128xbf16>, vector<128x128xbf16>, vector<128x128xbf16> -> vector<128x640xbf16>
    %c0_3 = arith.constant 0 : index
    %c0_4 = arith.constant 0 : index
    %10 = vector.load %arg2[%c0_3, %c0_4] : memref<640x128xbf16, #tpu.memory_space<vmem>>, vector<640x128xbf16>
    %cst_5 = arith.constant dense<0.000000e+00> : vector<128x128xf32>
    %11 = tpu.matmul %9, %10, %cst_5 {dimension_numbers = #tpu.dot_dimension_numbers<[1], [0], [0], [1], [0, 0, 1, 1], [], []>} : vector<128x640xbf16>, vector<640x128xbf16>, vector<128x128xf32> -> vector<128x128xf32>
    %c0_6 = arith.constant 0 : index
    %c0_7 = arith.constant 0 : index
    %c0_8 = arith.constant 0 : index
    %12 = vector.load %arg9[%c0_6, %c0_7, %c0_8] : memref<4x3x128xf32, #tpu.memory_space<vmem>>, vector<1x3x128xf32>
    %13 = vector.shape_cast %12 : vector<1x3x128xf32> to vector<3x128xf32>
    %14 = vector.extract_strided_slice %13 {offsets = [0, 0], sizes = [1, 128], strides = [1, 1]} : vector<3x128xf32> to vector<1x128xf32>
    %15 = vector.broadcast %14 : vector<1x128xf32> to vector<128x128xf32>
    %16 = arith.addf %11, %15 : vector<128x128xf32>
    %cst_9 = arith.constant 0.000000e+00 : f32
    %17 = vector.broadcast %cst_9 : f32 to vector<128x128xf32>
    %18 = arith.maximumf %16, %17 : vector<128x128xf32>
    %cst_10 = arith.constant dense<0.000000e+00> : vector<128xf32>
    %19 = vector.multi_reduction <add>, %18, %cst_10 [0] : vector<128x128xf32> to vector<128xf32>
    %20 = vector.shape_cast %19 : vector<128xf32> to vector<1x128xf32>
    %c8_i32 = arith.constant 8 : i32
    %21 = tpu.dynamic_rotate %20 by %c8_i32 dim 1 : vector<1x128xf32>, i32 -> vector<1x128xf32>
    %22 = arith.addf %20, %21 : vector<1x128xf32>
    %c16_i32 = arith.constant 16 : i32
    %23 = tpu.dynamic_rotate %22 by %c16_i32 dim 1 : vector<1x128xf32>, i32 -> vector<1x128xf32>
    %24 = arith.addf %22, %23 : vector<1x128xf32>
    %c32_i32 = arith.constant 32 : i32
    %25 = tpu.dynamic_rotate %24 by %c32_i32 dim 1 : vector<1x128xf32>, i32 -> vector<1x128xf32>
    %26 = arith.addf %24, %25 : vector<1x128xf32>
    %c64_i32 = arith.constant 64 : i32
    %27 = tpu.dynamic_rotate %26 by %c64_i32 dim 1 : vector<1x128xf32>, i32 -> vector<1x128xf32>
    %28 = arith.addf %26, %27 : vector<1x128xf32>
    %cst_11 = arith.constant 4.8828125E-4 : f32
    %29 = vector.broadcast %cst_11 : f32 to vector<1x128xf32>
    %30 = arith.mulf %28, %29 : vector<1x128xf32>
    %31 = vector.broadcast %30 : vector<1x128xf32> to vector<128x128xf32>
    %32 = arith.subf %18, %31 : vector<128x128xf32>
    %33 = arith.mulf %32, %32 : vector<128x128xf32>
    %cst_12 = arith.constant dense<0.000000e+00> : vector<128xf32>
    %34 = vector.multi_reduction <add>, %33, %cst_12 [0] : vector<128x128xf32> to vector<128xf32>
    %35 = vector.shape_cast %34 : vector<128xf32> to vector<1x128xf32>
    %c8_i32_13 = arith.constant 8 : i32
    %36 = tpu.dynamic_rotate %35 by %c8_i32_13 dim 1 : vector<1x128xf32>, i32 -> vector<1x128xf32>
    %37 = arith.addf %35, %36 : vector<1x128xf32>
    %c16_i32_14 = arith.constant 16 : i32
    %38 = tpu.dynamic_rotate %37 by %c16_i32_14 dim 1 : vector<1x128xf32>, i32 -> vector<1x128xf32>
    %39 = arith.addf %37, %38 : vector<1x128xf32>
    %c32_i32_15 = arith.constant 32 : i32
    %40 = tpu.dynamic_rotate %39 by %c32_i32_15 dim 1 : vector<1x128xf32>, i32 -> vector<1x128xf32>
    %41 = arith.addf %39, %40 : vector<1x128xf32>
    %c64_i32_16 = arith.constant 64 : i32
    %42 = tpu.dynamic_rotate %41 by %c64_i32_16 dim 1 : vector<1x128xf32>, i32 -> vector<1x128xf32>
    %43 = arith.addf %41, %42 : vector<1x128xf32>
    %cst_17 = arith.constant 4.8828125E-4 : f32
    %44 = vector.broadcast %cst_17 : f32 to vector<1x128xf32>
    %45 = arith.mulf %43, %44 : vector<1x128xf32>
    %cst_18 = arith.constant 9.99999974E-6 : f32
    %46 = vector.broadcast %cst_18 : f32 to vector<1x128xf32>
    %47 = arith.addf %45, %46 : vector<1x128xf32>
    %48 = math.rsqrt %47 : vector<1x128xf32>
    %49 = vector.extract_strided_slice %13 {offsets = [1, 0], sizes = [1, 128], strides = [1, 1]} : vector<3x128xf32> to vector<1x128xf32>
    %50 = arith.mulf %49, %48 : vector<1x128xf32>
    %51 = vector.broadcast %50 : vector<1x128xf32> to vector<128x128xf32>
    %52 = arith.mulf %32, %51 : vector<128x128xf32>
    %53 = vector.extract_strided_slice %13 {offsets = [2, 0], sizes = [1, 128], strides = [1, 1]} : vector<3x128xf32> to vector<1x128xf32>
    %54 = vector.broadcast %53 : vector<1x128xf32> to vector<128x128xf32>
    %55 = arith.addf %52, %54 : vector<128x128xf32>
    %56 = arith.truncf %55 : vector<128x128xf32> to vector<128x128xbf16>
    %c0_19 = arith.constant 0 : index
    %c0_20 = arith.constant 0 : index
    %57 = vector.load %arg3[%c0_19, %c0_20] : memref<192x128xbf16, #tpu.memory_space<vmem>>, vector<192x128xbf16>
    %cst_21 = arith.constant dense<0.000000e+00> : vector<192x128xf32>
    %58 = tpu.matmul %57, %56, %cst_21 {dimension_numbers = #tpu.dot_dimension_numbers<[1], [0], [0], [1], [0, 0, 1, 1], [], []>} : vector<192x128xbf16>, vector<128x128xbf16>, vector<192x128xf32> -> vector<192x128xf32>
    %59 = arith.truncf %58 : vector<192x128xf32> to vector<192x128xbf16>
    %60 = vector.extract_strided_slice %59 {offsets = [0, 0], sizes = [64, 128], strides = [1, 1]} : vector<192x128xbf16> to vector<64x128xbf16>
    %61 = vector.extract_strided_slice %59 {offsets = [64, 0], sizes = [64, 128], strides = [1, 1]} : vector<192x128xbf16> to vector<64x128xbf16>
    %62 = vector.extract_strided_slice %59 {offsets = [128, 0], sizes = [64, 128], strides = [1, 1]} : vector<192x128xbf16> to vector<64x128xbf16>
    %63 = tpu.concatenate %60, %61, %62 in 1 : vector<64x128xbf16>, vector<64x128xbf16>, vector<64x128xbf16> -> vector<64x384xbf16>
    %c0_22 = arith.constant 0 : index
    %c0_23 = arith.constant 0 : index
    %64 = vector.load %arg4[%c0_22, %c0_23] : memref<384x128xbf16, #tpu.memory_space<vmem>>, vector<384x128xbf16>
    %cst_24 = arith.constant dense<0.000000e+00> : vector<64x128xf32>
    %65 = tpu.matmul %63, %64, %cst_24 {dimension_numbers = #tpu.dot_dimension_numbers<[1], [0], [0], [1], [0, 0, 1, 1], [], []>} : vector<64x384xbf16>, vector<384x128xbf16>, vector<64x128xf32> -> vector<64x128xf32>
    %c1 = arith.constant 1 : index
    %c0_25 = arith.constant 0 : index
    %c0_26 = arith.constant 0 : index
    %66 = vector.load %arg9[%c1, %c0_25, %c0_26] : memref<4x3x128xf32, #tpu.memory_space<vmem>>, vector<1x3x128xf32>
    %67 = vector.shape_cast %66 : vector<1x3x128xf32> to vector<3x128xf32>
    %68 = vector.extract_strided_slice %67 {offsets = [0, 0], sizes = [1, 128], strides = [1, 1]} : vector<3x128xf32> to vector<1x128xf32>
    %69 = vector.broadcast %68 : vector<1x128xf32> to vector<64x128xf32>
    %70 = arith.addf %65, %69 : vector<64x128xf32>
    %cst_27 = arith.constant 0.000000e+00 : f32
    %71 = vector.broadcast %cst_27 : f32 to vector<64x128xf32>
    %72 = arith.maximumf %70, %71 : vector<64x128xf32>
    %cst_28 = arith.constant dense<0.000000e+00> : vector<128xf32>
    %73 = vector.multi_reduction <add>, %72, %cst_28 [0] : vector<64x128xf32> to vector<128xf32>
    %74 = vector.shape_cast %73 : vector<128xf32> to vector<1x128xf32>
    %c16_i32_29 = arith.constant 16 : i32
    %75 = tpu.dynamic_rotate %74 by %c16_i32_29 dim 1 : vector<1x128xf32>, i32 -> vector<1x128xf32>
    %76 = arith.addf %74, %75 : vector<1x128xf32>
    %c32_i32_30 = arith.constant 32 : i32
    %77 = tpu.dynamic_rotate %76 by %c32_i32_30 dim 1 : vector<1x128xf32>, i32 -> vector<1x128xf32>
    %78 = arith.addf %76, %77 : vector<1x128xf32>
    %c64_i32_31 = arith.constant 64 : i32
    %79 = tpu.dynamic_rotate %78 by %c64_i32_31 dim 1 : vector<1x128xf32>, i32 -> vector<1x128xf32>
    %80 = arith.addf %78, %79 : vector<1x128xf32>
    %cst_32 = arith.constant 0.001953125 : f32
    %81 = vector.broadcast %cst_32 : f32 to vector<1x128xf32>
    %82 = arith.mulf %80, %81 : vector<1x128xf32>
    %83 = vector.broadcast %82 : vector<1x128xf32> to vector<64x128xf32>
    %84 = arith.subf %72, %83 : vector<64x128xf32>
    %85 = arith.mulf %84, %84 : vector<64x128xf32>
    %cst_33 = arith.constant dense<0.000000e+00> : vector<128xf32>
    %86 = vector.multi_reduction <add>, %85, %cst_33 [0] : vector<64x128xf32> to vector<128xf32>
    %87 = vector.shape_cast %86 : vector<128xf32> to vector<1x128xf32>
    %c16_i32_34 = arith.constant 16 : i32
    %88 = tpu.dynamic_rotate %87 by %c16_i32_34 dim 1 : vector<1x128xf32>, i32 -> vector<1x128xf32>
    %89 = arith.addf %87, %88 : vector<1x128xf32>
    %c32_i32_35 = arith.constant 32 : i32
    %90 = tpu.dynamic_rotate %89 by %c32_i32_35 dim 1 : vector<1x128xf32>, i32 -> vector<1x128xf32>
    %91 = arith.addf %89, %90 : vector<1x128xf32>
    %c64_i32_36 = arith.constant 64 : i32
    %92 = tpu.dynamic_rotate %91 by %c64_i32_36 dim 1 : vector<1x128xf32>, i32 -> vector<1x128xf32>
    %93 = arith.addf %91, %92 : vector<1x128xf32>
    %cst_37 = arith.constant 0.001953125 : f32
    %94 = vector.broadcast %cst_37 : f32 to vector<1x128xf32>
    %95 = arith.mulf %93, %94 : vector<1x128xf32>
    %cst_38 = arith.constant 9.99999974E-6 : f32
    %96 = vector.broadcast %cst_38 : f32 to vector<1x128xf32>
    %97 = arith.addf %95, %96 : vector<1x128xf32>
    %98 = math.rsqrt %97 : vector<1x128xf32>
    %99 = vector.extract_strided_slice %67 {offsets = [1, 0], sizes = [1, 128], strides = [1, 1]} : vector<3x128xf32> to vector<1x128xf32>
    %100 = arith.mulf %99, %98 : vector<1x128xf32>
    %101 = vector.broadcast %100 : vector<1x128xf32> to vector<64x128xf32>
    %102 = arith.mulf %84, %101 : vector<64x128xf32>
    %103 = vector.extract_strided_slice %67 {offsets = [2, 0], sizes = [1, 128], strides = [1, 1]} : vector<3x128xf32> to vector<1x128xf32>
    %104 = vector.broadcast %103 : vector<1x128xf32> to vector<64x128xf32>
    %105 = arith.addf %102, %104 : vector<64x128xf32>
    %106 = arith.truncf %105 : vector<64x128xf32> to vector<64x128xbf16>
    %c0_39 = arith.constant 0 : index
    %c0_40 = arith.constant 0 : index
    %107 = vector.load %arg5[%c0_39, %c0_40] : memref<96x64xbf16, #tpu.memory_space<vmem>>, vector<96x64xbf16>
    %cst_41 = arith.constant dense<0.000000e+00> : vector<96x128xf32>
    %108 = tpu.matmul %107, %106, %cst_41 {dimension_numbers = #tpu.dot_dimension_numbers<[1], [0], [0], [1], [0, 0, 1, 1], [], []>} : vector<96x64xbf16>, vector<64x128xbf16>, vector<96x128xf32> -> vector<96x128xf32>
    %109 = arith.truncf %108 : vector<96x128xf32> to vector<96x128xbf16>
    %110 = vector.extract_strided_slice %109 {offsets = [0, 0], sizes = [32, 128], strides = [1, 1]} : vector<96x128xbf16> to vector<32x128xbf16>
    %111 = vector.extract_strided_slice %109 {offsets = [32, 0], sizes = [32, 128], strides = [1, 1]} : vector<96x128xbf16> to vector<32x128xbf16>
    %112 = vector.extract_strided_slice %109 {offsets = [64, 0], sizes = [32, 128], strides = [1, 1]} : vector<96x128xbf16> to vector<32x128xbf16>
    %113 = tpu.concatenate %110, %111, %112 in 1 : vector<32x128xbf16>, vector<32x128xbf16>, vector<32x128xbf16> -> vector<32x384xbf16>
    %c0_42 = arith.constant 0 : index
    %c0_43 = arith.constant 0 : index
    %114 = vector.load %arg6[%c0_42, %c0_43] : memref<384x128xbf16, #tpu.memory_space<vmem>>, vector<384x128xbf16>
    %cst_44 = arith.constant dense<0.000000e+00> : vector<32x128xf32>
    %115 = tpu.matmul %113, %114, %cst_44 {dimension_numbers = #tpu.dot_dimension_numbers<[1], [0], [0], [1], [0, 0, 1, 1], [], []>} : vector<32x384xbf16>, vector<384x128xbf16>, vector<32x128xf32> -> vector<32x128xf32>
    %c2 = arith.constant 2 : index
    %c0_45 = arith.constant 0 : index
    %c0_46 = arith.constant 0 : index
    %116 = vector.load %arg9[%c2, %c0_45, %c0_46] : memref<4x3x128xf32, #tpu.memory_space<vmem>>, vector<1x3x128xf32>
    %117 = vector.shape_cast %116 : vector<1x3x128xf32> to vector<3x128xf32>
    %118 = vector.extract_strided_slice %117 {offsets = [0, 0], sizes = [1, 128], strides = [1, 1]} : vector<3x128xf32> to vector<1x128xf32>
    %119 = vector.broadcast %118 : vector<1x128xf32> to vector<32x128xf32>
    %120 = arith.addf %115, %119 : vector<32x128xf32>
    %cst_47 = arith.constant 0.000000e+00 : f32
    %121 = vector.broadcast %cst_47 : f32 to vector<32x128xf32>
    %122 = arith.maximumf %120, %121 : vector<32x128xf32>
    %cst_48 = arith.constant dense<0.000000e+00> : vector<128xf32>
    %123 = vector.multi_reduction <add>, %122, %cst_48 [0] : vector<32x128xf32> to vector<128xf32>
    %124 = vector.shape_cast %123 : vector<128xf32> to vector<1x128xf32>
    %c32_i32_49 = arith.constant 32 : i32
    %125 = tpu.dynamic_rotate %124 by %c32_i32_49 dim 1 : vector<1x128xf32>, i32 -> vector<1x128xf32>
    %126 = arith.addf %124, %125 : vector<1x128xf32>
    %c64_i32_50 = arith.constant 64 : i32
    %127 = tpu.dynamic_rotate %126 by %c64_i32_50 dim 1 : vector<1x128xf32>, i32 -> vector<1x128xf32>
    %128 = arith.addf %126, %127 : vector<1x128xf32>
    %cst_51 = arith.constant 7.812500e-03 : f32
    %129 = vector.broadcast %cst_51 : f32 to vector<1x128xf32>
    %130 = arith.mulf %128, %129 : vector<1x128xf32>
    %131 = vector.broadcast %130 : vector<1x128xf32> to vector<32x128xf32>
    %132 = arith.subf %122, %131 : vector<32x128xf32>
    %133 = arith.mulf %132, %132 : vector<32x128xf32>
    %cst_52 = arith.constant dense<0.000000e+00> : vector<128xf32>
    %134 = vector.multi_reduction <add>, %133, %cst_52 [0] : vector<32x128xf32> to vector<128xf32>
    %135 = vector.shape_cast %134 : vector<128xf32> to vector<1x128xf32>
    %c32_i32_53 = arith.constant 32 : i32
    %136 = tpu.dynamic_rotate %135 by %c32_i32_53 dim 1 : vector<1x128xf32>, i32 -> vector<1x128xf32>
    %137 = arith.addf %135, %136 : vector<1x128xf32>
    %c64_i32_54 = arith.constant 64 : i32
    %138 = tpu.dynamic_rotate %137 by %c64_i32_54 dim 1 : vector<1x128xf32>, i32 -> vector<1x128xf32>
    %139 = arith.addf %137, %138 : vector<1x128xf32>
    %cst_55 = arith.constant 7.812500e-03 : f32
    %140 = vector.broadcast %cst_55 : f32 to vector<1x128xf32>
    %141 = arith.mulf %139, %140 : vector<1x128xf32>
    %cst_56 = arith.constant 9.99999974E-6 : f32
    %142 = vector.broadcast %cst_56 : f32 to vector<1x128xf32>
    %143 = arith.addf %141, %142 : vector<1x128xf32>
    %144 = math.rsqrt %143 : vector<1x128xf32>
    %145 = vector.extract_strided_slice %117 {offsets = [1, 0], sizes = [1, 128], strides = [1, 1]} : vector<3x128xf32> to vector<1x128xf32>
    %146 = arith.mulf %145, %144 : vector<1x128xf32>
    %147 = vector.broadcast %146 : vector<1x128xf32> to vector<32x128xf32>
    %148 = arith.mulf %132, %147 : vector<32x128xf32>
    %149 = vector.extract_strided_slice %117 {offsets = [2, 0], sizes = [1, 128], strides = [1, 1]} : vector<3x128xf32> to vector<1x128xf32>
    %150 = vector.broadcast %149 : vector<1x128xf32> to vector<32x128xf32>
    %151 = arith.addf %148, %150 : vector<32x128xf32>
    %152 = arith.truncf %151 : vector<32x128xf32> to vector<32x128xbf16>
    %c0_57 = arith.constant 0 : index
    %c0_58 = arith.constant 0 : index
    %153 = vector.load %arg7[%c0_57, %c0_58] : memref<48x32xbf16, #tpu.memory_space<vmem>>, vector<48x32xbf16>
    %cst_59 = arith.constant dense<0.000000e+00> : vector<48x128xf32>
    %154 = tpu.matmul %153, %152, %cst_59 {dimension_numbers = #tpu.dot_dimension_numbers<[1], [0], [0], [1], [0, 0, 1, 1], [], []>} : vector<48x32xbf16>, vector<32x128xbf16>, vector<48x128xf32> -> vector<48x128xf32>
    %155 = arith.truncf %154 : vector<48x128xf32> to vector<48x128xbf16>
    %156 = vector.extract_strided_slice %155 {offsets = [0, 0], sizes = [16, 128], strides = [1, 1]} : vector<48x128xbf16> to vector<16x128xbf16>
    %157 = vector.extract_strided_slice %155 {offsets = [16, 0], sizes = [16, 128], strides = [1, 1]} : vector<48x128xbf16> to vector<16x128xbf16>
    %158 = vector.extract_strided_slice %155 {offsets = [32, 0], sizes = [16, 128], strides = [1, 1]} : vector<48x128xbf16> to vector<16x128xbf16>
    %159 = tpu.concatenate %156, %157, %158 in 1 : vector<16x128xbf16>, vector<16x128xbf16>, vector<16x128xbf16> -> vector<16x384xbf16>
    %c0_60 = arith.constant 0 : index
    %c0_61 = arith.constant 0 : index
    %160 = vector.load %arg8[%c0_60, %c0_61] : memref<384x128xbf16, #tpu.memory_space<vmem>>, vector<384x128xbf16>
    %cst_62 = arith.constant dense<0.000000e+00> : vector<16x128xf32>
    %161 = tpu.matmul %159, %160, %cst_62 {dimension_numbers = #tpu.dot_dimension_numbers<[1], [0], [0], [1], [0, 0, 1, 1], [], []>} : vector<16x384xbf16>, vector<384x128xbf16>, vector<16x128xf32> -> vector<16x128xf32>
    %c3 = arith.constant 3 : index
    %c0_63 = arith.constant 0 : index
    %c0_64 = arith.constant 0 : index
    %162 = vector.load %arg9[%c3, %c0_63, %c0_64] : memref<4x3x128xf32, #tpu.memory_space<vmem>>, vector<1x3x128xf32>
    %163 = vector.shape_cast %162 : vector<1x3x128xf32> to vector<3x128xf32>
    %164 = vector.extract_strided_slice %163 {offsets = [0, 0], sizes = [1, 128], strides = [1, 1]} : vector<3x128xf32> to vector<1x128xf32>
    %165 = vector.broadcast %164 : vector<1x128xf32> to vector<16x128xf32>
    %166 = arith.addf %161, %165 : vector<16x128xf32>
    %cst_65 = arith.constant 0.000000e+00 : f32
    %167 = vector.broadcast %cst_65 : f32 to vector<16x128xf32>
    %168 = arith.maximumf %166, %167 : vector<16x128xf32>
    %cst_66 = arith.constant dense<0.000000e+00> : vector<128xf32>
    %169 = vector.multi_reduction <add>, %168, %cst_66 [0] : vector<16x128xf32> to vector<128xf32>
    %170 = vector.shape_cast %169 : vector<128xf32> to vector<1x128xf32>
    %c64_i32_67 = arith.constant 64 : i32
    %171 = tpu.dynamic_rotate %170 by %c64_i32_67 dim 1 : vector<1x128xf32>, i32 -> vector<1x128xf32>
    %172 = arith.addf %170, %171 : vector<1x128xf32>
    %cst_68 = arith.constant 3.125000e-02 : f32
    %173 = vector.broadcast %cst_68 : f32 to vector<1x128xf32>
    %174 = arith.mulf %172, %173 : vector<1x128xf32>
    %175 = vector.broadcast %174 : vector<1x128xf32> to vector<16x128xf32>
    %176 = arith.subf %168, %175 : vector<16x128xf32>
    %177 = arith.mulf %176, %176 : vector<16x128xf32>
    %cst_69 = arith.constant dense<0.000000e+00> : vector<128xf32>
    %178 = vector.multi_reduction <add>, %177, %cst_69 [0] : vector<16x128xf32> to vector<128xf32>
    %179 = vector.shape_cast %178 : vector<128xf32> to vector<1x128xf32>
    %c64_i32_70 = arith.constant 64 : i32
    %180 = tpu.dynamic_rotate %179 by %c64_i32_70 dim 1 : vector<1x128xf32>, i32 -> vector<1x128xf32>
    %181 = arith.addf %179, %180 : vector<1x128xf32>
    %cst_71 = arith.constant 3.125000e-02 : f32
    %182 = vector.broadcast %cst_71 : f32 to vector<1x128xf32>
    %183 = arith.mulf %181, %182 : vector<1x128xf32>
    %cst_72 = arith.constant 9.99999974E-6 : f32
    %184 = vector.broadcast %cst_72 : f32 to vector<1x128xf32>
    %185 = arith.addf %183, %184 : vector<1x128xf32>
    %186 = math.rsqrt %185 : vector<1x128xf32>
    %187 = vector.extract_strided_slice %163 {offsets = [1, 0], sizes = [1, 128], strides = [1, 1]} : vector<3x128xf32> to vector<1x128xf32>
    %188 = arith.mulf %187, %186 : vector<1x128xf32>
    %189 = vector.broadcast %188 : vector<1x128xf32> to vector<16x128xf32>
    %190 = arith.mulf %176, %189 : vector<16x128xf32>
    %191 = vector.extract_strided_slice %163 {offsets = [2, 0], sizes = [1, 128], strides = [1, 1]} : vector<3x128xf32> to vector<1x128xf32>
    %192 = vector.broadcast %191 : vector<1x128xf32> to vector<16x128xf32>
    %193 = arith.addf %190, %192 : vector<16x128xf32>
    %194 = arith.truncf %193 : vector<16x128xf32> to vector<16x128xbf16>
    %c0_73 = arith.constant 0 : index
    %c0_74 = arith.constant 0 : index
    %195 = vector.load %arg10[%c0_73, %c0_74] : memref<8x16xbf16, #tpu.memory_space<vmem>>, vector<8x16xbf16>
    %cst_75 = arith.constant dense<0.000000e+00> : vector<8x128xf32>
    %196 = tpu.matmul %195, %194, %cst_75 {dimension_numbers = #tpu.dot_dimension_numbers<[1], [0], [0], [1], [0, 0, 1, 1], [], []>} : vector<8x16xbf16>, vector<16x128xbf16>, vector<8x128xf32> -> vector<8x128xf32>
    %197 = arith.truncf %196 : vector<8x128xf32> to vector<8x128xbf16>
    %c0_76 = arith.constant 0 : index
    %c0_77 = arith.constant 0 : index
    %198 = vector.load %arg11[%c0_76, %c0_77] : memref<128x128xbf16, #tpu.memory_space<vmem>>, vector<128x128xbf16>
    %cst_78 = arith.constant dense<0.000000e+00> : vector<8x128xf32>
    %199 = tpu.matmul %197, %198, %cst_78 {dimension_numbers = #tpu.dot_dimension_numbers<[1], [0], [0], [1], [0, 0, 1, 1], [], []>} : vector<8x128xbf16>, vector<128x128xbf16>, vector<8x128xf32> -> vector<8x128xf32>
    %c0_79 = arith.constant 0 : index
    %c0_80 = arith.constant 0 : index
    %200 = vector.load %arg12[%c0_79, %c0_80] : memref<1x128xf32, #tpu.memory_space<vmem>>, vector<1x128xf32>
    %201 = vector.broadcast %200 : vector<1x128xf32> to vector<8x128xf32>
    %202 = arith.addf %199, %201 : vector<8x128xf32>
    %c0_81 = arith.constant 0 : index
    %c0_82 = arith.constant 0 : index
    %203 = vector.load %arg13[%c0_81, %c0_82] : memref<8x128xf32, #tpu.memory_space<vmem>>, vector<8x128xf32>
    tpu.vector_store %arg13[%c0_81, %c0_82], %202 {strides = array<i32>} : memref<8x128xf32, #tpu.memory_space<vmem>>, vector<8x128xf32>,
    return
  }
}

</mosaic_0001>

<bundles_post_ra>
// kernel: audio_classifier_forward.1
= control target key start
LH: loop header
LB: loop body
LE: loop exit
PB: predicated region body
PF: predicated region fallthrough
CT: control target
= control target key end

     0   :  { %18 = vsyncpa [#allocation3], 0  ;;  %s5930_s0 = inlined_call_operand.vmem [shape: bf16[256,128], index: 0, kind: input, shape index: {}]   ;;  %s5931_s1 = inlined_call_operand.hbm [shape: bf16[640,256], index: 1, kind: input, shape index: {}]   ;;  %s5932_s2 = inlined_call_operand.vmem [shape: bf16[640,128], index: 2, kind: input, shape index: {}]   ;;  %s5933_s3 = inlined_call_operand.vmem [shape: bf16[192,128], index: 3, kind: input, shape index: {}]   ;;  %s5934_s4 = inlined_call_operand.vmem [shape: bf16[384,128], index: 4, kind: input, shape index: {}]   ;;  %s5935_s5 = inlined_call_operand.vmem [shape: bf16[96,64], index: 5, kind: input, shape index: {}]   ;;  %s5936_s6 = inlined_call_operand.hbm [shape: bf16[384,128], index: 6, kind: input, shape index: {}]   ;;  %s5937_s7 = inlined_call_operand.vmem [shape: bf16[48,32], index: 7, kind: input, shape index: {}]   ;;  %s5938_s8 = inlined_call_operand.hbm [shape: bf16[384,128], index: 8, kind: input, shape index: {}]   ;;  %s5939_s9 = inlined_call_operand.vmem [shape: f32[4,3,128], index: 9, kind: input, shape index: {}]   ;;  %s5940_s10 = inlined_call_operand.vmem [shape: bf16[8,16], index: 10, kind: input, shape index: {}]   ;;  %s5941_s11 = inlined_call_operand.vmem [shape: bf16[128,128], index: 11, kind: input, shape index: {}]   ;;  %s5942_s12 = inlined_call_operand.vmem [shape: f32[1,128], index: 12, kind: input, shape index: {}]   ;;  %s5943_s13 = inlined_call_operand.hbm [shape: f32[8,128], index: 13, kind: output, shape index: {}]  }
   0x1   :  { %19 = vsyncpa [#allocation6], 0  ;;  %s48_s27 = sshll.u32 %s5936_s6, 4  ;;  %s49_s27 = int_to_ptr.hbm [resolvable:$true] %s48_s27 }
   0x2   :  { %20 = vsyncpa [#allocation4], 0  ;;  %s5109_s28 = smov [#allocation5]   ;;  %s27_s15 = sshll.u32 %s5931_s1, 4  ;;  %s28_s15 = int_to_ptr.hbm [resolvable:$true] %s27_s15 }
   0x3   :  { %s50_s29 = sshll.u32 %s5109_s28, 4  ;;  %s5110_s16 = smov 64   ;;  %s51_s29 = int_to_ptr.vmem [resolvable:$true] %s50_s29 }
   0x4   :  { %s5111_s17 = smov 4   ;;  %s5112_s18 = smov [#allocation2]  }
   0x5   :  { %56 = dma.hbm_to_vmem [thread:$0]  %s49_s27, 3072, %s51_s29, [#allocation6], %s5110_s16, %s5110_s16, %s5111_s17  }
   0x6   :  { %s29_s19 = sshll.u32 %s5112_s18, 4  ;;  %s5113_s20 = smov 128   ;;  %s30_s19 = int_to_ptr.vmem [resolvable:$true] %s29_s19 }
   0x7   :  { %s5114_s6 = smov 8   ;;  %s63_s23 = sshll.u32 %s5938_s8, 4  ;;  %s64_s23 = int_to_ptr.hbm [resolvable:$true] %s63_s23 }
   0x8   :  { %35 = dma.hbm_to_vmem [thread:$0]  %s28_s15, 10240, %s30_s19, [#allocation3], %s5113_s20, %s5113_s20, %s5114_s6  }
   0x9   :  { %s5115_s24 = smov [#allocation7]  }
   0xa   :  { %s65_s1 = sshll.u32 %s5115_s24, 4  ;;  %s66_s1 = int_to_ptr.vmem [resolvable:$true] %s65_s1 }
   0xb   :  { %71 = dma.hbm_to_vmem [thread:$0]  %s64_s23, 3072, %s66_s1, [#allocation6], %s5110_s16, %s5110_s16, %s5111_s17  }
   0xc   :  { %5103 = dma.done.wait [#allocation3], 10240  }
   0xd   :  { %5104 = vsyncadd [#allocation3], 4294957056 }
   0xe   :  { %5105 = dma.done.wait [#allocation6], 6144  }
   0xf   :  { %5106 = vsyncadd [#allocation6], 4294961152  ;;  %v4757_v0 = vld [vmem:[%s5930_s0 + $0x38] sm:$0xff]  ;;  %v4756_v2 = vld [vmem:[%s5930_s0 + $0x30] sm:$0xff]  ;;  %s5117_s26 = smov 32   ;;  %vm2873_vm6 = vcmask 523264  }
  0x10   :  { %v4765_v1 = vld [vmem:[%s5930_s0 + $0x78] sm:$0xff]  ;;  %701 = vmatpush.bf16.msra.mxu0 %v4757_v0  ;;  %v4764_v3 = vld [vmem:[%s5930_s0 + $0x70] sm:$0xff]  ;;  %v4755_v4 = vld [vmem:[%s5930_s0 + $0x28] sm:$0xff]  ;;  %vm3324_vm10 = vcmask 261120   ;;  %vm3671_vm14 = vcmask 130048   ;;  %s5118_s18 = smov [#allocation8]  }
  0x11   :  { %910 = vmatpush.bf16.msra.mxu1 %v4765_v1  ;;  %v4763_v5 = vld [vmem:[%s5930_s0 + $0x68] sm:$0xff]  ;;  %v4754_v6 = vld [vmem:[%s5930_s0 + $0x20] sm:$0xff]  ;;  %v4753_v8 = vld [vmem:[%s5930_s0 + $0x18] sm:$0xff]  ;;  %s3776_s19 = sshll.u32 %s5118_s18, 4  ;;  %s3777_s19 = int_to_ptr.vmem [resolvable:$true] %s3776_s19 }
  0x12   :  { %v4762_v7 = vld [vmem:[%s5930_s0 + $0x60] sm:$0xff]  ;;  %v4761_v9 = vld [vmem:[%s5930_s0 + $0x58] sm:$0xff]  ;;  %v4752_v10 = vld [vmem:[%s5930_s0 + $0x10] sm:$0xff] }
  0x13   :  { %v4760_v11 = vld [vmem:[%s5930_s0 + $0x50] sm:$0xff]  ;;  %v4751_v12 = vld [vmem:[%s5930_s0 + $0x8] sm:$0xff]  ;;  %v4750_v14 = vld [vmem:[%s5930_s0] sm:$0xff] }
  0x14   :  { %702 = vmatpush.bf16.msra.mxu0 %v4756_v2  ;;  %v4759_v13 = vld [vmem:[%s5930_s0 + $0x48] sm:$0xff]  ;;  %v4758_v15 = vld [vmem:[%s5930_s0 + $0x40] sm:$0xff]  ;;  %v3799_v22 = vld [vmem:[#allocation2 + $0x10] sm:$0xf] }
  0x15   :  { %911 = vmatpush.bf16.msra.mxu1 %v4764_v3  ;;  %v3791_v16 = vld [vmem:[#allocation2] sm:$0xf]  ;;  %v4767_v17 = vld [vmem:[#allocation2 + $0x4] sm:$0xf0]  ;;  %v4766_v18 = vld [vmem:[#allocation2 + $0x4] sm:$0xf] }
  0x16   :  { %v3793_v19 = vld [vmem:[#allocation2 + $0x8] sm:$0xf0]  ;;  %v3792_v20 = vor.u32 %v4767_v17, %v3791_v16  ;;  %v4769_v23 = vld [vmem:[#allocation2 + $0x14] sm:$0xf0]  ;;  %v4768_v24 = vld [vmem:[#allocation2 + $0x14] sm:$0xf] }
  0x17   :  { %v3796_v21 = vor.u32 %v4766_v18, %v3793_v19  ;;  %v3801_v25 = vld [vmem:[#allocation2 + $0x18] sm:$0xf0]  ;;  %v3800_v26 = vor.u32 %v4769_v23, %v3799_v22  ;;  %v3807_v28 = vld [vmem:[#allocation2 + $0x20] sm:$0xf]  ;;  %v4771_v29 = vld [vmem:[#allocation2 + $0x24] sm:$0xf0] }
  0x18   :  { %703 = vmatpush.bf16.msra.mxu0 %v4755_v4  ;;  %v3804_v27 = vor.u32 %v4768_v24, %v3801_v25  ;;  %v4770_v30 = vld [vmem:[#allocation2 + $0x24] sm:$0xf]  ;;  %v3809_v31 = vld [vmem:[#allocation2 + $0x28] sm:$0xf0]  ;;  %v3808_v32 = vor.u32 %v4771_v29, %v3807_v28  ;;  %v3815_v34 = vld [vmem:[#allocation2 + $0x30] sm:$0xf] }
  0x19   :  { %912 = vmatpush.bf16.msra.mxu1 %v4763_v5  ;;  %v3812_v33 = vor.u32 %v4770_v30, %v3809_v31  ;;  %v4773_v35 = vld [vmem:[#allocation2 + $0x34] sm:$0xf0]  ;;  %v4772_v36 = vld [vmem:[#allocation2 + $0x34] sm:$0xf]  ;;  %v3817_v37 = vld [vmem:[#allocation2 + $0x38] sm:$0xf0] }
  0x1a   :  { %v3816_v38 = vor.u32 %v4773_v35, %v3815_v34  ;;  %v3820_v39 = vor.u32 %v4772_v36, %v3817_v37  ;;  %v3823_v40 = vld [vmem:[#allocation2 + $0x40] sm:$0xf]  ;;  %v4775_v41 = vld [vmem:[#allocation2 + $0x44] sm:$0xf0]  ;;  %v4774_v42 = vld [vmem:[#allocation2 + $0x44] sm:$0xf] }
  0x1b   :  { %v3825_v43 = vld [vmem:[#allocation2 + $0x48] sm:$0xf0]  ;;  %v3824_v44 = vor.u32 %v4775_v41, %v3823_v40  ;;  %v4853_v46 = vld [vmem:[%s5932_s2 + $0x38] sm:$0xff]  ;;  %v3831_v47 = vld [vmem:[#allocation2 + $0x50] sm:$0xf] }
  0x1c   :  { %704 = vmatpush.bf16.msra.mxu0 %v4754_v6  ;;  %v3828_v45 = vor.u32 %v4774_v42, %v3825_v43  ;;  %1761 = vmatpush.bf16.msra.mxu2 %v4853_v46  ;;  %v4777_v48 = vld [vmem:[#allocation2 + $0x54] sm:$0xf0]  ;;  %v4776_v49 = vld [vmem:[#allocation2 + $0x54] sm:$0xf]  ;;  %v3833_v50 = vld [vmem:[#allocation2 + $0x58] sm:$0xf0] }
  0x1d   :  { %913 = vmatpush.bf16.msra.mxu1 %v4762_v7  ;;  %v3832_v51 = vor.u32 %v4777_v48, %v3831_v47  ;;  %v3836_v52 = vor.u32 %v4776_v49, %v3833_v50  ;;  %v4852_v53 = vld [vmem:[%s5932_s2 + $0x30] sm:$0xff]  ;;  %v4851_v54 = vld [vmem:[%s5932_s2 + $0x28] sm:$0xff]  ;;  %v4850_v55 = vld [vmem:[%s5932_s2 + $0x20] sm:$0xff] }
  0x1e   :  { %v3839_v56 = vld [vmem:[#allocation2 + $0x60] sm:$0xf]  ;;  %v4779_v57 = vld [vmem:[#allocation2 + $0x64] sm:$0xf0]  ;;  %v4778_v58 = vld [vmem:[#allocation2 + $0x64] sm:$0xf] }
  0x1f   :  { %v3841_v59 = vld [vmem:[#allocation2 + $0x68] sm:$0xf0]  ;;  %v3840_v60 = vor.u32 %v4779_v57, %v3839_v56  ;;  %v4849_v62 = vld [vmem:[%s5932_s2 + $0x18] sm:$0xff]  ;;  %v4848_v63 = vld [vmem:[%s5932_s2 + $0x10] sm:$0xff] }
  0x20   :  { %705 = vmatpush.bf16.msra.mxu0 %v4753_v8  ;;  %1762 = vmatpush.bf16.msra.mxu2 %v4852_v53  ;;  %v3844_v61 = vor.u32 %v4778_v58, %v3841_v59  ;;  %v4847_v0 = vld [vmem:[%s5932_s2 + $0x8] sm:$0xff]  ;;  %v3847_v1 = vld [vmem:[#allocation2 + $0x70] sm:$0xf]  ;;  %v4781_v2 = vld [vmem:[#allocation2 + $0x74] sm:$0xf0] }
  0x21   :  { %914 = vmatpush.bf16.msra.mxu1 %v4761_v9  ;;  %v4780_v3 = vld [vmem:[#allocation2 + $0x74] sm:$0xf]  ;;  %v3849_v4 = vld [vmem:[#allocation2 + $0x78] sm:$0xf0]  ;;  %v4846_v5 = vld [vmem:[%s5932_s2] sm:$0xff]  ;;  %v3848_v6 = vor.u32 %v4781_v2, %v3847_v1 }
  0x22   :  { %v3852_v7 = vor.u32 %v4780_v3, %v3849_v4  ;;  %v3855_v8 = vld [vmem:[#allocation2 + $0x80] sm:$0xf]  ;;  %v4783_v9 = vld [vmem:[#allocation2 + $0x84] sm:$0xf0]  ;;  %v3863_v22 = vld [vmem:[#allocation2 + $0x90] sm:$0xf] }
  0x23   :  { %v4785_v23 = vld [vmem:[#allocation2 + $0x94] sm:$0xf0]  ;;  %v4784_v24 = vld [vmem:[#allocation2 + $0x94] sm:$0xf]  ;;  %v3865_v25 = vld [vmem:[#allocation2 + $0x98] sm:$0xf0] }
  0x24   :  { %706 = vmatpush.bf16.msra.mxu0 %v4752_v10  ;;  %1763 = vmatpush.bf16.msra.mxu2 %v4851_v54  ;;  %v4782_v10 = vld [vmem:[#allocation2 + $0x84] sm:$0xf]  ;;  %v3864_v29 = vor.u32 %v4785_v23, %v3863_v22  ;;  %v3868_v30 = vor.u32 %v4784_v24, %v3865_v25  ;;  %v4787_v40 = vld [vmem:[#allocation2 + $0xa4] sm:$0xf0]  ;;  %v3873_v42 = vld [vmem:[#allocation2 + $0xa8] sm:$0xf0] }
  0x25   :  { %915 = vmatpush.bf16.msra.mxu1 %v4760_v11  ;;  %v3857_v11 = vld [vmem:[#allocation2 + $0x88] sm:$0xf0]  ;;  %v4786_v41 = vld [vmem:[#allocation2 + $0xa4] sm:$0xf]  ;;  %v3879_v56 = vld [vmem:[#allocation2 + $0xb0] sm:$0xf] }
  0x26   :  { %v3876_v47 = vor.u32 %v4786_v41, %v3873_v42  ;;  %v4789_v57 = vld [vmem:[#allocation2 + $0xb4] sm:$0xf0]  ;;  %v4788_v58 = vld [vmem:[#allocation2 + $0xb4] sm:$0xf]  ;;  %v3881_v59 = vld [vmem:[#allocation2 + $0xb8] sm:$0xf0] }
  0x27   :  { %v4859_v42 = vld [vmem:[%s5932_s2 + $0x68] sm:$0xff] }
  0x28   :  { %707 = vmatpush.bf16.msra.mxu0 %v4751_v12  ;;  %1764 = vmatpush.bf16.msra.mxu2 %v4850_v55  ;;  %v3856_v12 = vor.u32 %v4783_v9, %v3855_v8  ;;  %v3887_v9 = vld [vmem:[#allocation2 + $0xc0] sm:$0xf] }
  0x29   :  { %916 = vmatpush.bf16.msra.mxu1 %v4759_v13  ;;  %v3860_v13 = vor.u32 %v4782_v10, %v3857_v11  ;;  %v4791_v10 = vld [vmem:[#allocation2 + $0xc4] sm:$0xf0]  ;;  %v4790_v11 = vld [vmem:[#allocation2 + $0xc4] sm:$0xf] }
  0x2c   :  { %708 = vmatpush.bf16.msra.mxu0 %v4750_v14  ;;  %1765 = vmatpush.bf16.msra.mxu2 %v4849_v62 }
  0x2d   :  { %917 = vmatpush.bf16.msra.mxu1 %v4758_v15 }
  0x2f   :  { %709 = vmatmul.bf16.vlgmr.msra.gmra.mxu0 %v3792_v20 }
  0x30   :  { %918 = vmatmul.bf16.vlgmr.msra.gmra.mxu1 %v3796_v21  ;;  %1766 = vmatpush.bf16.msra.mxu2 %v4848_v63  ;;  %v3880_v63 = vor.u32 %v4789_v57, %v3879_v56 }
  0x34   :  { %1767 = vmatpush.bf16.msra.mxu2 %v4847_v0  ;;  %v3884_v0 = vor.u32 %v4788_v58, %v3881_v59  ;;  %v4857_v58 = vld [vmem:[%s5932_s2 + $0x58] sm:$0xff]  ;;  %v4856_v59 = vld [vmem:[%s5932_s2 + $0x50] sm:$0xff] }
  0x38   :  { %1768 = vmatpush.bf16.msra.mxu2 %v4846_v5 }
  0x3f   :  { %714 = vmatmul.bf16.gmra.mxu0 %v3800_v26 }
  0x40   :  { %923 = vmatmul.bf16.gmra.mxu1 %v3804_v27 }
  0x4f   :  { %719 = vmatmul.bf16.gmra.mxu0 %v3808_v32 }
  0x50   :  { %928 = vmatmul.bf16.gmra.mxu1 %v3812_v33 }
  0x5f   :  { %724 = vmatmul.bf16.gmra.mxu0 %v3816_v38 }
  0x60   :  { %933 = vmatmul.bf16.gmra.mxu1 %v3820_v39  ;;  %v3871_v39 = vld [vmem:[#allocation2 + $0xa0] sm:$0xf] }
  0x61   :  { %v3872_v46 = vor.u32 %v4787_v40, %v3871_v39 }
  0x6f   :  { %729 = vmatmul.bf16.gmra.mxu0 %v3824_v44 }
  0x70   :  { %938 = vmatmul.bf16.gmra.mxu1 %v3828_v45 }
  0x7f   :  { %734 = vmatmul.bf16.gmra.mxu0 %v3832_v51 }
  0x80   :  { %943 = vmatmul.bf16.gmra.mxu1 %v3836_v52 }
  0x8f   :  { %739 = vmatmul.bf16.gmra.mxu0 %v3840_v60 }
  0x90   :  { %948 = vmatmul.bf16.gmra.mxu1 %v3844_v61 }
  0x9f   :  { %744 = vmatmul.bf16.gmra.mxu0 %v3848_v6 }
  0xa0   :  { %953 = vmatmul.bf16.gmra.mxu1 %v3852_v7 }
  0xac   :  { %v710_v14 = vpop.f32.mrf.mxu0 }
  0xad   :  { %v919_v15 = vpop.f32.mrf.mxu1 }
  0xae   :  { %v920_v16 = vadd.f32 %v919_v15, %v710_v14 }
  0xaf   :  { %749 = vmatmul.bf16.gmra.mxu0 %v3856_v12  ;;  %v3889_v12 = vld [vmem:[#allocation2 + $0xc8] sm:$0xf0] }
  0xb0   :  { %958 = vmatmul.bf16.gmra.mxu1 %v3860_v13  ;;  %v1119_v19 = vpack.c.bf16 %v920_v16, %v920_v16  ;;  %v3888_v16 = vor.u32 %v4791_v10, %v3887_v9 }
  0xb2   :  { %v1215_v26 = vunpack.c.l.b16 %v1119_v19 }
  0xb4   :  { %v712_v17 = vpop.f32.mrf.mxu0 }
  0xb5   :  { %v921_v18 = vpop.f32.mrf.mxu1 }
  0xb6   :  { %v922_v20 = vadd.f32 %v921_v18, %v712_v17  ;;  %v3892_v17 = vor.u32 %v4790_v11, %v3889_v12 }
  0xb8   :  { %v1120_v21 = vpack.c.bf16 %v922_v20, %v922_v20 }
  0xba   :  { %v1216_v27 = vunpack.c.l.b16 %v1120_v21 }
  0xbc   :  { %v1231_v28 = vpack.c.b16 %v1216_v27, %v1215_v26  ;;  %v715_v31 = vpop.f32.mrf.mxu0  ;;  %v3895_v26 = vld [vmem:[#allocation2 + $0xd0] sm:$0xf]  ;;  %v4793_v27 = vld [vmem:[#allocation2 + $0xd4] sm:$0xf0] }
  0xbd   :  { %v924_v32 = vpop.f32.mrf.mxu1 }
  0xbe   :  { %1769 = vmatmul.bf16.vlgmr.msra.gmra.mxu2 %v1231_v28  ;;  %v925_v33 = vadd.f32 %v924_v32, %v715_v31  ;;  %v4792_v28 = vld [vmem:[#allocation2 + $0xd4] sm:$0xf] }
  0xbf   :  { %754 = vmatmul.bf16.gmra.mxu0 %v3864_v29  ;;  %v3897_v29 = vld [vmem:[#allocation2 + $0xd8] sm:$0xf0] }
  0xc0   :  { %963 = vmatmul.bf16.gmra.mxu1 %v3868_v30  ;;  %v1121_v36 = vpack.c.bf16 %v925_v33, %v925_v33  ;;  %v3896_v33 = vor.u32 %v4793_v27, %v3895_v26 }
  0xc2   :  { %v1217_v43 = vunpack.c.l.b16 %v1121_v36 }
  0xc4   :  { %v717_v34 = vpop.f32.mrf.mxu0 }
  0xc5   :  { %v926_v35 = vpop.f32.mrf.mxu1 }
  0xc6   :  { %v927_v37 = vadd.f32 %v926_v35, %v717_v34  ;;  %v3900_v34 = vor.u32 %v4792_v28, %v3897_v29 }
  0xc8   :  { %v1122_v38 = vpack.c.bf16 %v927_v37, %v927_v37  ;;  %v4861_v37 = vld [vmem:[%s5932_s2 + $0x78] sm:$0xff] }
  0xc9   :  { %1810 = vmatpush.bf16.msra.mxu3 %v4861_v37 }
  0xca   :  { %v1218_v44 = vunpack.c.l.b16 %v1122_v38  ;;  %v4860_v38 = vld [vmem:[%s5932_s2 + $0x70] sm:$0xff] }
  0xcc   :  { %v1232_v45 = vpack.c.b16 %v1218_v44, %v1217_v43  ;;  %v720_v48 = vpop.f32.mrf.mxu0 }
  0xcd   :  { %v929_v49 = vpop.f32.mrf.mxu1  ;;  %1811 = vmatpush.bf16.msra.mxu3 %v4860_v38  ;;  %v3927_v38 = vld [vmem:[#allocation2 + $0x110] sm:$0xf] }
  0xce   :  { %1774 = vmatmul.bf16.gmra.mxu2 %v1232_v45  ;;  %v930_v50 = vadd.f32 %v929_v49, %v720_v48  ;;  %v4794_v48 = vld [vmem:[#allocation2 + $0xe4] sm:$0xf]  ;;  %v3905_v49 = vld [vmem:[#allocation2 + $0xe8] sm:$0xf0] }
  0xcf   :  { %759 = vmatmul.bf16.gmra.mxu0 %v3872_v46  ;;  %v3903_v46 = vld [vmem:[#allocation2 + $0xe0] sm:$0xf] }
  0xd0   :  { %968 = vmatmul.bf16.gmra.mxu1 %v3876_v47  ;;  %v1123_v53 = vpack.c.bf16 %v930_v50, %v930_v50  ;;  %v4795_v47 = vld [vmem:[#allocation2 + $0xe4] sm:$0xf0]  ;;  %v4858_v50 = vld [vmem:[%s5932_s2 + $0x60] sm:$0xff] }
  0xd1   :  { %1812 = vmatpush.bf16.msra.mxu3 %v4859_v42 }
  0xd2   :  { %v1219_v60 = vunpack.c.l.b16 %v1123_v53 }
  0xd4   :  { %v722_v51 = vpop.f32.mrf.mxu0 }
  0xd5   :  { %v931_v52 = vpop.f32.mrf.mxu1  ;;  %1813 = vmatpush.bf16.msra.mxu3 %v4858_v50 }
  0xd6   :  { %v932_v54 = vadd.f32 %v931_v52, %v722_v51 }
  0xd8   :  { %v1124_v55 = vpack.c.bf16 %v932_v54, %v932_v54  ;;  %v3904_v54 = vor.u32 %v4795_v47, %v3903_v46 }
  0xd9   :  { %1814 = vmatpush.bf16.msra.mxu3 %v4857_v58  ;;  %v3937_v58 = vld [vmem:[#allocation2 + $0x128] sm:$0xf0] }
  0xda   :  { %v1220_v61 = vunpack.c.l.b16 %v1124_v55  ;;  %v3908_v55 = vor.u32 %v4794_v48, %v3905_v49 }
  0xdc   :  { %v1233_v62 = vpack.c.b16 %v1220_v61, %v1219_v60  ;;  %v725_v1 = vpop.f32.mrf.mxu0 }
  0xdd   :  { %v934_v2 = vpop.f32.mrf.mxu1  ;;  %1815 = vmatpush.bf16.msra.mxu3 %v4856_v59 }
  0xde   :  { %1779 = vmatmul.bf16.gmra.mxu2 %v1233_v62  ;;  %v935_v3 = vadd.f32 %v934_v2, %v725_v1 }
  0xdf   :  { %764 = vmatmul.bf16.gmra.mxu0 %v3880_v63  ;;  %v4855_v63 = vld [vmem:[%s5932_s2 + $0x48] sm:$0xff] }
  0xe0   :  { %973 = vmatmul.bf16.gmra.mxu1 %v3884_v0  ;;  %v1125_v6 = vpack.c.bf16 %v935_v3, %v935_v3  ;;  %v3911_v3 = vld [vmem:[#allocation2 + $0xf0] sm:$0xf] }
  0xe1   :  { %1816 = vmatpush.bf16.msra.mxu3 %v4855_v63 }
  0xe2   :  { %v1221_v13 = vunpack.c.l.b16 %v1125_v6  ;;  %v3913_v6 = vld [vmem:[#allocation2 + $0xf8] sm:$0xf0] }
  0xe4   :  { %v727_v4 = vpop.f32.mrf.mxu0 }
  0xe5   :  { %v936_v5 = vpop.f32.mrf.mxu1 }
  0xe6   :  { %v937_v7 = vadd.f32 %v936_v5, %v727_v4  ;;  %v4797_v4 = vld [vmem:[#allocation2 + $0xf4] sm:$0xf0]  ;;  %v4796_v5 = vld [vmem:[#allocation2 + $0xf4] sm:$0xf] }
  0xe7   :  { %v3912_v11 = vor.u32 %v4797_v4, %v3911_v3  ;;  %v3916_v12 = vor.u32 %v4796_v5, %v3913_v6 }
  0xe8   :  { %v1126_v8 = vpack.c.bf16 %v937_v7, %v937_v7  ;;  %v4854_v7 = vld [vmem:[%s5932_s2 + $0x40] sm:$0xff] }
  0xe9   :  { %1817 = vmatpush.bf16.msra.mxu3 %v4854_v7 }
  0xea   :  { %v1222_v14 = vunpack.c.l.b16 %v1126_v8 }
  0xec   :  { %v1234_v15 = vpack.c.b16 %v1222_v14, %v1221_v13  ;;  %v730_v18 = vpop.f32.mrf.mxu0 }
  0xed   :  { %v939_v19 = vpop.f32.mrf.mxu1 }
  0xee   :  { %1784 = vmatmul.bf16.gmra.mxu2 %v1234_v15  ;;  %v940_v20 = vadd.f32 %v939_v19, %v730_v18 }
  0xef   :  { %769 = vmatmul.bf16.gmra.mxu0 %v3888_v16 }
  0xf0   :  { %978 = vmatmul.bf16.gmra.mxu1 %v3892_v17  ;;  %v1127_v23 = vpack.c.bf16 %v940_v20, %v940_v20 }
  0xf2   :  { %v1223_v30 = vunpack.c.l.b16 %v1127_v23  ;;  %v4798_v23 = vld [vmem:[#allocation2 + $0x104] sm:$0xf] }
  0xf4   :  { %v732_v21 = vpop.f32.mrf.mxu0 }
  0xf5   :  { %v941_v22 = vpop.f32.mrf.mxu1 }
  0xf6   :  { %v942_v24 = vadd.f32 %v941_v22, %v732_v21  ;;  %v3919_v21 = vld [vmem:[#allocation2 + $0x100] sm:$0xf]  ;;  %v4799_v22 = vld [vmem:[#allocation2 + $0x104] sm:$0xf0] }
  0xf7   :  { %v3920_v28 = vor.u32 %v4799_v22, %v3919_v21 }
  0xf8   :  { %v1128_v25 = vpack.c.bf16 %v942_v24, %v942_v24  ;;  %v3921_v24 = vld [vmem:[#allocation2 + $0x108] sm:$0xf0] }
  0xf9   :  { %v3924_v29 = vor.u32 %v4798_v23, %v3921_v24 }
  0xfa   :  { %v1224_v31 = vunpack.c.l.b16 %v1128_v25 }
  0xfc   :  { %v1235_v32 = vpack.c.b16 %v1224_v31, %v1223_v30  ;;  %v735_v35 = vpop.f32.mrf.mxu0 }
  0xfd   :  { %v944_v36 = vpop.f32.mrf.mxu1 }
  0xfe   :  { %1789 = vmatmul.bf16.gmra.mxu2 %v1235_v32  ;;  %v945_v39 = vadd.f32 %v944_v36, %v735_v35 }
  0xff   :  { %774 = vmatmul.bf16.gmra.mxu0 %v3896_v33 }
 0x100   :  { %983 = vmatmul.bf16.gmra.mxu1 %v3900_v34  ;;  %v1129_v43 = vpack.c.bf16 %v945_v39, %v945_v39  ;;  %v4801_v39 = vld [vmem:[#allocation2 + $0x114] sm:$0xf0] }
 0x102   :  { %v1225_v51 = vunpack.c.l.b16 %v1129_v43 }
 0x104   :  { %v737_v40 = vpop.f32.mrf.mxu0 }
 0x105   :  { %v946_v41 = vpop.f32.mrf.mxu1 }
 0x106   :  { %v947_v44 = vadd.f32 %v946_v41, %v737_v40  ;;  %v4800_v40 = vld [vmem:[#allocation2 + $0x114] sm:$0xf]  ;;  %v3929_v41 = vld [vmem:[#allocation2 + $0x118] sm:$0xf0] }
 0x107   :  { %v3932_v46 = vor.u32 %v4800_v40, %v3929_v41 }
 0x108   :  { %v1130_v45 = vpack.c.bf16 %v947_v44, %v947_v44 }
 0x10a   :  { %v1226_v52 = vunpack.c.l.b16 %v1130_v45  ;;  %v3928_v45 = vor.u32 %v4801_v39, %v3927_v38 }
 0x10c   :  { %v1236_v53 = vpack.c.b16 %v1226_v52, %v1225_v51  ;;  %v740_v56 = vpop.f32.mrf.mxu0 }
 0x10d   :  { %v949_v57 = vpop.f32.mrf.mxu1 }
 0x10e   :  { %1794 = vmatmul.bf16.gmra.mxu2 %v1236_v53  ;;  %v950_v60 = vadd.f32 %v949_v57, %v740_v56  ;;  %v4803_v56 = vld [vmem:[#allocation2 + $0x124] sm:$0xf0]  ;;  %v4802_v57 = vld [vmem:[#allocation2 + $0x124] sm:$0xf] }
 0x10f   :  { %779 = vmatmul.bf16.gmra.mxu0 %v3904_v54  ;;  %v3940_v63 = vor.u32 %v4802_v57, %v3937_v58  ;;  %v4867_v58 = vld [vmem:[%s5932_s2 + $0xa8] sm:$0xff] }
 0x110   :  { %988 = vmatmul.bf16.gmra.mxu1 %v3908_v55  ;;  %v1131_v0 = vpack.c.bf16 %v950_v60, %v950_v60  ;;  %v3935_v55 = vld [vmem:[#allocation2 + $0x120] sm:$0xf] }
 0x112   :  { %v1227_v8 = vunpack.c.l.b16 %v1131_v0 }
 0x114   :  { %v742_v61 = vpop.f32.mrf.mxu0 }
 0x115   :  { %v951_v62 = vpop.f32.mrf.mxu1 }
 0x116   :  { %v952_v1 = vadd.f32 %v951_v62, %v742_v61  ;;  %v3936_v62 = vor.u32 %v4803_v56, %v3935_v55 }
 0x118   :  { %v1132_v2 = vpack.c.bf16 %v952_v1, %v952_v1 }
 0x11a   :  { %v1228_v9 = vunpack.c.l.b16 %v1132_v2 }
 0x11c   :  { %v1237_v10 = vpack.c.b16 %v1228_v9, %v1227_v8  ;;  %v745_v13 = vpop.f32.mrf.mxu0  ;;  %v3943_v8 = vld [vmem:[#allocation2 + $0x130] sm:$0xf]  ;;  %v4805_v9 = vld [vmem:[#allocation2 + $0x134] sm:$0xf0] }
 0x11d   :  { %v954_v14 = vpop.f32.mrf.mxu1 }
 0x11e   :  { %1799 = vmatmul.bf16.gmra.mxu2 %v1237_v10  ;;  %v955_v15 = vadd.f32 %v954_v14, %v745_v13  ;;  %v4804_v10 = vld [vmem:[#allocation2 + $0x134] sm:$0xf] }
 0x11f   :  { %784 = vmatmul.bf16.gmra.mxu0 %v3912_v11  ;;  %v3945_v11 = vld [vmem:[#allocation2 + $0x138] sm:$0xf0] }
 0x120   :  { %993 = vmatmul.bf16.gmra.mxu1 %v3916_v12  ;;  %v1133_v18 = vpack.c.bf16 %v955_v15, %v955_v15  ;;  %v3944_v15 = vor.u32 %v4805_v9, %v3943_v8 }
 0x122   :  { %v1229_v25 = vunpack.c.l.b16 %v1133_v18 }
 0x124   :  { %v747_v16 = vpop.f32.mrf.mxu0 }
 0x125   :  { %v956_v17 = vpop.f32.mrf.mxu1 }
 0x126   :  { %v957_v19 = vadd.f32 %v956_v17, %v747_v16  ;;  %v3948_v16 = vor.u32 %v4804_v10, %v3945_v11  ;;  %v4865_v10 = vld [vmem:[%s5932_s2 + $0x98] sm:$0xff]  ;;  %v4864_v11 = vld [vmem:[%s5932_s2 + $0x90] sm:$0xff] }
 0x128   :  { %v1134_v20 = vpack.c.bf16 %v957_v19, %v957_v19 }
 0x12a   :  { %v1230_v26 = vunpack.c.l.b16 %v1134_v20 }
 0x12c   :  { %v1238_v27 = vpack.c.b16 %v1230_v26, %v1229_v25  ;;  %v750_v30 = vpop.f32.mrf.mxu0  ;;  %v3951_v25 = vld [vmem:[#allocation2 + $0x140] sm:$0xf]  ;;  %v4807_v26 = vld [vmem:[#allocation2 + $0x144] sm:$0xf0] }
 0x12d   :  { %v959_v31 = vpop.f32.mrf.mxu1 }
 0x12e   :  { %1804 = vmatmul.bf16.gmra.mxu2 %v1238_v27  ;;  %v960_v32 = vadd.f32 %v959_v31, %v750_v30  ;;  %v4806_v27 = vld [vmem:[#allocation2 + $0x144] sm:$0xf] }
 0x12f   :  { %789 = vmatmul.bf16.gmra.mxu0 %v3920_v28  ;;  %v3953_v28 = vld [vmem:[#allocation2 + $0x148] sm:$0xf0] }
 0x130   :  { %998 = vmatmul.bf16.gmra.mxu1 %v3924_v29  ;;  %v1135_v35 = vpack.c.bf16 %v960_v32, %v960_v32  ;;  %v3952_v32 = vor.u32 %v4807_v26, %v3951_v25 }
 0x132   :  { %v1263_v42 = vunpack.c.l.b16 %v1135_v35 }
 0x134   :  { %v752_v33 = vpop.f32.mrf.mxu0 }
 0x135   :  { %v961_v34 = vpop.f32.mrf.mxu1 }
 0x136   :  { %v962_v36 = vadd.f32 %v961_v34, %v752_v33  ;;  %v3956_v33 = vor.u32 %v4806_v27, %v3953_v28 }
 0x138   :  { %v1136_v37 = vpack.c.bf16 %v962_v36, %v962_v36 }
 0x13a   :  { %v1264_v43 = vunpack.c.l.b16 %v1136_v37 }
 0x13c   :  { %v1279_v44 = vpack.c.b16 %v1264_v43, %v1263_v42  ;;  %v755_v47 = vpop.f32.mrf.mxu0  ;;  %v3959_v42 = vld [vmem:[#allocation2 + $0x150] sm:$0xf]  ;;  %v4809_v43 = vld [vmem:[#allocation2 + $0x154] sm:$0xf0] }
 0x13d   :  { %v964_v48 = vpop.f32.mrf.mxu1 }
 0x13e   :  { %1818 = vmatmul.bf16.vlgmr.msra.gmra.mxu3 %v1279_v44  ;;  %v965_v49 = vadd.f32 %v964_v48, %v755_v47  ;;  %v4808_v44 = vld [vmem:[#allocation2 + $0x154] sm:$0xf] }
 0x13f   :  { %794 = vmatmul.bf16.gmra.mxu0 %v3928_v45  ;;  %v3961_v45 = vld [vmem:[#allocation2 + $0x158] sm:$0xf0] }
 0x140   :  { %1003 = vmatmul.bf16.gmra.mxu1 %v3932_v46  ;;  %v1137_v52 = vpack.c.bf16 %v965_v49, %v965_v49  ;;  %v3960_v49 = vor.u32 %v4809_v43, %v3959_v42 }
 0x142   :  { %v1265_v59 = vunpack.c.l.b16 %v1137_v52 }
 0x144   :  { %v757_v50 = vpop.f32.mrf.mxu0 }
 0x145   :  { %v966_v51 = vpop.f32.mrf.mxu1 }
 0x146   :  { %v967_v53 = vadd.f32 %v966_v51, %v757_v50  ;;  %v3964_v50 = vor.u32 %v4808_v44, %v3961_v45 }
 0x148   :  { %v1138_v54 = vpack.c.bf16 %v967_v53, %v967_v53  ;;  %v4869_v53 = vld [vmem:[%s5932_s2 + $0xb8] sm:$0xff] }
 0x149   :  { %1859 = vmatpush.bf16.msrb.mxu2 %v4869_v53 }
 0x14a   :  { %v1266_v60 = vunpack.c.l.b16 %v1138_v54  ;;  %v4868_v54 = vld [vmem:[%s5932_s2 + $0xb0] sm:$0xff] }
 0x14c   :  { %v1280_v61 = vpack.c.b16 %v1266_v60, %v1265_v59  ;;  %v760_v0 = vpop.f32.mrf.mxu0 }
 0x14d   :  { %v969_v1 = vpop.f32.mrf.mxu1  ;;  %1860 = vmatpush.bf16.msrb.mxu2 %v4868_v54 }
 0x14e   :  { %1823 = vmatmul.bf16.gmra.mxu3 %v1280_v61  ;;  %v970_v2 = vadd.f32 %v969_v1, %v760_v0  ;;  %v4810_v0 = vld [vmem:[#allocation2 + $0x164] sm:$0xf]  ;;  %v3969_v1 = vld [vmem:[#allocation2 + $0x168] sm:$0xf0] }
 0x14f   :  { %799 = vmatmul.bf16.gmra.mxu0 %v3936_v62  ;;  %v3967_v62 = vld [vmem:[#allocation2 + $0x160] sm:$0xf] }
 0x150   :  { %1008 = vmatmul.bf16.gmra.mxu1 %v3940_v63  ;;  %v1139_v5 = vpack.c.bf16 %v970_v2, %v970_v2  ;;  %v4811_v63 = vld [vmem:[#allocation2 + $0x164] sm:$0xf0]  ;;  %v4866_v2 = vld [vmem:[%s5932_s2 + $0xa0] sm:$0xff] }
 0x151   :  { %1861 = vmatpush.bf16.msrb.mxu2 %v4867_v58  ;;  %v3991_v58 = vld [vmem:[#allocation2 + $0x190] sm:$0xf] }
 0x152   :  { %v1267_v12 = vunpack.c.l.b16 %v1139_v5 }
 0x154   :  { %v762_v3 = vpop.f32.mrf.mxu0 }
 0x155   :  { %v971_v4 = vpop.f32.mrf.mxu1  ;;  %1862 = vmatpush.bf16.msrb.mxu2 %v4866_v2 }
 0x156   :  { %v972_v6 = vadd.f32 %v971_v4, %v762_v3 }
 0x158   :  { %v1140_v7 = vpack.c.bf16 %v972_v6, %v972_v6  ;;  %v3968_v6 = vor.u32 %v4811_v63, %v3967_v62 }
 0x159   :  { %1863 = vmatpush.bf16.msrb.mxu2 %v4865_v10 }
 0x15a   :  { %v1268_v13 = vunpack.c.l.b16 %v1140_v7  ;;  %v3972_v7 = vor.u32 %v4810_v0, %v3969_v1 }
 0x15c   :  { %v1281_v14 = vpack.c.b16 %v1268_v13, %v1267_v12  ;;  %v765_v17 = vpop.f32.mrf.mxu0 }
 0x15d   :  { %v974_v18 = vpop.f32.mrf.mxu1  ;;  %1864 = vmatpush.bf16.msrb.mxu2 %v4864_v11 }
 0x15e   :  { %1828 = vmatmul.bf16.gmra.mxu3 %v1281_v14  ;;  %v975_v19 = vadd.f32 %v974_v18, %v765_v17 }
 0x15f   :  { %804 = vmatmul.bf16.gmra.mxu0 %v3944_v15  ;;  %v4863_v15 = vld [vmem:[%s5932_s2 + $0x88] sm:$0xff] }
 0x160   :  { %1013 = vmatmul.bf16.gmra.mxu1 %v3948_v16  ;;  %v1141_v22 = vpack.c.bf16 %v975_v19, %v975_v19  ;;  %v3975_v19 = vld [vmem:[#allocation2 + $0x170] sm:$0xf] }
 0x161   :  { %1865 = vmatpush.bf16.msrb.mxu2 %v4863_v15 }
 0x162   :  { %v1269_v29 = vunpack.c.l.b16 %v1141_v22  ;;  %v3977_v22 = vld [vmem:[#allocation2 + $0x178] sm:$0xf0] }
 0x164   :  { %v767_v20 = vpop.f32.mrf.mxu0 }
 0x165   :  { %v976_v21 = vpop.f32.mrf.mxu1 }
 0x166   :  { %v977_v23 = vadd.f32 %v976_v21, %v767_v20  ;;  %v4813_v20 = vld [vmem:[#allocation2 + $0x174] sm:$0xf0]  ;;  %v4812_v21 = vld [vmem:[#allocation2 + $0x174] sm:$0xf] }
 0x167   :  { %v3976_v27 = vor.u32 %v4813_v20, %v3975_v19  ;;  %v3980_v28 = vor.u32 %v4812_v21, %v3977_v22  ;;  %v4819_v19 = vld [vmem:[#allocation2 + $0x1a4] sm:$0xf0]  ;;  %v4818_v20 = vld [vmem:[#allocation2 + $0x1a4] sm:$0xf]  ;;  %v4001_v21 = vld [vmem:[#allocation2 + $0x1a8] sm:$0xf0] }
 0x168   :  { %v1142_v24 = vpack.c.bf16 %v977_v23, %v977_v23  ;;  %v4862_v23 = vld [vmem:[%s5932_s2 + $0x80] sm:$0xff] }
 0x169   :  { %1866 = vmatpush.bf16.msrb.mxu2 %v4862_v23 }
 0x16a   :  { %v1270_v30 = vunpack.c.l.b16 %v1142_v24 }
 0x16c   :  { %v1282_v31 = vpack.c.b16 %v1270_v30, %v1269_v29  ;;  %v770_v34 = vpop.f32.mrf.mxu0 }
 0x16d   :  { %v979_v35 = vpop.f32.mrf.mxu1 }
 0x16e   :  { %1833 = vmatmul.bf16.gmra.mxu3 %v1282_v31  ;;  %v980_v36 = vadd.f32 %v979_v35, %v770_v34  ;;  %v1770_v31 = vpop.f32.mrf.mxu2 }
 0x16f   :  { %809 = vmatmul.bf16.gmra.mxu0 %v3952_v32 }
 0x170   :  { %1018 = vmatmul.bf16.gmra.mxu1 %v3956_v33  ;;  %v1143_v39 = vpack.c.bf16 %v980_v36, %v980_v36 }
 0x172   :  { %v1271_v46 = vunpack.c.l.b16 %v1143_v39  ;;  %v4815_v39 = vld [vmem:[#allocation2 + $0x184] sm:$0xf0] }
 0x174   :  { %v772_v37 = vpop.f32.mrf.mxu0 }
 0x175   :  { %v981_v38 = vpop.f32.mrf.mxu1 }
 0x176   :  { %v982_v40 = vadd.f32 %v981_v38, %v772_v37  ;;  %v3983_v38 = vld [vmem:[#allocation2 + $0x180] sm:$0xf]  ;;  %v5323_v42 = vpop.f32.mrf.mxu2 }
 0x178   :  { %v1144_v41 = vpack.c.bf16 %v982_v40, %v982_v40  ;;  %v4814_v40 = vld [vmem:[#allocation2 + $0x184] sm:$0xf] }
 0x17a   :  { %v1272_v47 = vunpack.c.l.b16 %v1144_v41  ;;  %v3985_v41 = vld [vmem:[#allocation2 + $0x188] sm:$0xf0] }
 0x17c   :  { %v1283_v48 = vpack.c.b16 %v1272_v47, %v1271_v46  ;;  %v775_v51 = vpop.f32.mrf.mxu0  ;;  %v3984_v46 = vor.u32 %v4815_v39, %v3983_v38  ;;  %v3988_v47 = vor.u32 %v4814_v40, %v3985_v41  ;;  %v4007_v39 = vld [vmem:[#allocation2 + $0x1b0] sm:$0xf]  ;;  %v4821_v41 = vld [vmem:[#allocation2 + $0x1b4] sm:$0xf0] }
 0x17d   :  { %v984_v52 = vpop.f32.mrf.mxu1 }
 0x17e   :  { %1838 = vmatmul.bf16.gmra.mxu3 %v1283_v48  ;;  %v985_v55 = vadd.f32 %v984_v52, %v775_v51  ;;  %v1775_v51 = vpop.f32.mrf.mxu2 }
 0x17f   :  { %814 = vmatmul.bf16.gmra.mxu0 %v3960_v49 }
 0x180   :  { %1023 = vmatmul.bf16.gmra.mxu1 %v3964_v50  ;;  %v1145_v59 = vpack.c.bf16 %v985_v55, %v985_v55 }
 0x182   :  { %v1273_v3 = vunpack.c.l.b16 %v1145_v59  ;;  %v4817_v59 = vld [vmem:[#allocation2 + $0x194] sm:$0xf0] }
 0x183   :  { %v3992_v2 = vor.u32 %v4817_v59, %v3991_v58 }
 0x184   :  { %v777_v56 = vpop.f32.mrf.mxu0 }
 0x185   :  { %v986_v57 = vpop.f32.mrf.mxu1 }
 0x186   :  { %v987_v60 = vadd.f32 %v986_v57, %v777_v56  ;;  %v1519_v56 = vld [vmem:[%s5939_s9] sm:$0x7] }
 0x187   :  { %v5328_v0 = vperm.slane %v1519_v56, 0 }
 0x188   :  { %v1146_v61 = vpack.c.bf16 %v987_v60, %v987_v60  ;;  %v4816_v60 = vld [vmem:[#allocation2 + $0x194] sm:$0xf] }
 0x18a   :  { %v1274_v4 = vunpack.c.l.b16 %v1146_v61  ;;  %v3993_v61 = vld [vmem:[#allocation2 + $0x198] sm:$0xf0] }
 0x18c   :  { %v1284_v5 = vpack.c.b16 %v1274_v4, %v1273_v3  ;;  %v780_v8 = vpop.f32.mrf.mxu0  ;;  %v3996_v3 = vor.u32 %v4816_v60, %v3993_v61 }
 0x18d   :  { %v989_v9 = vpop.f32.mrf.mxu1 }
 0x18e   :  { %1843 = vmatmul.bf16.gmra.mxu3 %v1284_v5  ;;  %v990_v12 = vadd.f32 %v989_v9, %v780_v8 }
 0x18f   :  { %819 = vmatmul.bf16.gmra.mxu0 %v3968_v6  ;;  %v5330_v6 = vpop.f32.mrf.mxu2 }
 0x190   :  { %1028 = vmatmul.bf16.gmra.mxu1 %v3972_v7  ;;  %v1147_v16 = vpack.c.bf16 %v990_v12, %v990_v12  ;;  %v1771_v7 = vadd.f32 %v1770_v31, %v5328_v0 }
 0x192   :  { %v1275_v24 = vunpack.c.l.b16 %v1147_v16 }
 0x194   :  { %v782_v13 = vpop.f32.mrf.mxu0 }
 0x195   :  { %v991_v14 = vpop.f32.mrf.mxu1 }
 0x196   :  { %v992_v17 = vadd.f32 %v991_v14, %v782_v13 }
 0x197   :  { %v1780_v15 = vpop.f32.mrf.mxu2 }
 0x198   :  { %v1148_v18 = vpack.c.bf16 %v992_v17, %v992_v17  ;;  %v3999_v17 = vld [vmem:[#allocation2 + $0x1a0] sm:$0xf] }
 0x19a   :  { %v1276_v25 = vunpack.c.l.b16 %v1148_v18 }
 0x19c   :  { %v1285_v26 = vpack.c.b16 %v1276_v25, %v1275_v24  ;;  %v785_v29 = vpop.f32.mrf.mxu0  ;;  %v4000_v25 = vor.u32 %v4819_v19, %v3999_v17 }
 0x19d   :  { %v994_v30 = vpop.f32.mrf.mxu1 }
 0x19e   :  { %1848 = vmatmul.bf16.gmra.mxu3 %v1285_v26  ;;  %v995_v32 = vadd.f32 %v994_v30, %v785_v29  ;;  %v4004_v26 = vor.u32 %v4818_v20, %v4001_v21  ;;  %v1776_v29 = vadd.f32 %v1775_v51, %v5328_v0 }
 0x19f   :  { %824 = vmatmul.bf16.gmra.mxu0 %v3976_v27  ;;  %v5338_v31 = vpop.f32.mrf.mxu2 }
 0x1a0   :  { %1033 = vmatmul.bf16.gmra.mxu1 %v3980_v28  ;;  %v1149_v35 = vpack.c.bf16 %v995_v32, %v995_v32 }
 0x1a2   :  { %v1277_v43 = vunpack.c.l.b16 %v1149_v35 }
 0x1a4   :  { %v787_v33 = vpop.f32.mrf.mxu0 }
 0x1a5   :  { %v996_v34 = vpop.f32.mrf.mxu1 }
 0x1a6   :  { %v997_v36 = vadd.f32 %v996_v34, %v787_v33 }
 0x1a8   :  { %v1150_v37 = vpack.c.bf16 %v997_v36, %v997_v36 }
 0x1aa   :  { %v1278_v44 = vunpack.c.l.b16 %v1150_v37 }
 0x1ac   :  { %v1286_v45 = vpack.c.b16 %v1278_v44, %v1277_v43  ;;  %v790_v48 = vpop.f32.mrf.mxu0  ;;  %v4820_v43 = vld [vmem:[#allocation2 + $0x1b4] sm:$0xf]  ;;  %v4009_v44 = vld [vmem:[#allocation2 + $0x1b8] sm:$0xf0] }
 0x1ad   :  { %v999_v49 = vpop.f32.mrf.mxu1 }
 0x1ae   :  { %1853 = vmatmul.bf16.gmra.mxu3 %v1286_v45  ;;  %v1000_v50 = vadd.f32 %v999_v49, %v790_v48  ;;  %v4008_v49 = vor.u32 %v4821_v41, %v4007_v39  ;;  %v4877_v41 = vld [vmem:[%s5932_s2 + $0xf8] sm:$0xff] }
 0x1af   :  { %829 = vmatmul.bf16.gmra.mxu0 %v3984_v46  ;;  %1908 = vmatpush.bf16.msrb.mxu3 %v4877_v41 }
 0x1b0   :  { %1038 = vmatmul.bf16.gmra.mxu1 %v3988_v47  ;;  %v1151_v54 = vpack.c.bf16 %v1000_v50, %v1000_v50  ;;  %v1785_v47 = vpop.f32.mrf.mxu2  ;;  %v4012_v50 = vor.u32 %v4820_v43, %v4009_v44 }
 0x1b2   :  { %v1311_v62 = vunpack.c.l.b16 %v1151_v54 }
 0x1b4   :  { %v792_v52 = vpop.f32.mrf.mxu0 }
 0x1b5   :  { %v1001_v53 = vpop.f32.mrf.mxu1 }
 0x1b6   :  { %v1002_v55 = vadd.f32 %v1001_v53, %v792_v52  ;;  %v1781_v53 = vadd.f32 %v1780_v15, %v5328_v0 }
 0x1b8   :  { %v1152_v57 = vpack.c.bf16 %v1002_v55, %v1002_v55  ;;  %v5347_v59 = vpop.f32.mrf.mxu2 }
 0x1ba   :  { %v1312_v63 = vunpack.c.l.b16 %v1152_v57 }
 0x1bc   :  { %v1327_v1 = vpack.c.b16 %v1312_v63, %v1311_v62  ;;  %v795_v4 = vpop.f32.mrf.mxu0  ;;  %v4015_v63 = vld [vmem:[#allocation2 + $0x1c0] sm:$0xf] }
 0x1bd   :  { %v1004_v5 = vpop.f32.mrf.mxu1 }
 0x1be   :  { %1867 = vmatmul.bf16.vlgmr.msrb.gmra.mxu2 %v1327_v1  ;;  %v1005_v9 = vadd.f32 %v1004_v5, %v795_v4  ;;  %v4017_v4 = vld [vmem:[#allocation2 + $0x1c8] sm:$0xf0] }
 0x1bf   :  { %834 = vmatmul.bf16.gmra.mxu0 %v3992_v2  ;;  %v4823_v2 = vld [vmem:[#allocation2 + $0x1c4] sm:$0xf0] }
 0x1c0   :  { %1043 = vmatmul.bf16.gmra.mxu1 %v3996_v3  ;;  %v1153_v13 = vpack.c.bf16 %v1005_v9, %v1005_v9  ;;  %v4822_v3 = vld [vmem:[#allocation2 + $0x1c4] sm:$0xf]  ;;  %v4016_v9 = vor.u32 %v4823_v2, %v4015_v63  ;;  %v1790_v15 = vpop.f32.mrf.mxu2 }
 0x1c1   :  { %v1819_v8 = vpop.f32.mrf.mxu3  ;;  %v1791_v43 = vadd.f32 %v1790_v15, %v5328_v0 }
 0x1c2   :  { %v5333_v10 = vadd.f32 %v1819_v8, %v1771_v7  ;;  %v1313_v22 = vunpack.c.l.b16 %v1153_v13 }
 0x1c4   :  { %v797_v11 = vpop.f32.mrf.mxu0 }
 0x1c5   :  { %v1006_v12 = vpop.f32.mrf.mxu1 }
 0x1c6   :  { %v1007_v14 = vadd.f32 %v1006_v12, %v797_v11  ;;  %v4020_v11 = vor.u32 %v4822_v3, %v4017_v4 }
 0x1c8   :  { %v1154_v16 = vpack.c.bf16 %v1007_v14, %v1007_v14  ;;  %v1786_v14 = vadd.f32 %v1785_v47, %v5328_v0 }
 0x1c9   :  { %v5335_v18 = vpop.f32.mrf.mxu3 }
 0x1ca   :  { %v1314_v23 = vunpack.c.l.b16 %v1154_v16 }
 0x1cc   :  { %v1328_v24 = vpack.c.b16 %v1314_v23, %v1313_v22  ;;  %v800_v27 = vpop.f32.mrf.mxu0 }
 0x1cd   :  { %v1009_v28 = vpop.f32.mrf.mxu1 }
 0x1ce   :  { %1872 = vmatmul.bf16.gmra.mxu2 %v1328_v24  ;;  %v1010_v32 = vadd.f32 %v1009_v28, %v800_v27  ;;  %v4825_v27 = vld [vmem:[#allocation2 + $0x1d4] sm:$0xf0]  ;;  %v4824_v28 = vld [vmem:[#allocation2 + $0x1d4] sm:$0xf] }
 0x1cf   :  { %839 = vmatmul.bf16.gmra.mxu0 %v4000_v25  ;;  %v4023_v25 = vld [vmem:[#allocation2 + $0x1d0] sm:$0xf] }
 0x1d0   :  { %1048 = vmatmul.bf16.gmra.mxu1 %v4004_v26  ;;  %v1155_v36 = vpack.c.bf16 %v1010_v32, %v1010_v32 }
 0x1d1   :  { %v1824_v30 = vpop.f32.mrf.mxu3 }
 0x1d2   :  { %v5340_v33 = vadd.f32 %v1824_v30, %v1776_v29  ;;  %v1315_v45 = vunpack.c.l.b16 %v1155_v36  ;;  %v4025_v29 = vld [vmem:[#allocation2 + $0x1d8] sm:$0xf0]  ;;  %v5356_v30 = vpop.f32.mrf.mxu2  ;;  %v4024_v36 = vor.u32 %v4825_v27, %v4023_v25  ;;  %v4039_v27 = vld [vmem:[#allocation2 + $0x1f0] sm:$0xf] }
 0x1d4   :  { %v802_v34 = vpop.f32.mrf.mxu0 }
 0x1d5   :  { %v1011_v35 = vpop.f32.mrf.mxu1 }
 0x1d6   :  { %v1012_v37 = vadd.f32 %v1011_v35, %v802_v34 }
 0x1d8   :  { %v1156_v38 = vpack.c.bf16 %v1012_v37, %v1012_v37  ;;  %v4028_v37 = vor.u32 %v4824_v28, %v4025_v29  ;;  %v4829_v28 = vld [vmem:[#allocation2 + $0x1f4] sm:$0xf0] }
 0x1d9   :  { %v5342_v40 = vpop.f32.mrf.mxu3 }
 0x1da   :  { %v1316_v46 = vunpack.c.l.b16 %v1156_v38 }
 0x1dc   :  { %v1329_v48 = vpack.c.b16 %v1316_v46, %v1315_v45  ;;  %v805_v51 = vpop.f32.mrf.mxu0  ;;  %v4876_v45 = vld [vmem:[%s5932_s2 + $0xf0] sm:$0xff] }
 0x1dd   :  { %v1014_v52 = vpop.f32.mrf.mxu1  ;;  %1909 = vmatpush.bf16.msrb.mxu3 %v4876_v45 }
 0x1de   :  { %1877 = vmatmul.bf16.gmra.mxu2 %v1329_v48  ;;  %v1015_v55 = vadd.f32 %v1014_v52, %v805_v51  ;;  %v1795_v48 = vpop.f32.mrf.mxu2  ;;  %v4875_v51 = vld [vmem:[%s5932_s2 + $0xe8] sm:$0xff] }
 0x1df   :  { %844 = vmatmul.bf16.gmra.mxu0 %v4008_v49 }
 0x1e0   :  { %1053 = vmatmul.bf16.gmra.mxu1 %v4012_v50  ;;  %v1157_v60 = vpack.c.bf16 %v1015_v55, %v1015_v55  ;;  %v4031_v55 = vld [vmem:[#allocation2 + $0x1e0] sm:$0xf] }
 0x1e1   :  { %v1829_v54 = vpop.f32.mrf.mxu3  ;;  %1910 = vmatpush.bf16.msrb.mxu3 %v4875_v51 }
 0x1e2   :  { %v5345_v56 = vadd.f32 %v1829_v54, %v1781_v53  ;;  %v1317_v5 = vunpack.c.l.b16 %v1157_v60  ;;  %v4826_v60 = vld [vmem:[#allocation2 + $0x1e4] sm:$0xf] }
 0x1e4   :  { %v807_v57 = vpop.f32.mrf.mxu0 }
 0x1e5   :  { %v1016_v58 = vpop.f32.mrf.mxu1 }
 0x1e6   :  { %v1017_v61 = vadd.f32 %v1016_v58, %v807_v57  ;;  %v4827_v57 = vld [vmem:[#allocation2 + $0x1e4] sm:$0xf0] }
 0x1e7   :  { %v4032_v4 = vor.u32 %v4827_v57, %v4031_v55  ;;  %v4047_v57 = vld [vmem:[#allocation2 + $0x200] sm:$0xf] }
 0x1e8   :  { %v1158_v62 = vpack.c.bf16 %v1017_v61, %v1017_v61  ;;  %v4033_v61 = vld [vmem:[#allocation2 + $0x1e8] sm:$0xf0] }
 0x1e9   :  { %v5349_v1 = vpop.f32.mrf.mxu3 }
 0x1ea   :  { %v1318_v7 = vunpack.c.l.b16 %v1158_v62  ;;  %v4874_v62 = vld [vmem:[%s5932_s2 + $0xe0] sm:$0xff] }
 0x1eb   :  { %1911 = vmatpush.bf16.msrb.mxu3 %v4874_v62  ;;  %v4830_v62 = vld [vmem:[#allocation2 + $0x204] sm:$0xf] }
 0x1ec   :  { %v1330_v8 = vpack.c.b16 %v1318_v7, %v1317_v5  ;;  %v810_v12 = vpop.f32.mrf.mxu0  ;;  %v4036_v5 = vor.u32 %v4826_v60, %v4033_v61  ;;  %v4831_v61 = vld [vmem:[#allocation2 + $0x204] sm:$0xf0] }
 0x1ed   :  { %v1019_v13 = vpop.f32.mrf.mxu1 }
 0x1ee   :  { %1882 = vmatmul.bf16.gmra.mxu2 %v1330_v8  ;;  %v1020_v17 = vadd.f32 %v1019_v13, %v810_v12  ;;  %v1796_v12 = vadd.f32 %v1795_v48, %v5328_v0 }
 0x1ef   :  { %849 = vmatmul.bf16.gmra.mxu0 %v4016_v9  ;;  %v4873_v9 = vld [vmem:[%s5932_s2 + $0xd8] sm:$0xff] }
 0x1f0   :  { %1058 = vmatmul.bf16.gmra.mxu1 %v4020_v11  ;;  %v1159_v22 = vpack.c.bf16 %v1020_v17, %v1020_v17  ;;  %v5378_v11 = vpop.f32.mrf.mxu2  ;;  %1912 = vmatpush.bf16.msrb.mxu3 %v4873_v9 }
 0x1f1   :  { %v1834_v16 = vpop.f32.mrf.mxu3 }
 0x1f2   :  { %v5352_v19 = vadd.f32 %v1834_v16, %v1786_v14  ;;  %v1319_v32 = vunpack.c.l.b16 %v1159_v22  ;;  %v4872_v14 = vld [vmem:[%s5932_s2 + $0xd0] sm:$0xff] }
 0x1f4   :  { %v812_v20 = vpop.f32.mrf.mxu0  ;;  %1913 = vmatpush.bf16.msrb.mxu3 %v4872_v14 }
 0x1f5   :  { %v1021_v21 = vpop.f32.mrf.mxu1 }
 0x1f6   :  { %v1022_v23 = vadd.f32 %v1021_v21, %v812_v20  ;;  %v4871_v21 = vld [vmem:[%s5932_s2 + $0xc8] sm:$0xff] }
 0x1f8   :  { %v1160_v24 = vpack.c.bf16 %v1022_v23, %v1022_v23  ;;  %1914 = vmatpush.bf16.msrb.mxu3 %v4871_v21 }
 0x1f9   :  { %v5354_v26 = vpop.f32.mrf.mxu3 }
 0x1fa   :  { %v1320_v34 = vunpack.c.l.b16 %v1160_v24  ;;  %v1800_v24 = vpop.f32.mrf.mxu2 }
 0x1fb   :  { %v1801_v45 = vadd.f32 %v1800_v24, %v5328_v0 }
 0x1fc   :  { %v1331_v35 = vpack.c.b16 %v1320_v34, %v1319_v32  ;;  %v815_v38 = vpop.f32.mrf.mxu0  ;;  %v4828_v32 = vld [vmem:[#allocation2 + $0x1f4] sm:$0xf]  ;;  %v4041_v34 = vld [vmem:[#allocation2 + $0x1f8] sm:$0xf0] }
 0x1fd   :  { %v1024_v39 = vpop.f32.mrf.mxu1  ;;  %v4044_v41 = vor.u32 %v4828_v32, %v4041_v34  ;;  %v4832_v32 = vld [vmem:[#allocation2 + $0x214] sm:$0xf]  ;;  %v4057_v34 = vld [vmem:[#allocation2 + $0x218] sm:$0xf0] }
 0x1fe   :  { %1887 = vmatmul.bf16.gmra.mxu2 %v1331_v35  ;;  %v1025_v46 = vadd.f32 %v1024_v39, %v815_v38  ;;  %v4870_v35 = vld [vmem:[%s5932_s2 + $0xc0] sm:$0xff]  ;;  %v4040_v39 = vor.u32 %v4829_v28, %v4039_v27  ;;  %v4833_v28 = vld [vmem:[#allocation2 + $0x214] sm:$0xf0] }
 0x1ff   :  { %854 = vmatmul.bf16.gmra.mxu0 %v4024_v36  ;;  %1915 = vmatpush.bf16.msrb.mxu3 %v4870_v35 }
 0x200   :  { %1063 = vmatmul.bf16.gmra.mxu1 %v4028_v37  ;;  %v1161_v52 = vpack.c.bf16 %v1025_v46, %v1025_v46 }
 0x201   :  { %v1839_v44 = vpop.f32.mrf.mxu3 }
 0x202   :  { %v5365_v47 = vadd.f32 %v1839_v44, %v1791_v43  ;;  %v1321_v63 = vunpack.c.l.b16 %v1161_v52  ;;  %v5395_v48 = vpop.f32.mrf.mxu2 }
 0x204   :  { %v817_v49 = vpop.f32.mrf.mxu0 }
 0x205   :  { %v1026_v50 = vpop.f32.mrf.mxu1 }
 0x206   :  { %v1027_v53 = vadd.f32 %v1026_v50, %v817_v49 }
 0x208   :  { %v1162_v54 = vpack.c.bf16 %v1027_v53, %v1027_v53 }
 0x209   :  { %v5370_v58 = vpop.f32.mrf.mxu3 }
 0x20a   :  { %v1322_v2 = vunpack.c.l.b16 %v1162_v54 }
 0x20c   :  { %v1332_v3 = vpack.c.b16 %v1322_v2, %v1321_v63  ;;  %v820_v7 = vpop.f32.mrf.mxu0  ;;  %v4049_v63 = vld [vmem:[#allocation2 + $0x208] sm:$0xf0] }
 0x20d   :  { %v1029_v8 = vpop.f32.mrf.mxu1 }
 0x20e   :  { %1892 = vmatmul.bf16.gmra.mxu2 %v1332_v3  ;;  %v1030_v15 = vadd.f32 %v1029_v8, %v820_v7  ;;  %v4048_v7 = vor.u32 %v4831_v61, %v4047_v57  ;;  %v4052_v8 = vor.u32 %v4830_v62, %v4049_v63  ;;  %v4835_v61 = vld [vmem:[#allocation2 + $0x224] sm:$0xf0]  ;;  %v4834_v62 = vld [vmem:[#allocation2 + $0x224] sm:$0xf]  ;;  %v4065_v63 = vld [vmem:[#allocation2 + $0x228] sm:$0xf0] }
 0x20f   :  { %859 = vmatmul.bf16.gmra.mxu0 %v4032_v4  ;;  %v1805_v4 = vpop.f32.mrf.mxu2 }
 0x210   :  { %1068 = vmatmul.bf16.gmra.mxu1 %v4036_v5  ;;  %v1163_v22 = vpack.c.bf16 %v1030_v15, %v1030_v15 }
 0x211   :  { %v1844_v13 = vpop.f32.mrf.mxu3 }
 0x212   :  { %v5384_v16 = vadd.f32 %v1844_v13, %v1796_v12  ;;  %v1323_v36 = vunpack.c.l.b16 %v1163_v22  ;;  %v1806_v13 = vadd.f32 %v1805_v4, %v5328_v0 }
 0x214   :  { %v822_v17 = vpop.f32.mrf.mxu0 }
 0x215   :  { %v1031_v20 = vpop.f32.mrf.mxu1 }
 0x216   :  { %v1032_v23 = vadd.f32 %v1031_v20, %v822_v17 }
 0x217   :  { %v5404_v27 = vpop.f32.mrf.mxu2 }
 0x218   :  { %v1164_v25 = vpack.c.bf16 %v1032_v23, %v1032_v23 }
 0x219   :  { %v5389_v29 = vpop.f32.mrf.mxu3 }
 0x21a   :  { %v1324_v37 = vunpack.c.l.b16 %v1164_v25  ;;  %v4055_v25 = vld [vmem:[#allocation2 + $0x210] sm:$0xf] }
 0x21c   :  { %v1333_v38 = vpack.c.b16 %v1324_v37, %v1323_v36  ;;  %v825_v43 = vpop.f32.mrf.mxu0 }
 0x21d   :  { %v1034_v44 = vpop.f32.mrf.mxu1 }
 0x21e   :  { %1897 = vmatmul.bf16.gmra.mxu2 %v1333_v38  ;;  %v1035_v49 = vadd.f32 %v1034_v44, %v825_v43  ;;  %v4056_v38 = vor.u32 %v4833_v28, %v4055_v25  ;;  %v4837_v25 = vld [vmem:[#allocation2 + $0x234] sm:$0xf0]  ;;  %v4836_v28 = vld [vmem:[#allocation2 + $0x234] sm:$0xf] }
 0x21f   :  { %864 = vmatmul.bf16.gmra.mxu0 %v4040_v39  ;;  %v4060_v39 = vor.u32 %v4832_v32, %v4057_v34  ;;  %v4073_v32 = vld [vmem:[#allocation2 + $0x238] sm:$0xf0] }
 0x220   :  { %1073 = vmatmul.bf16.gmra.mxu1 %v4044_v41  ;;  %v1165_v53 = vpack.c.bf16 %v1035_v49, %v1035_v49 }
 0x221   :  { %v1849_v46 = vpop.f32.mrf.mxu3 }
 0x222   :  { %v5397_v50 = vadd.f32 %v1849_v46, %v1801_v45  ;;  %v1325_v2 = vunpack.c.l.b16 %v1165_v53 }
 0x224   :  { %v827_v51 = vpop.f32.mrf.mxu0 }
 0x225   :  { %v1036_v52 = vpop.f32.mrf.mxu1 }
 0x226   :  { %v1037_v54 = vadd.f32 %v1036_v52, %v827_v51 }
 0x228   :  { %v1166_v55 = vpack.c.bf16 %v1037_v54, %v1037_v54 }
 0x229   :  { %v5399_v60 = vpop.f32.mrf.mxu3 }
 0x22a   :  { %v1326_v3 = vunpack.c.l.b16 %v1166_v55  ;;  %v4063_v55 = vld [vmem:[#allocation2 + $0x220] sm:$0xf] }
 0x22c   :  { %v1334_v5 = vpack.c.b16 %v1326_v3, %v1325_v2  ;;  %v830_v9 = vpop.f32.mrf.mxu0 }
 0x22d   :  { %v1039_v12 = vpop.f32.mrf.mxu1 }
 0x22e   :  { %1902 = vmatmul.bf16.gmra.mxu2 %v1334_v5  ;;  %v1040_v15 = vadd.f32 %v1039_v12, %v830_v9  ;;  %v4064_v5 = vor.u32 %v4835_v61, %v4063_v55  ;;  %v4839_v61 = vld [vmem:[#allocation2 + $0x244] sm:$0xf0] }
 0x22f   :  { %869 = vmatmul.bf16.gmra.mxu0 %v4048_v7  ;;  %v4068_v7 = vor.u32 %v4834_v62, %v4065_v63  ;;  %v4838_v62 = vld [vmem:[#allocation2 + $0x244] sm:$0xf]  ;;  %v4081_v63 = vld [vmem:[#allocation2 + $0x248] sm:$0xf0] }
 0x230   :  { %1078 = vmatmul.bf16.gmra.mxu1 %v4052_v8  ;;  %v1167_v22 = vpack.c.bf16 %v1040_v15, %v1040_v15 }
 0x231   :  { %v1854_v14 = vpop.f32.mrf.mxu3 }
 0x232   :  { %v5402_v17 = vadd.f32 %v1854_v14, %v1806_v13  ;;  %v1359_v35 = vunpack.c.l.b16 %v1167_v22 }
 0x234   :  { %v832_v20 = vpop.f32.mrf.mxu0 }
 0x235   :  { %v1041_v21 = vpop.f32.mrf.mxu1 }
 0x236   :  { %v1042_v23 = vadd.f32 %v1041_v21, %v832_v20 }
 0x238   :  { %v1168_v24 = vpack.c.bf16 %v1042_v23, %v1042_v23  ;;  %v4071_v23 = vld [vmem:[#allocation2 + $0x230] sm:$0xf] }
 0x23a   :  { %v1360_v36 = vunpack.c.l.b16 %v1168_v24 }
 0x23c   :  { %v1375_v37 = vpack.c.b16 %v1360_v36, %v1359_v35  ;;  %v835_v41 = vpop.f32.mrf.mxu0 }
 0x23d   :  { %v1044_v43 = vpop.f32.mrf.mxu1 }
 0x23e   :  { %1916 = vmatmul.bf16.vlgmr.msrb.gmra.mxu3 %v1375_v37  ;;  %v1045_v45 = vadd.f32 %v1044_v43, %v835_v41  ;;  %v4072_v37 = vor.u32 %v4837_v25, %v4071_v23  ;;  %v4087_v23 = vld [vmem:[#allocation2 + $0x250] sm:$0xf] }
 0x23f   :  { %874 = vmatmul.bf16.gmra.mxu0 %v4056_v38  ;;  %v4076_v38 = vor.u32 %v4836_v28, %v4073_v32  ;;  %v4841_v28 = vld [vmem:[#allocation2 + $0x254] sm:$0xf0]  ;;  %v4840_v32 = vld [vmem:[#allocation2 + $0x254] sm:$0xf] }
 0x240   :  { %1083 = vmatmul.bf16.gmra.mxu1 %v4060_v39  ;;  %v1169_v52 = vpack.c.bf16 %v1045_v45, %v1045_v45 }
 0x241   :  { %v1868_v44 = vpop.f32.mrf.mxu2 }
 0x242   :  { %v5407_v46 = vadd.f32 %v1868_v44, %v5333_v10  ;;  %v1361_v2 = vunpack.c.l.b16 %v1169_v52 }
 0x244   :  { %v837_v49 = vpop.f32.mrf.mxu0 }
 0x245   :  { %v1046_v51 = vpop.f32.mrf.mxu1 }
 0x246   :  { %v1047_v53 = vadd.f32 %v1046_v51, %v837_v49 }
 0x248   :  { %v1170_v54 = vpack.c.bf16 %v1047_v53, %v1047_v53 }
 0x249   :  { %v5409_v57 = vpop.f32.mrf.mxu2 }
 0x24a   :  { %v1362_v3 = vunpack.c.l.b16 %v1170_v54  ;;  %v4079_v54 = vld [vmem:[#allocation2 + $0x240] sm:$0xf] }
 0x24c   :  { %v1376_v4 = vpack.c.b16 %v1362_v3, %v1361_v2  ;;  %v840_v8 = vpop.f32.mrf.mxu0 }
 0x24d   :  { %v1049_v9 = vpop.f32.mrf.mxu1 }
 0x24e   :  { %1921 = vmatmul.bf16.gmra.mxu3 %v1376_v4  ;;  %v1050_v12 = vadd.f32 %v1049_v9, %v840_v8 }
 0x24f   :  { %879 = vmatmul.bf16.gmra.mxu0 %v4064_v5  ;;  %v4080_v5 = vor.u32 %v4839_v61, %v4079_v54  ;;  %v4883_v54 = vld [vmem:[%s5932_s2 + $0x128] sm:$0xff] }
 0x250   :  { %1088 = vmatmul.bf16.gmra.mxu1 %v4068_v7  ;;  %v1171_v20 = vpack.c.bf16 %v1050_v12, %v1050_v12  ;;  %v4084_v7 = vor.u32 %v4838_v62, %v4081_v63 }
 0x251   :  { %v1873_v10 = vpop.f32.mrf.mxu2 }
 0x252   :  { %v5412_v13 = vadd.f32 %v1873_v10, %v5340_v33  ;;  %v1363_v34 = vunpack.c.l.b16 %v1171_v20 }
 0x254   :  { %v842_v14 = vpop.f32.mrf.mxu0 }
 0x255   :  { %v1051_v15 = vpop.f32.mrf.mxu1 }
 0x256   :  { %v1052_v21 = vadd.f32 %v1051_v15, %v842_v14 }
 0x258   :  { %v1172_v22 = vpack.c.bf16 %v1052_v21, %v1052_v21 }
 0x259   :  { %v5414_v24 = vpop.f32.mrf.mxu2 }
 0x25a   :  { %v1364_v35 = vunpack.c.l.b16 %v1172_v22 }
 0x25c   :  { %v1377_v36 = vpack.c.b16 %v1364_v35, %v1363_v34  ;;  %v845_v39 = vpop.f32.mrf.mxu0  ;;  %v4089_v34 = vld [vmem:[#allocation2 + $0x258] sm:$0xf0] }
 0x25d   :  { %v1054_v41 = vpop.f32.mrf.mxu1 }
 0x25e   :  { %1926 = vmatmul.bf16.gmra.mxu3 %v1377_v36  ;;  %v1055_v43 = vadd.f32 %v1054_v41, %v845_v39  ;;  %v4092_v39 = vor.u32 %v4840_v32, %v4089_v34 }
 0x25f   :  { %884 = vmatmul.bf16.gmra.mxu0 %v4072_v37 }
 0x260   :  { %1093 = vmatmul.bf16.gmra.mxu1 %v4076_v38  ;;  %v1173_v51 = vpack.c.bf16 %v1055_v43, %v1055_v43  ;;  %v4088_v38 = vor.u32 %v4841_v28, %v4087_v23  ;;  %v4880_v23 = vld [vmem:[%s5932_s2 + $0x110] sm:$0xff] }
 0x261   :  { %v1878_v33 = vpop.f32.mrf.mxu2 }
 0x262   :  { %v5417_v44 = vadd.f32 %v1878_v33, %v5345_v56  ;;  %v1365_v2 = vunpack.c.l.b16 %v1173_v51 }
 0x264   :  { %v847_v45 = vpop.f32.mrf.mxu0 }
 0x265   :  { %v1056_v49 = vpop.f32.mrf.mxu1 }
 0x266   :  { %v1057_v52 = vadd.f32 %v1056_v49, %v847_v45  ;;  %v4884_v45 = vld [vmem:[%s5932_s2 + $0x130] sm:$0xff] }
 0x268   :  { %v1174_v53 = vpack.c.bf16 %v1057_v52, %v1057_v52 }
 0x269   :  { %v5419_v55 = vpop.f32.mrf.mxu2 }
 0x26a   :  { %v1366_v3 = vunpack.c.l.b16 %v1174_v53 }
 0x26c   :  { %v1378_v4 = vpack.c.b16 %v1366_v3, %v1365_v2  ;;  %v850_v8 = vpop.f32.mrf.mxu0  ;;  %v4095_v2 = vld [vmem:[#allocation2 + $0x260] sm:$0xf]  ;;  %v4843_v3 = vld [vmem:[#allocation2 + $0x264] sm:$0xf0] }
 0x26d   :  { %v1059_v9 = vpop.f32.mrf.mxu1 }
 0x26e   :  { %1931 = vmatmul.bf16.gmra.mxu3 %v1378_v4  ;;  %v1060_v10 = vadd.f32 %v1059_v9, %v850_v8 }
 0x26f   :  { %889 = vmatmul.bf16.gmra.mxu0 %v4080_v5  ;;  %v4842_v5 = vld [vmem:[#allocation2 + $0x264] sm:$0xf] }
 0x270   :  { %1098 = vmatmul.bf16.gmra.mxu1 %v4084_v7  ;;  %v1175_v20 = vpack.c.bf16 %v1060_v10, %v1060_v10  ;;  %v4097_v7 = vld [vmem:[#allocation2 + $0x268] sm:$0xf0]  ;;  %v4096_v10 = vor.u32 %v4843_v3, %v4095_v2 }
 0x271   :  { %v1883_v56 = vpop.f32.mrf.mxu2 }
 0x272   :  { %v5422_v12 = vadd.f32 %v1883_v56, %v5352_v19  ;;  %v1367_v35 = vunpack.c.l.b16 %v1175_v20  ;;  %v4885_v19 = vld [vmem:[%s5932_s2 + $0x138] sm:$0xff] }
 0x273   :  { %1957 = vmatpush.bf16.msra.mxu2 %v4885_v19 }
 0x274   :  { %v852_v14 = vpop.f32.mrf.mxu0 }
 0x275   :  { %v1061_v15 = vpop.f32.mrf.mxu1 }
 0x276   :  { %v1062_v21 = vadd.f32 %v1061_v15, %v852_v14  ;;  %v4100_v14 = vor.u32 %v4842_v5, %v4097_v7 }
 0x277   :  { %1958 = vmatpush.bf16.msra.mxu2 %v4884_v45  ;;  %v4105_v45 = vld [vmem:[#allocation2 + $0x278] sm:$0xf0] }
 0x278   :  { %v1176_v22 = vpack.c.bf16 %v1062_v21, %v1062_v21  ;;  %v4881_v21 = vld [vmem:[%s5932_s2 + $0x118] sm:$0xff] }
 0x279   :  { %v5424_v25 = vpop.f32.mrf.mxu2 }
 0x27a   :  { %v1368_v36 = vunpack.c.l.b16 %v1176_v22 }
 0x27b   :  { %1959 = vmatpush.bf16.msra.mxu2 %v4883_v54 }
 0x27c   :  { %v1379_v37 = vpack.c.b16 %v1368_v36, %v1367_v35  ;;  %v855_v41 = vpop.f32.mrf.mxu0  ;;  %v4879_v36 = vld [vmem:[%s5932_s2 + $0x108] sm:$0xff] }
 0x27d   :  { %v1064_v33 = vpop.f32.mrf.mxu1 }
 0x27e   :  { %1936 = vmatmul.bf16.gmra.mxu3 %v1379_v37  ;;  %v1065_v49 = vadd.f32 %v1064_v33, %v855_v41  ;;  %v4103_v41 = vld [vmem:[#allocation2 + $0x270] sm:$0xf]  ;;  %v4845_v33 = vld [vmem:[#allocation2 + $0x274] sm:$0xf0] }
 0x27f   :  { %894 = vmatmul.bf16.gmra.mxu0 %v4088_v38  ;;  %v4104_v54 = vor.u32 %v4845_v33, %v4103_v41 }
 0x280   :  { %1103 = vmatmul.bf16.gmra.mxu1 %v4092_v39  ;;  %v1177_v61 = vpack.c.bf16 %v1065_v49, %v1065_v49 }
 0x281   :  { %v1888_v43 = vpop.f32.mrf.mxu2 }
 0x282   :  { %v5433_v51 = vadd.f32 %v1888_v43, %v5365_v47  ;;  %v4882_v47 = vld [vmem:[%s5932_s2 + $0x120] sm:$0xff]  ;;  %v1369_v8 = vunpack.c.l.b16 %v1177_v61  ;;  %v4844_v43 = vld [vmem:[#allocation2 + $0x274] sm:$0xf] }
 0x283   :  { %1960 = vmatpush.bf16.msra.mxu2 %v4882_v47  ;;  %v4108_v61 = vor.u32 %v4844_v43, %v4105_v45 }
 0x284   :  { %v857_v52 = vpop.f32.mrf.mxu0 }
 0x285   :  { %v1066_v53 = vpop.f32.mrf.mxu1 }
 0x286   :  { %v1067_v62 = vadd.f32 %v1066_v53, %v857_v52 }
 0x287   :  { %1961 = vmatpush.bf16.msra.mxu2 %v4881_v21 }
 0x288   :  { %v1178_v63 = vpack.c.bf16 %v1067_v62, %v1067_v62 }
 0x289   :  { %v5438_v4 = vpop.f32.mrf.mxu2 }
 0x28a   :  { %v1370_v9 = vunpack.c.l.b16 %v1178_v63 }
 0x28b   :  { %1962 = vmatpush.bf16.msra.mxu2 %v4880_v23 }
 0x28c   :  { %v1380_v56 = vpack.c.b16 %v1370_v9, %v1369_v8  ;;  %v860_v15 = vpop.f32.mrf.mxu0 }
 0x28d   :  { %v1069_v20 = vpop.f32.mrf.mxu1 }
 0x28e   :  { %1941 = vmatmul.bf16.gmra.mxu3 %v1380_v56  ;;  %v1070_v28 = vadd.f32 %v1069_v20, %v860_v15 }
 0x28f   :  { %899 = vmatmul.bf16.gmra.mxu0 %v4096_v10  ;;  %1963 = vmatpush.bf16.msra.mxu2 %v4879_v36 }
 0x290   :  { %1108 = vmatmul.bf16.gmra.mxu1 %v4100_v14  ;;  %v1179_v37 = vpack.c.bf16 %v1070_v28, %v1070_v28 }
 0x291   :  { %v1893_v22 = vpop.f32.mrf.mxu2 }
 0x292   :  { %v5450_v32 = vadd.f32 %v1893_v22, %v5384_v16  ;;  %v4878_v16 = vld [vmem:[%s5932_s2 + $0x100] sm:$0xff]  ;;  %v1371_v49 = vunpack.c.l.b16 %v1179_v37  ;;  %s5116_s2 = smov 16  }
 0x293   :  { %1964 = vmatpush.bf16.msra.mxu2 %v4878_v16 }
 0x294   :  { %v862_v34 = vpop.f32.mrf.mxu0 }
 0x295   :  { %v1071_v35 = vpop.f32.mrf.mxu1 }
 0x296   :  { %v1072_v38 = vadd.f32 %v1071_v35, %v862_v34 }
 0x298   :  { %v1180_v39 = vpack.c.bf16 %v1072_v38, %v1072_v38 }
 0x299   :  { %v5455_v19 = vpop.f32.mrf.mxu2 }
 0x29a   :  { %v1372_v52 = vunpack.c.l.b16 %v1180_v39  ;;  %v5468_v39 = vpop.f32.mrf.mxu3 }
 0x29c   :  { %v1381_v53 = vpack.c.b16 %v1372_v52, %v1371_v49  ;;  %v865_v62 = vpop.f32.mrf.mxu0 }
 0x29d   :  { %v1074_v63 = vpop.f32.mrf.mxu1 }
 0x29e   :  { %1946 = vmatmul.bf16.gmra.mxu3 %v1381_v53  ;;  %v1075_v3 = vadd.f32 %v1074_v63, %v865_v62 }
 0x29f   :  { %904 = vmatmul.bf16.gmra.mxu0 %v4104_v54 }
 0x2a0   :  { %1113 = vmatmul.bf16.gmra.mxu1 %v4108_v61  ;;  %v1181_v8 = vpack.c.bf16 %v1075_v3, %v1075_v3 }
 0x2a1   :  { %v1898_v2 = vpop.f32.mrf.mxu2 }
 0x2a2   :  { %v5461_v5 = vadd.f32 %v1898_v2, %v5397_v50  ;;  %v1373_v14 = vunpack.c.l.b16 %v1181_v8 }
 0x2a4   :  { %v867_v7 = vpop.f32.mrf.mxu0 }
 0x2a5   :  { %v1076_v47 = vpop.f32.mrf.mxu1 }
 0x2a6   :  { %v1077_v9 = vadd.f32 %v1076_v47, %v867_v7 }
 0x2a8   :  { %v1182_v56 = vpack.c.bf16 %v1077_v9, %v1077_v9 }
 0x2a9   :  { %v5463_v10 = vpop.f32.mrf.mxu2 }
 0x2aa   :  { %v1374_v15 = vunpack.c.l.b16 %v1182_v56 }
 0x2ac   :  { %v1382_v20 = vpack.c.b16 %v1374_v15, %v1373_v14  ;;  %v870_v21 = vpop.f32.mrf.mxu0 }
 0x2ad   :  { %v1079_v22 = vpop.f32.mrf.mxu1 }
 0x2ae   :  { %1951 = vmatmul.bf16.gmra.mxu3 %v1382_v20  ;;  %v1080_v28 = vadd.f32 %v1079_v22, %v870_v21 }
 0x2b0   :  { %v1183_v36 = vpack.c.bf16 %v1080_v28, %v1080_v28 }
 0x2b1   :  { %v1903_v23 = vpop.f32.mrf.mxu2 }
 0x2b2   :  { %v5466_v34 = vadd.f32 %v1903_v23, %v5402_v17  ;;  %v1407_v41 = vunpack.c.l.b16 %v1183_v36 }
 0x2b4   :  { %v872_v50 = vpop.f32.mrf.mxu0 }
 0x2b5   :  { %v1081_v35 = vpop.f32.mrf.mxu1 }
 0x2b6   :  { %v1082_v37 = vadd.f32 %v1081_v35, %v872_v50 }
 0x2b8   :  { %v1184_v38 = vpack.c.bf16 %v1082_v37, %v1082_v37 }
 0x2ba   :  { %v1408_v33 = vunpack.c.l.b16 %v1184_v38 }
 0x2bc   :  { %v1423_v43 = vpack.c.b16 %v1408_v33, %v1407_v41  ;;  %v875_v45 = vpop.f32.mrf.mxu0 }
 0x2bd   :  { %v1084_v16 = vpop.f32.mrf.mxu1 }
 0x2be   :  { %1965 = vmatmul.bf16.vlgmr.msra.gmra.mxu2 %v1423_v43  ;;  %v1085_v52 = vadd.f32 %v1084_v16, %v875_v45 }
 0x2c0   :  { %v1185_v61 = vpack.c.bf16 %v1085_v52, %v1085_v52 }
 0x2c1   :  { %v1917_v49 = vpop.f32.mrf.mxu3 }
 0x2c2   :  { %v5471_v53 = vadd.f32 %v1917_v49, %v5407_v46  ;;  %v1409_v3 = vunpack.c.l.b16 %v1185_v61 }
 0x2c4   :  { %v877_v17 = vpop.f32.mrf.mxu0 }
 0x2c5   :  { %v1086_v54 = vpop.f32.mrf.mxu1 }
 0x2c6   :  { %v1087_v62 = vadd.f32 %v1086_v54, %v877_v17 }
 0x2c8   :  { %v1186_v63 = vpack.c.bf16 %v1087_v62, %v1087_v62 }
 0x2c9   :  { %v5473_v2 = vpop.f32.mrf.mxu3 }
 0x2ca   :  { %v1410_v7 = vunpack.c.l.b16 %v1186_v63 }
 0x2cc   :  { %v1424_v47 = vpack.c.b16 %v1410_v7, %v1409_v3  ;;  %v880_v8 = vpop.f32.mrf.mxu0 }
 0x2cd   :  { %v1089_v9 = vpop.f32.mrf.mxu1 }
 0x2ce   :  { %1970 = vmatmul.bf16.gmra.mxu2 %v1424_v47  ;;  %v1090_v14 = vadd.f32 %v1089_v9, %v880_v8 }
 0x2d0   :  { %v1187_v21 = vpack.c.bf16 %v1090_v14, %v1090_v14 }
 0x2d1   :  { %v1922_v56 = vpop.f32.mrf.mxu3 }
 0x2d2   :  { %v5476_v15 = vadd.f32 %v1922_v56, %v5412_v13  ;;  %v1411_v50 = vunpack.c.l.b16 %v1187_v21 }
 0x2d4   :  { %v882_v46 = vpop.f32.mrf.mxu0 }
 0x2d5   :  { %v1091_v20 = vpop.f32.mrf.mxu1 }
 0x2d6   :  { %v1092_v22 = vadd.f32 %v1091_v20, %v882_v46 }
 0x2d8   :  { %v1188_v23 = vpack.c.bf16 %v1092_v22, %v1092_v22 }
 0x2d9   :  { %v5478_v28 = vpop.f32.mrf.mxu3 }
 0x2da   :  { %v1412_v35 = vunpack.c.l.b16 %v1188_v23 }
 0x2dc   :  { %v1425_v36 = vpack.c.b16 %v1412_v35, %v1411_v50  ;;  %v885_v37 = vpop.f32.mrf.mxu0 }
 0x2dd   :  { %v1094_v38 = vpop.f32.mrf.mxu1 }
 0x2de   :  { %1975 = vmatmul.bf16.gmra.mxu2 %v1425_v36  ;;  %v1095_v33 = vadd.f32 %v1094_v38, %v885_v37 }
 0x2e0   :  { %v1189_v16 = vpack.c.bf16 %v1095_v33, %v1095_v33 }
 0x2e1   :  { %v1927_v41 = vpop.f32.mrf.mxu3 }
 0x2e2   :  { %v5481_v43 = vadd.f32 %v1927_v41, %v5417_v44  ;;  %v1413_v17 = vunpack.c.l.b16 %v1189_v16 }
 0x2e4   :  { %v887_v13 = vpop.f32.mrf.mxu0 }
 0x2e5   :  { %v1096_v45 = vpop.f32.mrf.mxu1 }
 0x2e6   :  { %v1097_v49 = vadd.f32 %v1096_v45, %v887_v13 }
 0x2e8   :  { %v1190_v52 = vpack.c.bf16 %v1097_v49, %v1097_v49 }
 0x2ea   :  { %v1414_v54 = vunpack.c.l.b16 %v1190_v52 }
 0x2ec   :  { %v1426_v61 = vpack.c.b16 %v1414_v54, %v1413_v17  ;;  %v890_v62 = vpop.f32.mrf.mxu0 }
 0x2ed   :  { %v1099_v63 = vpop.f32.mrf.mxu1 }
 0x2ee   :  { %1980 = vmatmul.bf16.gmra.mxu2 %v1426_v61  ;;  %v1100_v3 = vadd.f32 %v1099_v63, %v890_v62 }
 0x2f0   :  { %v1191_v8 = vpack.c.bf16 %v1100_v3, %v1100_v3 }
 0x2f2   :  { %v1415_v14 = vunpack.c.l.b16 %v1191_v8 }
 0x2f4   :  { %v892_v7 = vpop.f32.mrf.mxu0 }
 0x2f5   :  { %v1101_v47 = vpop.f32.mrf.mxu1 }
 0x2f6   :  { %v1102_v9 = vadd.f32 %v1101_v47, %v892_v7 }
 0x2f8   :  { %v1192_v56 = vpack.c.bf16 %v1102_v9, %v1102_v9 }
 0x2fa   :  { %v1416_v44 = vunpack.c.l.b16 %v1192_v56 }
 0x2fc   :  { %v1427_v46 = vpack.c.b16 %v1416_v44, %v1415_v14  ;;  %v895_v20 = vpop.f32.mrf.mxu0 }
 0x2fd   :  { %v1104_v21 = vpop.f32.mrf.mxu1 }
 0x2fe   :  { %1985 = vmatmul.bf16.gmra.mxu2 %v1427_v46  ;;  %v1105_v22 = vadd.f32 %v1104_v21, %v895_v20 }
 0x300   :  { %v1193_v35 = vpack.c.bf16 %v1105_v22, %v1105_v22 }
 0x302   :  { %v1417_v38 = vunpack.c.l.b16 %v1193_v35 }
 0x304   :  { %v897_v23 = vpop.f32.mrf.mxu0 }
 0x305   :  { %v1106_v50 = vpop.f32.mrf.mxu1 }
 0x306   :  { %v1107_v36 = vadd.f32 %v1106_v50, %v897_v23  ;;  %v5483_v23 = vpop.f32.mrf.mxu2 }
 0x308   :  { %v1194_v37 = vpack.c.bf16 %v1107_v36, %v1107_v36 }
 0x30a   :  { %v1418_v41 = vunpack.c.l.b16 %v1194_v37  ;;  %v1929_v37 = vpop.f32.mrf.mxu3 }
 0x30c   :  { %v1428_v33 = vpack.c.b16 %v1418_v41, %v1417_v38  ;;  %v900_v13 = vpop.f32.mrf.mxu0 }
 0x30d   :  { %v1109_v45 = vpop.f32.mrf.mxu1 }
 0x30e   :  { %1990 = vmatmul.bf16.gmra.mxu2 %v1428_v33  ;;  %v1110_v16 = vadd.f32 %v1109_v45, %v900_v13 }
 0x310   :  { %v1195_v17 = vpack.c.bf16 %v1110_v16, %v1110_v16 }
 0x312   :  { %v1419_v62 = vunpack.c.l.b16 %v1195_v17  ;;  %v1932_v13 = vpop.f32.mrf.mxu3 }
 0x314   :  { %v902_v49 = vpop.f32.mrf.mxu0 }
 0x315   :  { %v1111_v52 = vpop.f32.mrf.mxu1 }
 0x316   :  { %v1112_v54 = vadd.f32 %v1111_v52, %v902_v49 }
 0x318   :  { %v1196_v61 = vpack.c.bf16 %v1112_v54, %v1112_v54 }
 0x31a   :  { %v1420_v63 = vunpack.c.l.b16 %v1196_v61  ;;  %v1934_v49 = vpop.f32.mrf.mxu3 }
 0x31c   :  { %v1429_v3 = vpack.c.b16 %v1420_v63, %v1419_v62  ;;  %v905_v7 = vpop.f32.mrf.mxu0 }
 0x31d   :  { %v1114_v47 = vpop.f32.mrf.mxu1 }
 0x31e   :  { %1995 = vmatmul.bf16.gmra.mxu2 %v1429_v3  ;;  %v1115_v8 = vadd.f32 %v1114_v47, %v905_v7 }
 0x320   :  { %v1197_v14 = vpack.c.bf16 %v1115_v8, %v1115_v8 }
 0x322   :  { %v1421_v20 = vunpack.c.l.b16 %v1197_v14  ;;  %v1937_v17 = vpop.f32.mrf.mxu3 }
 0x324   :  { %v907_v9 = vpop.f32.mrf.mxu0 }
 0x325   :  { %v1116_v56 = vpop.f32.mrf.mxu1 }
 0x326   :  { %v1117_v44 = vadd.f32 %v1116_v56, %v907_v9 }
 0x328   :  { %v1198_v46 = vpack.c.bf16 %v1117_v44, %v1117_v44 }
 0x32a   :  { %v1422_v21 = vunpack.c.l.b16 %v1198_v46  ;;  %v1939_v61 = vpop.f32.mrf.mxu3 }
 0x32c   :  { %v1430_v22 = vpack.c.b16 %v1422_v21, %v1421_v20  ;;  %v1783_v20 = vadd.f32 %v5338_v31, %v5328_v0 }
 0x32e   :  { %2000 = vmatmul.bf16.gmra.mxu2 %v1430_v22 }
 0x332   :  { %v1942_v63 = vpop.f32.mrf.mxu3 }
 0x33a   :  { %v1944_v7 = vpop.f32.mrf.mxu3 }
 0x341   :  { %v1966_v50 = vpop.f32.mrf.mxu2 }
 0x342   :  { %v5486_v35 = vadd.f32 %v1966_v50, %v5471_v53  ;;  %v1947_v56 = vpop.f32.mrf.mxu3 }
 0x349   :  { %v1968_v36 = vpop.f32.mrf.mxu2 }
 0x351   :  { %v1971_v38 = vpop.f32.mrf.mxu2 }
 0x352   :  { %v5489_v41 = vadd.f32 %v1971_v38, %v5476_v15  ;;  %v1773_v15 = vadd.f32 %v5323_v42, %v5328_v0  ;;  %v1832_v42 = vadd.f32 %v5349_v1, %v1783_v20  ;;  %v1793_v1 = vadd.f32 %v5356_v30, %v5328_v0  ;;  %v1949_v38 = vpop.f32.mrf.mxu3 }
 0x353   :  { %v1943_v20 = vadd.f32 %v1942_v63, %v5450_v32  ;;  %v1948_v63 = vadd.f32 %v1947_v56, %v5461_v5 }
 0x354   :  { %v1822_v8 = vadd.f32 %v5335_v18, %v1773_v15 }
 0x356   :  { %v1871_v9 = vadd.f32 %v5409_v57, %v1822_v8  ;;  %v1881_v57 = vadd.f32 %v5419_v55, %v1832_v42  ;;  %v1933_v55 = vadd.f32 %v1932_v13, %v5422_v12  ;;  %v1798_v12 = vadd.f32 %v5378_v11, %v5328_v0 }
 0x358   :  { %v1920_v44 = vadd.f32 %v5473_v2, %v1871_v9  ;;  %v1930_v31 = vadd.f32 %v1929_v37, %v1881_v57  ;;  %v1847_v9 = vadd.f32 %v5389_v29, %v1798_v12 }
 0x359   :  { %v1973_v33 = vpop.f32.mrf.mxu2 }
 0x35a   :  { %v5505_v22 = vadd.f32 %v1968_v36, %v1920_v44  ;;  %v2008_v36 = vmax.f32 %v5489_v41, 0.0  ;;  %v1952_v42 = vpop.f32.mrf.mxu3 }
 0x35b   :  { %v1953_v5 = vadd.f32 %v1952_v42, %v5466_v34 }
 0x361   :  { %v1976_v45 = vpop.f32.mrf.mxu2 }
 0x362   :  { %v5492_v16 = vadd.f32 %v1976_v45, %v5481_v43  ;;  %v1778_v43 = vadd.f32 %v5330_v6, %v5328_v0  ;;  %v1788_v6 = vadd.f32 %v5347_v59, %v5328_v0  ;;  %v1842_v45 = vadd.f32 %v5370_v58, %v1793_v1 }
 0x364   :  { %v1827_v14 = vadd.f32 %v5342_v40, %v1778_v43  ;;  %v2007_v40 = vmax.f32 %v5505_v22, 0.0  ;;  %v1837_v50 = vadd.f32 %v5354_v26, %v1788_v6  ;;  %v1891_v13 = vadd.f32 %v5438_v4, %v1842_v45 }
 0x365   :  { %v1938_v43 = vadd.f32 %v1937_v17, %v5433_v51  ;;  %v1803_v51 = vadd.f32 %v5395_v48, %v5328_v0  ;;  %v1896_v4 = vadd.f32 %v5455_v19, %v1847_v9 }
 0x366   :  { %v1876_v21 = vadd.f32 %v5414_v24, %v1827_v14  ;;  %v2006_v24 = vmax.f32 %v5486_v35, 0.0  ;;  %v1940_v14 = vadd.f32 %v1939_v61, %v1891_v13 }
 0x368   :  { %v1925_v18 = vadd.f32 %v5478_v28, %v1876_v21  ;;  %v1886_v28 = vadd.f32 %v5424_v25, %v1837_v50  ;;  %v2010_v25 = vmax.f32 %v5492_v16, 0.0  ;;  %v1852_v21 = vadd.f32 %v5399_v60, %v1803_v51 }
 0x369   :  { %v1978_v52 = vpop.f32.mrf.mxu2 }
 0x36a   :  { %v5513_v2 = vadd.f32 %v1973_v33, %v1925_v18  ;;  %v2022_v33 = vadd.f32 %v2007_v40, %v2006_v24  ;;  %v5527_v37 = vadd.f32 %v1978_v52, %v1930_v31  ;;  %v1935_v15 = vadd.f32 %v1934_v49, %v1886_v28 }
 0x36b   :  { %v1901_v32 = vadd.f32 %v5463_v10, %v1852_v21  ;;  %v1808_v10 = vadd.f32 %v5404_v27, %v5328_v0  ;;  %v1954_v0 = vpop.f32.mrf.mxu3 }
 0x36c   :  { %v2009_v26 = vmax.f32 %v5513_v2, 0.0  ;;  %v2023_v30 = vadd.f32 %v2022_v33, %v2008_v36  ;;  %v2011_v58 = vmax.f32 %v5527_v37, 0.0 }
 0x36d   :  { %v1950_v60 = vadd.f32 %v1949_v38, %v1901_v32  ;;  %v1857_v28 = vadd.f32 %v5468_v39, %v1808_v10 }
 0x36e   :  { %v2024_v52 = vadd.f32 %v2023_v30, %v2009_v26 }
 0x36f   :  { %v1906_v27 = vadd.f32 %v5483_v23, %v1857_v28 }
 0x371   :  { %v1981_v54 = vpop.f32.mrf.mxu2  ;;  %v1955_v45 = vadd.f32 %v1954_v0, %v1906_v27 }
 0x372   :  { %v5533_v8 = vadd.f32 %v1981_v54, %v1933_v55  ;;  %v2025_v54 = vadd.f32 %v2024_v52, %v2010_v25 }
 0x374   :  { %v2012_v44 = vmax.f32 %v5533_v8, 0.0 }
 0x379   :  { %v1983_v62 = vpop.f32.mrf.mxu2 }
 0x37a   :  { %v5542_v49 = vadd.f32 %v1983_v62, %v1935_v15  ;;  %v2026_v62 = vadd.f32 %v2025_v54, %v2011_v58 }
 0x37c   :  { %v2013_v29 = vmax.f32 %v5542_v49, 0.0  ;;  %v2027_v18 = vadd.f32 %v2026_v62, %v2012_v44 }
 0x37e   :  { %v2028_v6 = vadd.f32 %v2027_v18, %v2013_v29 }
 0x381   :  { %v1986_v53 = vpop.f32.mrf.mxu2 }
 0x382   :  { %v5548_v11 = vadd.f32 %v1986_v53, %v1938_v43  ;;  %v1945_v53 = vadd.f32 %v1944_v7, %v1896_v4 }
 0x384   :  { %v2014_v48 = vmax.f32 %v5548_v11, 0.0 }
 0x386   :  { %v2029_v7 = vadd.f32 %v2028_v6, %v2014_v48 }
 0x389   :  { %v1988_v3 = vpop.f32.mrf.mxu2 }
 0x38a   :  { %v5557_v61 = vadd.f32 %v1988_v3, %v1940_v14 }
 0x38c   :  { %v2015_v3 = vmax.f32 %v5557_v61, 0.0 }
 0x38e   :  { %v2030_v56 = vadd.f32 %v2029_v7, %v2015_v3 }
 0x391   :  { %v1991_v47 = vpop.f32.mrf.mxu2 }
 0x392   :  { %v5563_v19 = vadd.f32 %v1991_v47, %v1943_v20 }
 0x394   :  { %v2016_v50 = vmax.f32 %v5563_v19, 0.0 }
 0x396   :  { %v2031_v38 = vadd.f32 %v2030_v56, %v2016_v50 }
 0x399   :  { %v1993_v46 = vpop.f32.mrf.mxu2 }
 0x39a   :  { %v5570_v57 = vadd.f32 %v1993_v46, %v1945_v53 }
 0x39c   :  { %v2017_v46 = vmax.f32 %v5570_v57, 0.0 }
 0x39e   :  { %v2032_v34 = vadd.f32 %v2031_v38, %v2017_v46 }
 0x3a1   :  { %v1996_v59 = vpop.f32.mrf.mxu2 }
 0x3a2   :  { %v5575_v31 = vadd.f32 %v1996_v59, %v1948_v63 }
 0x3a4   :  { %v2018_v59 = vmax.f32 %v5575_v31, 0.0 }
 0x3a6   :  { %v2033_v15 = vadd.f32 %v2032_v34, %v2018_v59 }
 0x3a9   :  { %v1998_v17 = vpop.f32.mrf.mxu2 }
 0x3aa   :  { %v5583_v1 = vadd.f32 %v1998_v17, %v1950_v60 }
 0x3ac   :  { %v2019_v33 = vmax.f32 %v5583_v1, 0.0 }
 0x3ae   :  { %v2034_v12 = vadd.f32 %v2033_v15, %v2019_v33 }
 0x3b1   :  { %v2001_v47 = vpop.f32.mrf.mxu2 }
 0x3b2   :  { %v5589_v55 = vadd.f32 %v2001_v47, %v1953_v5 }
 0x3b4   :  { %v2020_v39 = vmax.f32 %v5589_v55, 0.0 }
 0x3b6   :  { %v2035_v23 = vadd.f32 %v2034_v12, %v2020_v39 }
 0x3b9   :  { %v2003_v30 = vpop.f32.mrf.mxu2 }
 0x3ba   :  { %v5600_v13 = vadd.f32 %v2003_v30, %v1955_v45 }
 0x3bc   :  { %v2021_v43 = vmax.f32 %v5600_v13, 0.0 }
 0x3be   :  { %v2036_v52 = vadd.f32 %v2035_v23, %v2021_v43 }
 0x3c0   :  { %v2037_v9 = vrot.slane %v2036_v52, 4 }
 0x3c2   :  { %v2038_v14 = vadd.f32 %v2037_v9, %v2036_v52 }
 0x3c4   :  { %v2039_v54 = vrot.slane %v2038_v14, 2 }
 0x3c6   :  { %v2040_v51 = vadd.f32 %v2039_v54, %v2038_v14 }
 0x3c8   :  { %v2041_v4 = vrot.slane %v2040_v51, 1 }
 0x3ca   :  { %v2042_v17 = vadd.f32 %v2041_v4, %v2040_v51 }
 0x3cc   :  { %2043 = vrot.lane.b32.xlu0 %v2042_v17, %s5114_s6 }
 0x43e   :  { %v2044_v20 = vpop.permute.xlu0 %2043 }
 0x43f   :  { %v2045_v62 = vadd.f32 %v2044_v20, %v2042_v17 }
 0x441   :  { %2046 = vrot.lane.b32.xlu0 %v2045_v62, %s5116_s2 }
 0x4b3   :  { %v2047_v21 = vpop.permute.xlu0 %2046 }
 0x4b4   :  { %v2048_v42 = vadd.f32 %v2047_v21, %v2045_v62 }
 0x4b6   :  { %2049 = vrot.lane.b32.xlu1 %v2048_v42, %s5117_s26 }
 0x528   :  { %v2050_v53 = vpop.permute.xlu1 %2049 }
 0x529   :  { %v2051_v18 = vadd.f32 %v2050_v53, %v2048_v42 }
 0x52b   :  { %2052 = vrot.lane.b32.xlu1 %v2051_v18, %s5110_s16 }
 0x59d   :  { %v2053_v32 = vpop.permute.xlu1 %2052 }
 0x59e   :  { %v2054_v63 = vadd.f32 %v2053_v32, %v2051_v18 }
 0x5a0   :  { %v2055_v6 = vmul.f32 0.00048828125, %v2054_v63 }
 0x5a2   :  { %v2056_v60 = vperm.slane %v2055_v6, 0 }
 0x5a4   :  { %v5613_v7 = vsub.f32 %v2006_v24, %v2056_v60  ;;  %v5617_v10 = vsub.f32 %v2007_v40, %v2056_v60  ;;  %v5621_v47 = vsub.f32 %v2008_v36, %v2056_v60  ;;  %v5629_v28 = vsub.f32 %v2009_v26, %v2056_v60 }
 0x5a5   :  { %v5633_v35 = vsub.f32 %v2010_v25, %v2056_v60  ;;  %v5639_v40 = vsub.f32 %v2011_v58, %v2056_v60  ;;  %v5645_v2 = vsub.f32 %v2012_v44, %v2056_v60  ;;  %v5651_v25 = vsub.f32 %v2013_v29, %v2056_v60 }
 0x5a6   :  { %v2073_v5 = vmul.f32 %v5613_v7, %v5613_v7  ;;  %v2074_v56 = vmul.f32 %v5617_v10, %v5617_v10  ;;  %v2075_v22 = vmul.f32 %v5621_v47, %v5621_v47  ;;  %v2076_v24 = vmul.f32 %v5629_v28, %v5629_v28 }
 0x5a7   :  { %v2077_v16 = vmul.f32 %v5633_v35, %v5633_v35  ;;  %v2078_v37 = vmul.f32 %v5639_v40, %v5639_v40  ;;  %v5657_v38 = vsub.f32 %v2014_v48, %v2056_v60  ;;  %v2079_v8 = vmul.f32 %v5645_v2, %v5645_v2 }
 0x5a8   :  { %v2089_v41 = vadd.f32 %v2074_v56, %v2073_v5  ;;  %v5663_v0 = vsub.f32 %v2015_v3, %v2056_v60  ;;  %v2080_v49 = vmul.f32 %v5651_v25, %v5651_v25  ;;  %v5669_v27 = vsub.f32 %v2016_v50, %v2056_v60 }
 0x5a9   :  { %v2081_v11 = vmul.f32 %v5657_v38, %v5657_v38  ;;  %v5675_v34 = vsub.f32 %v2017_v46, %v2056_v60  ;;  %v2069_v45 = vsub.f32 %v2018_v59, %v2056_v60  ;;  %v2070_v15 = vsub.f32 %v2019_v33, %v2056_v60 }
 0x5aa   :  { %v2090_v36 = vadd.f32 %v2089_v41, %v2075_v22  ;;  %v2082_v61 = vmul.f32 %v5663_v0, %v5663_v0  ;;  %v2083_v19 = vmul.f32 %v5669_v27, %v5669_v27  ;;  %v2071_v46 = vsub.f32 %v2020_v39, %v2056_v60 }
 0x5ab   :  { %v2084_v30 = vmul.f32 %v5675_v34, %v5675_v34  ;;  %v2085_v12 = vmul.f32 %v2069_v45, %v2069_v45  ;;  %v2072_v31 = vsub.f32 %v2021_v43, %v2056_v60  ;;  %v2086_v59 = vmul.f32 %v2070_v15, %v2070_v15 }
 0x5ac   :  { %v2091_v26 = vadd.f32 %v2090_v36, %v2076_v24  ;;  %v2087_v9 = vmul.f32 %v2071_v46, %v2071_v46 }
 0x5ad   :  { %v2088_v54 = vmul.f32 %v2072_v31, %v2072_v31 }
 0x5ae   :  { %v2092_v58 = vadd.f32 %v2091_v26, %v2077_v16  ;;  %v5006_v26 = vld [vmem:[%s5939_s9] sm:$0x7] }
 0x5b0   :  { %v2093_v44 = vadd.f32 %v2092_v58, %v2078_v37 }
 0x5b2   :  { %v2094_v29 = vadd.f32 %v2093_v44, %v2079_v8  ;;  %v2155_v8 = vperm.slane %v5006_v26, 2 }
 0x5b4   :  { %v2095_v48 = vadd.f32 %v2094_v29, %v2080_v49 }
 0x5b6   :  { %v2096_v3 = vadd.f32 %v2095_v48, %v2081_v11 }
 0x5b8   :  { %v2097_v50 = vadd.f32 %v2096_v3, %v2082_v61 }
 0x5ba   :  { %v2098_v57 = vadd.f32 %v2097_v50, %v2083_v19 }
 0x5bc   :  { %v2099_v23 = vadd.f32 %v2098_v57, %v2084_v30 }
 0x5be   :  { %v2100_v52 = vadd.f32 %v2099_v23, %v2085_v12 }
 0x5c0   :  { %v2101_v14 = vadd.f32 %v2100_v52, %v2086_v59 }
 0x5c2   :  { %v2102_v51 = vadd.f32 %v2101_v14, %v2087_v9 }
 0x5c4   :  { %v2103_v1 = vadd.f32 %v2102_v51, %v2088_v54 }
 0x5c6   :  { %v2104_v33 = vrot.slane %v2103_v1, 4 }
 0x5c8   :  { %v2105_v4 = vadd.f32 %v2104_v33, %v2103_v1 }
 0x5ca   :  { %v2106_v17 = vrot.slane %v2105_v4, 2 }
 0x5cc   :  { %v2107_v20 = vadd.f32 %v2106_v17, %v2105_v4 }
 0x5ce   :  { %v2108_v62 = vrot.slane %v2107_v20, 1 }
 0x5d0   :  { %v2109_v21 = vadd.f32 %v2108_v62, %v2107_v20 }
 0x5d2   :  { %2110 = vrot.lane.b32.xlu2 %v2109_v21, %s5114_s6 }
 0x62c   :  { %v2111_v55 = vpop.permute.xlu2 %2110 }
 0x62d   :  { %v2112_v39 = vadd.f32 %v2111_v55, %v2109_v21 }
 0x62f   :  { %2113 = vrot.lane.b32.xlu2 %v2112_v39, %s5116_s2 }
 0x689   :  { %v2114_v13 = vpop.permute.xlu2 %2113 }
 0x68a   :  { %v2115_v43 = vadd.f32 %v2114_v13, %v2112_v39  ;;  %v4890_v13 = vld [vmem:[%s5933_s3 + $0x20] sm:$0xff] }
 0x68c   :  { %2116 = vrot.lane.b32.xlu0 %v2115_v43, %s5117_s26 }
 0x6fe   :  { %v2117_v42 = vpop.permute.xlu0 %2116 }
 0x6ff   :  { %v2118_v53 = vadd.f32 %v2117_v42, %v2115_v43  ;;  %v4891_v43 = vld [vmem:[%s5933_s3 + $0x28] sm:$0xff]  ;;  %v4905_v42 = vld [vmem:[%s5934_s4 + $0x38] sm:$0xff] }
 0x700   :  { %2636 = vmatpush.bf16.msrb.mxu2 %v4905_v42 }
 0x701   :  { %2119 = vrot.lane.b32.xlu1 %v2118_v53, %s5110_s16 }
 0x773   :  { %v2120_v18 = vpop.permute.xlu1 %2119 }
 0x774   :  { %v2121_v32 = vadd.f32 %v2120_v18, %v2118_v53  ;;  %v4904_v53 = vld [vmem:[%s5934_s4 + $0x30] sm:$0xff]  ;;  %v4903_v18 = vld [vmem:[%s5934_s4 + $0x28] sm:$0xff] }
 0x775   :  { %2637 = vmatpush.bf16.msrb.mxu2 %v4904_v53 }
 0x776   :  { %v2122_v63 = vmul.f32 0.00048828125, %v2121_v32  ;;  %v4902_v32 = vld [vmem:[%s5934_s4 + $0x20] sm:$0xff] }
 0x778   :  { %v2123_v6 = vadd.f32 1e-05, %v2122_v63  ;;  %v4892_v63 = vld [vmem:[%s5933_s3 + $0x30] sm:$0xff] }
 0x779   :  { %2638 = vmatpush.bf16.msrb.mxu2 %v4903_v18  ;;  %v4918_v18 = vld [vmem:[%s5934_s4 + $0xa0] sm:$0xff] }
 0x77a   :  { %4998 = vrsqrt.f32 %v2123_v6  ;;  %vm2130_vm1 = vweird.f32 %v2123_v6 }
 0x77d   :  { %2639 = vmatpush.bf16.msrb.mxu2 %v4902_v32 }
 0x780   :  { %v4999_v60 = vpop.eup %4998 }
 0x781   :  { %v2125_v5 = vmul.f32 %v4999_v60, %v2123_v6  ;;  %vm2131_vm0 = vweird.f32 %v4999_v60  ;;  %v4901_v6 = vld [vmem:[%s5934_s4 + $0x18] sm:$0xff] }
 0x782   :  { %vm2132_vm2 = vmor %vm2130_vm1, %vm2131_vm0  ;;  %2640 = vmatpush.bf16.msrb.mxu2 %v4901_v6  ;;  %v4917_v6 = vld [vmem:[%s5934_s4 + $0x98] sm:$0xff] }
 0x783   :  { %v2126_v56 = vmul.f32 %v4999_v60, %v2125_v5  ;;  %v4893_v5 = vld [vmem:[%s5933_s3 + $0x38] sm:$0xff] }
 0x785   :  { %v2127_v22 = vmul.f32 0.5, %v2126_v56  ;;  %v4899_v56 = vld [vmem:[%s5934_s4 + $0x8] sm:$0xff] }
 0x787   :  { %v2128_v41 = vsub.f32 1.5, %v2127_v22  ;;  %v4898_v22 = vld [vmem:[%s5934_s4] sm:$0xff] }
 0x789   :  { %v2129_v24 = vmul.f32 %v4999_v60, %v2128_v41  ;;  %v4894_v41 = vld [vmem:[%s5933_s3 + $0x40] sm:$0xff] }
 0x78b   :  { %v2133_v36 = vsel %vm2132_vm2, %v4999_v60, %v2129_v24  ;;  %v4900_v60 = vld [vmem:[%s5934_s4 + $0x10] sm:$0xff] }
 0x78c   :  { %v2135_v16 = vrot.slane %v2133_v36, 7  ;;  %2641 = vmatpush.bf16.msrb.mxu2 %v4900_v60  ;;  %v4916_v60 = vld [vmem:[%s5934_s4 + $0x90] sm:$0xff] }
 0x78e   :  { %v2137_v37 = vmul.f32 %v5006_v26, %v2135_v16 }
 0x790   :  { %v2138_v58 = vperm.slane %v2137_v37, 1  ;;  %2642 = vmatpush.bf16.msrb.mxu2 %v4899_v56  ;;  %v4895_v37 = vld [vmem:[%s5933_s3 + $0x48] sm:$0xff] }
 0x792   :  { %v2153_v44 = vmul.f32 %v2138_v58, %v2071_v46  ;;  %v2154_v49 = vmul.f32 %v2138_v58, %v2072_v31  ;;  %v2151_v29 = vmul.f32 %v2138_v58, %v2069_v45  ;;  %v2152_v11 = vmul.f32 %v2138_v58, %v2070_v15 }
 0x793   :  { %v2149_v3 = vmul.f32 %v2138_v58, %v5669_v27  ;;  %v2150_v57 = vmul.f32 %v2138_v58, %v5675_v34  ;;  %v2147_v12 = vmul.f32 %v2138_v58, %v5657_v38  ;;  %v2148_v23 = vmul.f32 %v2138_v58, %v5663_v0 }
 0x794   :  { %v2170_v48 = vadd.f32 %v2155_v8, %v2153_v44  ;;  %v2171_v61 = vadd.f32 %v2155_v8, %v2154_v49  ;;  %v2168_v50 = vadd.f32 %v2155_v8, %v2151_v29  ;;  %v2169_v30 = vadd.f32 %v2155_v8, %v2152_v11  ;;  %2643 = vmatpush.bf16.msrb.mxu2 %v4898_v22  ;;  %v4913_v29 = vld [vmem:[%s5934_s4 + $0x78] sm:$0xff] }
 0x795   :  { %v2166_v52 = vadd.f32 %v2155_v8, %v2149_v3  ;;  %v2167_v46 = vadd.f32 %v2155_v8, %v2150_v57  ;;  %v2164_v45 = vadd.f32 %v2155_v8, %v2147_v12  ;;  %v2165_v15 = vadd.f32 %v2155_v8, %v2148_v23  ;;  %v4921_v11 = vld [vmem:[%s5934_s4 + $0xb8] sm:$0xff]  ;;  %v4911_v12 = vld [vmem:[%s5934_s4 + $0x68] sm:$0xff] }
 0x796   :  { %v2179_v19 = vpack.c.bf16 %v2171_v61, %v2170_v48  ;;  %v2178_v59 = vpack.c.bf16 %v2169_v30, %v2168_v50  ;;  %v2145_v9 = vmul.f32 %v2138_v58, %v5645_v2  ;;  %v2146_v27 = vmul.f32 %v2138_v58, %v5651_v25  ;;  %v4912_v48 = vld [vmem:[%s5934_s4 + $0x70] sm:$0xff] }
 0x797   :  { %v2177_v31 = vpack.c.bf16 %v2167_v46, %v2166_v52  ;;  %v2176_v14 = vpack.c.bf16 %v2165_v15, %v2164_v45  ;;  %v2143_v51 = vmul.f32 %v2138_v58, %v5633_v35  ;;  %v2144_v38 = vmul.f32 %v2138_v58, %v5639_v40  ;;  %v4896_v50 = vld [vmem:[%s5933_s3 + $0x50] sm:$0xff]  ;;  %v4909_v46 = vld [vmem:[%s5934_s4 + $0x58] sm:$0xff] }
 0x798   :  { %2276 = vmatpush.bf16.msra.mxu3 %v2179_v19  ;;  %v2162_v54 = vadd.f32 %v2155_v8, %v2145_v9  ;;  %v2163_v34 = vadd.f32 %v2155_v8, %v2146_v27  ;;  %v2141_v0 = vmul.f32 %v2138_v58, %v5621_v47  ;;  %v2142_v17 = vmul.f32 %v2138_v58, %v5629_v28  ;;  %v4886_v47 = vld [vmem:[%s5933_s3] sm:$0xff]  ;;  %v4889_v28 = vld [vmem:[%s5933_s3 + $0x18] sm:$0xff]  ;;  %v4908_v45 = vld [vmem:[%s5934_s4 + $0x50] sm:$0xff] }
 0x799   :  { %v2160_v33 = vadd.f32 %v2155_v8, %v2143_v51  ;;  %v2161_v4 = vadd.f32 %v2155_v8, %v2144_v38  ;;  %v2139_v2 = vmul.f32 %v2138_v58, %v5613_v7  ;;  %v2140_v21 = vmul.f32 %v2138_v58, %v5617_v10  ;;  %v4887_v7 = vld [vmem:[%s5933_s3 + $0x8] sm:$0xff]  ;;  %v4888_v10 = vld [vmem:[%s5933_s3 + $0x10] sm:$0xff]  ;;  %2665 = vmatpush.bf16.msra.mxu2 %v4913_v29  ;;  %v4897_v27 = vld [vmem:[%s5933_s3 + $0x58] sm:$0xff] }
 0x79a   :  { %v2175_v1 = vpack.c.bf16 %v2163_v34, %v2162_v54  ;;  %v2158_v20 = vadd.f32 %v2155_v8, %v2141_v0  ;;  %v2159_v62 = vadd.f32 %v2155_v8, %v2142_v17  ;;  %v4907_v51 = vld [vmem:[%s5934_s4 + $0x48] sm:$0xff]  ;;  %v4920_v38 = vld [vmem:[%s5934_s4 + $0xb0] sm:$0xff] }
 0x79b   :  { %v2174_v25 = vpack.c.bf16 %v2161_v4, %v2160_v33  ;;  %v2156_v55 = vadd.f32 %v2155_v8, %v2139_v2  ;;  %v2157_v40 = vadd.f32 %v2155_v8, %v2140_v21  ;;  %v4919_v21 = vld [vmem:[%s5934_s4 + $0xa8] sm:$0xff] }
 0x79c   :  { %2277 = vmatpush.bf16.msra.mxu3 %v2178_v59  ;;  %v2173_v35 = vpack.c.bf16 %v2159_v62, %v2158_v20  ;;  %v4910_v59 = vld [vmem:[%s5934_s4 + $0x60] sm:$0xff] }
 0x79d   :  { %v2172_v39 = vpack.c.bf16 %v2157_v40, %v2156_v55  ;;  %2666 = vmatpush.bf16.msra.mxu2 %v4912_v48 }
 0x7a0   :  { %2278 = vmatpush.bf16.msra.mxu3 %v2177_v31 }
 0x7a1   :  { %2667 = vmatpush.bf16.msra.mxu2 %v4911_v12 }
 0x7a4   :  { %2279 = vmatpush.bf16.msra.mxu3 %v2176_v14 }
 0x7a5   :  { %2668 = vmatpush.bf16.msra.mxu2 %v4910_v59 }
 0x7a8   :  { %2280 = vmatpush.bf16.msra.mxu3 %v2175_v1  ;;  %v4906_v1 = vld [vmem:[%s5934_s4 + $0x40] sm:$0xff] }
 0x7a9   :  { %2669 = vmatpush.bf16.msra.mxu2 %v4909_v46 }
 0x7ac   :  { %2281 = vmatpush.bf16.msra.mxu3 %v2174_v25 }
 0x7ad   :  { %2670 = vmatpush.bf16.msra.mxu2 %v4908_v45 }
 0x7b0   :  { %2282 = vmatpush.bf16.msra.mxu3 %v2173_v35 }
 0x7b1   :  { %2671 = vmatpush.bf16.msra.mxu2 %v4907_v51 }
 0x7b4   :  { %2283 = vmatpush.bf16.msra.mxu3 %v2172_v39 }
 0x7b5   :  { %2672 = vmatpush.bf16.msra.mxu2 %v4906_v1 }
 0x7b7   :  { %2284 = vmatmul.bf16.vlgmr.msra.gmra.mxu3 %v4886_v47 }
 0x7b8   :  { %2694 = vmatpush.bf16.msrb.mxu3 %v4921_v11 }
 0x7bc   :  { %2695 = vmatpush.bf16.msrb.mxu3 %v4920_v38 }
 0x7c0   :  { %2696 = vmatpush.bf16.msrb.mxu3 %v4919_v21 }
 0x7c4   :  { %2697 = vmatpush.bf16.msrb.mxu3 %v4918_v18 }
 0x7c7   :  { %2289 = vmatmul.bf16.gmra.mxu3 %v4887_v7 }
 0x7c8   :  { %2698 = vmatpush.bf16.msrb.mxu3 %v4917_v6 }
 0x7cc   :  { %2699 = vmatpush.bf16.msrb.mxu3 %v4916_v60 }
 0x7d7   :  { %2294 = vmatmul.bf16.gmra.mxu3 %v4888_v10 }
 0x7e7   :  { %2299 = vmatmul.bf16.gmra.mxu3 %v4889_v28 }
 0x7f7   :  { %2304 = vmatmul.bf16.gmra.mxu3 %v4890_v13 }
 0x807   :  { %2309 = vmatmul.bf16.gmra.mxu3 %v4891_v43 }
 0x817   :  { %2314 = vmatmul.bf16.gmra.mxu3 %v4892_v63 }
 0x827   :  { %2319 = vmatmul.bf16.gmra.mxu3 %v4893_v5 }
 0x837   :  { %2324 = vmatmul.bf16.gmra.mxu3 %v4894_v41 }
 0x83a   :  { %v2285_v24 = vpop.f32.mrf.mxu3 }
 0x83b   :  { %v2345_v36 = vpack.c.bf16 %v2285_v24, %v2285_v24 }
 0x83d   :  { %v2377_v58 = vunpack.c.l.b16 %v2345_v36 }
 0x842   :  { %v2287_v16 = vpop.f32.mrf.mxu3 }
 0x843   :  { %v2346_v26 = vpack.c.bf16 %v2287_v16, %v2287_v16  ;;  %v4915_v16 = vld [vmem:[%s5934_s4 + $0x88] sm:$0xff] }
 0x844   :  { %2700 = vmatpush.bf16.msrb.mxu3 %v4915_v16 }
 0x845   :  { %v2378_v8 = vunpack.c.l.b16 %v2346_v26  ;;  %v4914_v26 = vld [vmem:[%s5934_s4 + $0x80] sm:$0xff] }
 0x847   :  { %v2385_v44 = vpack.c.b16 %v2378_v8, %v2377_v58  ;;  %2329 = vmatmul.bf16.gmra.mxu3 %v4895_v37 }
 0x848   :  { %2701 = vmatpush.bf16.msrb.mxu3 %v4914_v26 }
 0x849   :  { %2644 = vmatmul.bf16.vlgmr.msrb.gmra.mxu2 %v2385_v44 }
 0x84a   :  { %v2290_v49 = vpop.f32.mrf.mxu3 }
 0x84b   :  { %v2347_v61 = vpack.c.bf16 %v2290_v49, %v2290_v49 }
 0x84d   :  { %v2379_v30 = vunpack.c.l.b16 %v2347_v61 }
 0x852   :  { %v2292_v3 = vpop.f32.mrf.mxu3 }
 0x853   :  { %v2348_v19 = vpack.c.bf16 %v2292_v3, %v2292_v3 }
 0x855   :  { %v2380_v57 = vunpack.c.l.b16 %v2348_v19 }
 0x857   :  { %2334 = vmatmul.bf16.gmra.mxu3 %v4896_v50  ;;  %v2386_v23 = vpack.c.b16 %v2380_v57, %v2379_v30 }
 0x859   :  { %2649 = vmatmul.bf16.gmra.mxu2 %v2386_v23 }
 0x85a   :  { %v2295_v52 = vpop.f32.mrf.mxu3 }
 0x85b   :  { %v2349_v15 = vpack.c.bf16 %v2295_v52, %v2295_v52 }
 0x85d   :  { %v2381_v14 = vunpack.c.l.b16 %v2349_v15 }
 0x862   :  { %v2297_v31 = vpop.f32.mrf.mxu3 }
 0x863   :  { %v2350_v9 = vpack.c.bf16 %v2297_v31, %v2297_v31 }
 0x865   :  { %v2382_v54 = vunpack.c.l.b16 %v2350_v9 }
 0x867   :  { %2339 = vmatmul.bf16.gmra.mxu3 %v4897_v27  ;;  %v2387_v34 = vpack.c.b16 %v2382_v54, %v2381_v14 }
 0x869   :  { %2654 = vmatmul.bf16.gmra.mxu2 %v2387_v34 }
 0x86a   :  { %v2300_v0 = vpop.f32.mrf.mxu3 }
 0x86b   :  { %v2351_v33 = vpack.c.bf16 %v2300_v0, %v2300_v0 }
 0x86d   :  { %v2383_v2 = vunpack.c.l.b16 %v2351_v33 }
 0x872   :  { %v2302_v4 = vpop.f32.mrf.mxu3 }
 0x873   :  { %v2352_v17 = vpack.c.bf16 %v2302_v4, %v2302_v4 }
 0x875   :  { %v2384_v25 = vunpack.c.l.b16 %v2352_v17 }
 0x877   :  { %v2388_v20 = vpack.c.b16 %v2384_v25, %v2383_v2 }
 0x879   :  { %2659 = vmatmul.bf16.gmra.mxu2 %v2388_v20 }
 0x87a   :  { %v2305_v62 = vpop.f32.mrf.mxu3 }
 0x87b   :  { %v2353_v35 = vpack.c.bf16 %v2305_v62, %v2305_v62 }
 0x87d   :  { %v2401_v39 = vunpack.c.l.b16 %v2353_v35 }
 0x882   :  { %v2307_v55 = vpop.f32.mrf.mxu3 }
 0x883   :  { %v2354_v40 = vpack.c.bf16 %v2307_v55, %v2307_v55 }
 0x885   :  { %v2402_v47 = vunpack.c.l.b16 %v2354_v40 }
 0x887   :  { %v2409_v7 = vpack.c.b16 %v2402_v47, %v2401_v39 }
 0x889   :  { %2673 = vmatmul.bf16.vlgmr.msra.gmra.mxu2 %v2409_v7 }
 0x88a   :  { %v2310_v10 = vpop.f32.mrf.mxu3 }
 0x88b   :  { %v2355_v28 = vpack.c.bf16 %v2310_v10, %v2310_v10 }
 0x88d   :  { %v2403_v42 = vunpack.c.l.b16 %v2355_v28 }
 0x892   :  { %v2312_v13 = vpop.f32.mrf.mxu3 }
 0x893   :  { %v2356_v43 = vpack.c.bf16 %v2312_v13, %v2312_v13 }
 0x895   :  { %v2404_v53 = vunpack.c.l.b16 %v2356_v43 }
 0x897   :  { %v2410_v32 = vpack.c.b16 %v2404_v53, %v2403_v42 }
 0x899   :  { %2678 = vmatmul.bf16.gmra.mxu2 %v2410_v32  ;;  %v5821_v32 = vld [vmem:[%s5939_s9 + $0x4] sm:$0x7] }
 0x89a   :  { %v2315_v63 = vpop.f32.mrf.mxu3  ;;  %v2491_v60 = vperm.slane %v5821_v32, 0 }
 0x89b   :  { %v2357_v5 = vpack.c.bf16 %v2315_v63, %v2315_v63 }
 0x89d   :  { %v2405_v41 = vunpack.c.l.b16 %v2357_v5 }
 0x8a2   :  { %v2317_v56 = vpop.f32.mrf.mxu3 }
 0x8a3   :  { %v2358_v22 = vpack.c.bf16 %v2317_v56, %v2317_v56 }
 0x8a5   :  { %v2406_v24 = vunpack.c.l.b16 %v2358_v22 }
 0x8a7   :  { %v2411_v36 = vpack.c.b16 %v2406_v24, %v2405_v41 }
 0x8a9   :  { %2683 = vmatmul.bf16.gmra.mxu2 %v2411_v36 }
 0x8aa   :  { %v2320_v37 = vpop.f32.mrf.mxu3 }
 0x8ab   :  { %v2359_v58 = vpack.c.bf16 %v2320_v37, %v2320_v37 }
 0x8ad   :  { %v2407_v49 = vunpack.c.l.b16 %v2359_v58 }
 0x8b2   :  { %v2322_v8 = vpop.f32.mrf.mxu3 }
 0x8b3   :  { %v2360_v44 = vpack.c.bf16 %v2322_v8, %v2322_v8 }
 0x8b5   :  { %v2408_v29 = vunpack.c.l.b16 %v2360_v44 }
 0x8b7   :  { %v2412_v11 = vpack.c.b16 %v2408_v29, %v2407_v49 }
 0x8b9   :  { %2688 = vmatmul.bf16.gmra.mxu2 %v2412_v11 }
 0x8ba   :  { %v2325_v48 = vpop.f32.mrf.mxu3 }
 0x8bb   :  { %v2361_v61 = vpack.c.bf16 %v2325_v48, %v2325_v48 }
 0x8bd   :  { %v2425_v50 = vunpack.c.l.b16 %v2361_v61 }
 0x8c2   :  { %v2327_v3 = vpop.f32.mrf.mxu3 }
 0x8c3   :  { %v2362_v19 = vpack.c.bf16 %v2327_v3, %v2327_v3 }
 0x8c5   :  { %v2426_v30 = vunpack.c.l.b16 %v2362_v19 }
 0x8c7   :  { %v2433_v57 = vpack.c.b16 %v2426_v30, %v2425_v50 }
 0x8c9   :  { %2702 = vmatmul.bf16.vlgmr.msrb.gmra.mxu3 %v2433_v57 }
 0x8ca   :  { %v2330_v12 = vpop.f32.mrf.mxu3 }
 0x8cb   :  { %v2363_v23 = vpack.c.bf16 %v2330_v12, %v2330_v12 }
 0x8cc   :  { %v2645_v38 = vpop.f32.mrf.mxu2 }
 0x8cd   :  { %v2427_v46 = vunpack.c.l.b16 %v2363_v23  ;;  %v2646_v56 = vadd.f32 %v2645_v38, %v2491_v60 }
 0x8d2   :  { %v2332_v59 = vpop.f32.mrf.mxu3 }
 0x8d3   :  { %v2364_v52 = vpack.c.bf16 %v2332_v59, %v2332_v59 }
 0x8d4   :  { %v2647_v17 = vpop.f32.mrf.mxu2 }
 0x8d5   :  { %v2428_v45 = vunpack.c.l.b16 %v2364_v52  ;;  %v2648_v5 = vadd.f32 %v2647_v17, %v2491_v60 }
 0x8d7   :  { %v2434_v15 = vpack.c.b16 %v2428_v45, %v2427_v46 }
 0x8d9   :  { %2707 = vmatmul.bf16.gmra.mxu3 %v2434_v15 }
 0x8da   :  { %v2335_v31 = vpop.f32.mrf.mxu3 }
 0x8db   :  { %v2365_v9 = vpack.c.bf16 %v2335_v31, %v2335_v31 }
 0x8dc   :  { %v2650_v62 = vpop.f32.mrf.mxu2 }
 0x8dd   :  { %v2429_v54 = vunpack.c.l.b16 %v2365_v9  ;;  %v2651_v22 = vadd.f32 %v2650_v62, %v2491_v60 }
 0x8e2   :  { %v2337_v27 = vpop.f32.mrf.mxu3 }
 0x8e3   :  { %v2366_v14 = vpack.c.bf16 %v2337_v27, %v2337_v27 }
 0x8e4   :  { %v2652_v21 = vpop.f32.mrf.mxu2 }
 0x8e5   :  { %v2430_v34 = vunpack.c.l.b16 %v2366_v14  ;;  %v2653_v36 = vadd.f32 %v2652_v21, %v2491_v60 }
 0x8e7   :  { %v2435_v51 = vpack.c.b16 %v2430_v34, %v2429_v54 }
 0x8e9   :  { %2712 = vmatmul.bf16.gmra.mxu3 %v2435_v51 }
 0x8ea   :  { %v2340_v0 = vpop.f32.mrf.mxu3 }
 0x8eb   :  { %v2367_v1 = vpack.c.bf16 %v2340_v0, %v2340_v0 }
 0x8ec   :  { %v2655_v35 = vpop.f32.mrf.mxu2 }
 0x8ed   :  { %v2431_v2 = vunpack.c.l.b16 %v2367_v1  ;;  %v2656_v8 = vadd.f32 %v2655_v35, %v2491_v60 }
 0x8f2   :  { %v2342_v33 = vpop.f32.mrf.mxu3 }
 0x8f3   :  { %v2368_v4 = vpack.c.bf16 %v2342_v33, %v2342_v33 }
 0x8f4   :  { %v2657_v55 = vpop.f32.mrf.mxu2 }
 0x8f5   :  { %v2432_v25 = vunpack.c.l.b16 %v2368_v4  ;;  %v2658_v11 = vadd.f32 %v2657_v55, %v2491_v60 }
 0x8f7   :  { %v2436_v20 = vpack.c.b16 %v2432_v25, %v2431_v2 }
 0x8f9   :  { %2717 = vmatmul.bf16.gmra.mxu3 %v2436_v20 }
 0x8fc   :  { %v2660_v40 = vpop.f32.mrf.mxu2 }
 0x8fd   :  { %v2661_v19 = vadd.f32 %v2660_v40, %v2491_v60 }
 0x904   :  { %v2662_v39 = vpop.f32.mrf.mxu2 }
 0x905   :  { %v2663_v14 = vadd.f32 %v2662_v39, %v2491_v60 }
 0x90c   :  { %v2674_v47 = vpop.f32.mrf.mxu2 }
 0x90d   :  { %v2675_v16 = vadd.f32 %v2674_v47, %v2646_v56 }
 0x914   :  { %v2676_v7 = vpop.f32.mrf.mxu2 }
 0x915   :  { %v2677_v41 = vadd.f32 %v2676_v7, %v2648_v5 }
 0x91c   :  { %v2679_v28 = vpop.f32.mrf.mxu2 }
 0x91d   :  { %v2680_v26 = vadd.f32 %v2679_v28, %v2651_v22 }
 0x924   :  { %v2681_v43 = vpop.f32.mrf.mxu2 }
 0x925   :  { %v2682_v44 = vadd.f32 %v2681_v43, %v2653_v36 }
 0x92c   :  { %v2684_v53 = vpop.f32.mrf.mxu2 }
 0x92d   :  { %v2685_v48 = vadd.f32 %v2684_v53, %v2656_v8 }
 0x934   :  { %v2686_v63 = vpop.f32.mrf.mxu2 }
 0x935   :  { %v2687_v50 = vadd.f32 %v2686_v63, %v2658_v11 }
 0x93c   :  { %v2689_v58 = vpop.f32.mrf.mxu2 }
 0x93d   :  { %v2690_v59 = vadd.f32 %v2689_v58, %v2661_v19 }
 0x944   :  { %v2691_v27 = vpop.f32.mrf.mxu2 }
 0x945   :  { %v2692_v51 = vadd.f32 %v2691_v27, %v2663_v14 }
 0x94c   :  { %v2703_v10 = vpop.f32.mrf.mxu3 }
 0x94d   :  { %v2704_v49 = vadd.f32 %v2703_v10, %v2675_v16 }
 0x94f   :  { %v2723_v30 = vmax.f32 %v2704_v49, 0.0 }
 0x954   :  { %v2705_v13 = vpop.f32.mrf.mxu3 }
 0x955   :  { %v2706_v37 = vadd.f32 %v2705_v13, %v2677_v41 }
 0x957   :  { %v2724_v61 = vmax.f32 %v2706_v37, 0.0 }
 0x959   :  { %v2731_v52 = vadd.f32 %v2724_v61, %v2723_v30 }
 0x95c   :  { %v2708_v42 = vpop.f32.mrf.mxu3 }
 0x95d   :  { %v2709_v29 = vadd.f32 %v2708_v42, %v2680_v26 }
 0x95f   :  { %v2725_v57 = vmax.f32 %v2709_v29, 0.0 }
 0x961   :  { %v2732_v15 = vadd.f32 %v2731_v52, %v2725_v57 }
 0x964   :  { %v2710_v18 = vpop.f32.mrf.mxu3 }
 0x965   :  { %v2711_v3 = vadd.f32 %v2710_v18, %v2682_v44 }
 0x967   :  { %v2726_v46 = vmax.f32 %v2711_v3, 0.0 }
 0x969   :  { %v2733_v54 = vadd.f32 %v2732_v15, %v2726_v46 }
 0x96c   :  { %v2713_v6 = vpop.f32.mrf.mxu3 }
 0x96d   :  { %v2714_v12 = vadd.f32 %v2713_v6, %v2685_v48 }
 0x96f   :  { %v2727_v31 = vmax.f32 %v2714_v12, 0.0 }
 0x971   :  { %v2734_v38 = vadd.f32 %v2733_v54, %v2727_v31 }
 0x974   :  { %v2715_v24 = vpop.f32.mrf.mxu3 }
 0x975   :  { %v2716_v45 = vadd.f32 %v2715_v24, %v2687_v50 }
 0x977   :  { %v2728_v34 = vmax.f32 %v2716_v45, 0.0 }
 0x979   :  { %v2735_v33 = vadd.f32 %v2734_v38, %v2728_v34 }
 0x97c   :  { %v2718_v23 = vpop.f32.mrf.mxu3 }
 0x97d   :  { %v2719_v9 = vadd.f32 %v2718_v23, %v2690_v59 }
 0x97f   :  { %v2729_v0 = vmax.f32 %v2719_v9, 0.0 }
 0x981   :  { %v2736_v17 = vadd.f32 %v2735_v33, %v2729_v0 }
 0x984   :  { %v2720_v1 = vpop.f32.mrf.mxu3 }
 0x985   :  { %v2721_v4 = vadd.f32 %v2720_v1, %v2692_v51 }
 0x987   :  { %v2730_v2 = vmax.f32 %v2721_v4, 0.0 }
 0x989   :  { %v2737_v25 = vadd.f32 %v2736_v17, %v2730_v2  ;;  %v2818_v17 = vperm.slane %v5821_v32, 2 }
 0x98b   :  { %v2738_v20 = vrot.slane %v2737_v25, 4 }
 0x98d   :  { %v2739_v62 = vadd.f32 %v2738_v20, %v2737_v25 }
 0x98f   :  { %v2740_v21 = vrot.slane %v2739_v62, 2 }
 0x991   :  { %v2741_v35 = vadd.f32 %v2740_v21, %v2739_v62 }
 0x993   :  { %v2742_v55 = vrot.slane %v2741_v35, 1 }
 0x995   :  { %v2743_v40 = vadd.f32 %v2742_v55, %v2741_v35 }
 0x997   :  { %2744 = vrot.lane.b32.xlu2 %v2743_v40, %s5116_s2 }
 0x9f1   :  { %v2745_v39 = vpop.permute.xlu2 %2744 }
 0x9f2   :  { %v2746_v47 = vadd.f32 %v2745_v39, %v2743_v40 }
 0x9f4   :  { %2747 = vrot.lane.b32.xlu0 %v2746_v47, %s5117_s26 }
 0xa66   :  { %v2748_v7 = vpop.permute.xlu0 %2747 }
 0xa67   :  { %v2749_v10 = vadd.f32 %v2748_v7, %v2746_v47 }
 0xa69   :  { %2750 = vrot.lane.b32.xlu1 %v2749_v10, %s5110_s16 }
 0xadb   :  { %v2751_v28 = vpop.permute.xlu1 %2750 }
 0xadc   :  { %v2752_v13 = vadd.f32 %v2751_v28, %v2749_v10 }
 0xade   :  { %v2753_v43 = vmul.f32 0.001953125, %v2752_v13 }
 0xae0   :  { %v2754_v42 = vperm.slane %v2753_v43, 0 }
 0xae2   :  { %v5827_v53 = vsub.f32 %v2723_v30, %v2754_v42  ;;  %v5829_v18 = vsub.f32 %v2724_v61, %v2754_v42  ;;  %v2757_v63 = vsub.f32 %v2725_v57, %v2754_v42  ;;  %v2758_v6 = vsub.f32 %v2726_v46, %v2754_v42 }
 0xae3   :  { %v2759_v56 = vsub.f32 %v2727_v31, %v2754_v42  ;;  %v2760_v24 = vsub.f32 %v2728_v34, %v2754_v42  ;;  %v2761_v26 = vsub.f32 %v2729_v0, %v2754_v42  ;;  %v2762_v8 = vsub.f32 %v2730_v2, %v2754_v42 }
 0xae4   :  { %v2763_v60 = vmul.f32 %v5827_v53, %v5827_v53  ;;  %v2764_v5 = vmul.f32 %v5829_v18, %v5829_v18  ;;  %v2765_v22 = vmul.f32 %v2757_v63, %v2757_v63  ;;  %v2766_v36 = vmul.f32 %v2758_v6, %v2758_v6 }
 0xae5   :  { %v2767_v37 = vmul.f32 %v2759_v56, %v2759_v56  ;;  %v2768_v44 = vmul.f32 %v2760_v24, %v2760_v24  ;;  %v2769_v29 = vmul.f32 %v2761_v26, %v2761_v26  ;;  %v2770_v48 = vmul.f32 %v2762_v8, %v2762_v8 }
 0xae6   :  { %v2771_v41 = vadd.f32 %v2764_v5, %v2763_v60 }
 0xae8   :  { %v2772_v16 = vadd.f32 %v2771_v41, %v2765_v22  ;;  %v4935_v41 = vld [vmem:[#allocation5 + $0x38] sm:$0xff] }
 0xae9   :  { %3174 = vmatpush.bf16.msra.mxu3 %v4935_v41 }
 0xaea   :  { %v2773_v58 = vadd.f32 %v2772_v16, %v2766_v36  ;;  %v4933_v36 = vld [vmem:[#allocation5 + $0x28] sm:$0xff]  ;;  %v4932_v16 = vld [vmem:[#allocation5 + $0x20] sm:$0xff] }
 0xaec   :  { %v2774_v49 = vadd.f32 %v2773_v58, %v2767_v37  ;;  %v4927_v37 = vld [vmem:[%s5935_s5 + $0x28] sm:$0xff]  ;;  %v4931_v58 = vld [vmem:[#allocation5 + $0x18] sm:$0xff] }
 0xaee   :  { %v2775_v11 = vadd.f32 %v2774_v49, %v2768_v44  ;;  %v4929_v44 = vld [vmem:[#allocation5 + $0x8] sm:$0xff]  ;;  %v4928_v49 = vld [vmem:[#allocation5] sm:$0xff] }
 0xaf0   :  { %v2776_v61 = vadd.f32 %v2775_v11, %v2769_v29  ;;  %v4943_v29 = vld [vmem:[#allocation5 + $0x78] sm:$0xff]  ;;  %v4942_v11 = vld [vmem:[#allocation5 + $0x70] sm:$0xff] }
 0xaf2   :  { %v2777_v3 = vadd.f32 %v2776_v61, %v2770_v48  ;;  %v4941_v48 = vld [vmem:[#allocation5 + $0x68] sm:$0xff]  ;;  %v4940_v61 = vld [vmem:[#allocation5 + $0x60] sm:$0xff] }
 0xaf4   :  { %v2778_v19 = vrot.slane %v2777_v3, 4 }
 0xaf6   :  { %v2779_v50 = vadd.f32 %v2778_v19, %v2777_v3  ;;  %v4939_v19 = vld [vmem:[#allocation5 + $0x58] sm:$0xff] }
 0xaf8   :  { %v2780_v30 = vrot.slane %v2779_v50, 2 }
 0xafa   :  { %v2781_v57 = vadd.f32 %v2780_v30, %v2779_v50  ;;  %v4938_v30 = vld [vmem:[#allocation5 + $0x50] sm:$0xff] }
 0xafc   :  { %v2782_v12 = vrot.slane %v2781_v57, 1 }
 0xafe   :  { %v2783_v23 = vadd.f32 %v2782_v12, %v2781_v57 }
 0xb00   :  { %2784 = vrot.lane.b32.xlu2 %v2783_v23, %s5116_s2 }
 0xb5a   :  { %v2785_v59 = vpop.permute.xlu2 %2784 }
 0xb5b   :  { %v2786_v52 = vadd.f32 %v2785_v59, %v2783_v23 }
 0xb5d   :  { %2787 = vrot.lane.b32.xlu0 %v2786_v52, %s5117_s26 }
 0xbcf   :  { %v2788_v46 = vpop.permute.xlu0 %2787 }
 0xbd0   :  { %v2789_v45 = vadd.f32 %v2788_v46, %v2786_v52  ;;  %v4937_v46 = vld [vmem:[#allocation5 + $0x48] sm:$0xff] }
 0xbd2   :  { %2790 = vrot.lane.b32.xlu1 %v2789_v45, %s5110_s16 }
 0xc44   :  { %v2791_v15 = vpop.permute.xlu1 %2790 }
 0xc45   :  { %v2792_v31 = vadd.f32 %v2791_v15, %v2789_v45  ;;  %v4936_v15 = vld [vmem:[#allocation5 + $0x40] sm:$0xff] }
 0xc47   :  { %v2793_v9 = vmul.f32 0.001953125, %v2792_v31  ;;  %v4951_v31 = vld [vmem:[#allocation5 + $0xb8] sm:$0xff] }
 0xc49   :  { %v2794_v27 = vadd.f32 1e-05, %v2793_v9  ;;  %v4950_v9 = vld [vmem:[#allocation5 + $0xb0] sm:$0xff] }
 0xc4b   :  { %5000 = vrsqrt.f32 %v2794_v27  ;;  %vm2801_vm4 = vweird.f32 %v2794_v27 }
 0xc51   :  { %v5001_v14 = vpop.eup %5000 }
 0xc52   :  { %v2796_v54 = vmul.f32 %v5001_v14, %v2794_v27  ;;  %vm2802_vm3 = vweird.f32 %v5001_v14 }
 0xc53   :  { %vm2803_vm5 = vmor %vm2801_vm4, %vm2802_vm3 }
 0xc54   :  { %v2797_v34 = vmul.f32 %v5001_v14, %v2796_v54 }
 0xc56   :  { %v2798_v51 = vmul.f32 0.5, %v2797_v34 }
 0xc58   :  { %v2799_v38 = vsub.f32 1.5, %v2798_v51 }
 0xc5a   :  { %v2800_v0 = vmul.f32 %v5001_v14, %v2799_v38 }
 0xc5c   :  { %v2804_v1 = vsel %vm2803_vm5, %v5001_v14, %v2800_v0  ;;  %v4949_v0 = vld [vmem:[#allocation5 + $0xa8] sm:$0xff] }
 0xc5d   :  { %v2806_v33 = vrot.slane %v2804_v1, 7 }
 0xc5f   :  { %v2808_v4 = vmul.f32 %v5821_v32, %v2806_v33  ;;  %v4948_v33 = vld [vmem:[#allocation5 + $0xa0] sm:$0xff] }
 0xc61   :  { %v2809_v2 = vperm.slane %v2808_v4, 1  ;;  %v4947_v4 = vld [vmem:[#allocation5 + $0x98] sm:$0xff] }
 0xc63   :  { %v2816_v25 = vmul.f32 %v2809_v2, %v2761_v26  ;;  %v2817_v20 = vmul.f32 %v2809_v2, %v2762_v8  ;;  %v2814_v62 = vmul.f32 %v2809_v2, %v2759_v56  ;;  %v2815_v21 = vmul.f32 %v2809_v2, %v2760_v24  ;;  %v4934_v24 = vld [vmem:[#allocation5 + $0x30] sm:$0xff]  ;;  %v4926_v26 = vld [vmem:[%s5935_s5 + $0x20] sm:$0xff] }
 0xc64   :  { %v2812_v40 = vmul.f32 %v2809_v2, %v2757_v63  ;;  %v2813_v10 = vmul.f32 %v2809_v2, %v2758_v6  ;;  %v2810_v28 = vmul.f32 %v2809_v2, %v5827_v53  ;;  %v2811_v32 = vmul.f32 %v2809_v2, %v5829_v18  ;;  %v4922_v63 = vld [vmem:[%s5935_s5] sm:$0xff]  ;;  %v4923_v53 = vld [vmem:[%s5935_s5 + $0x8] sm:$0xff]  ;;  %v4924_v18 = vld [vmem:[%s5935_s5 + $0x10] sm:$0xff]  ;;  %3175 = vmatpush.bf16.msra.mxu3 %v4934_v24 }
 0xc65   :  { %v2825_v35 = vadd.f32 %v2818_v17, %v2816_v25  ;;  %v2826_v55 = vadd.f32 %v2818_v17, %v2817_v20  ;;  %v2823_v47 = vadd.f32 %v2818_v17, %v2814_v62  ;;  %v2824_v7 = vadd.f32 %v2818_v17, %v2815_v21  ;;  %v4925_v6 = vld [vmem:[%s5935_s5 + $0x18] sm:$0xff]  ;;  %v4930_v8 = vld [vmem:[#allocation5 + $0x10] sm:$0xff] }
 0xc66   :  { %v2821_v43 = vadd.f32 %v2818_v17, %v2812_v40  ;;  %v2822_v42 = vadd.f32 %v2818_v17, %v2813_v10  ;;  %v2819_v5 = vadd.f32 %v2818_v17, %v2810_v28  ;;  %v2820_v56 = vadd.f32 %v2818_v17, %v2811_v32  ;;  %v4946_v25 = vld [vmem:[#allocation5 + $0x90] sm:$0xff] }
 0xc67   :  { %v2830_v39 = vpack.c.bf16 %v2826_v55, %v2825_v35  ;;  %v2829_v13 = vpack.c.bf16 %v2824_v7, %v2823_v47  ;;  %v4945_v55 = vld [vmem:[#allocation5 + $0x88] sm:$0xff] }
 0xc68   :  { %v2828_v60 = vpack.c.bf16 %v2822_v42, %v2821_v43  ;;  %v2827_v22 = vpack.c.bf16 %v2820_v56, %v2819_v5  ;;  %3176 = vmatpush.bf16.msra.mxu3 %v4933_v36 }
 0xc69   :  { %2896 = vmatpush.bf16.msrb.mxu2 %v2830_v39  ;;  %v4944_v39 = vld [vmem:[#allocation5 + $0x80] sm:$0xff] }
 0xc6c   :  { %3177 = vmatpush.bf16.msra.mxu3 %v4932_v16 }
 0xc6d   :  { %2897 = vmatpush.bf16.msrb.mxu2 %v2829_v13 }
 0xc70   :  { %3178 = vmatpush.bf16.msra.mxu3 %v4931_v58 }
 0xc71   :  { %2898 = vmatpush.bf16.msrb.mxu2 %v2828_v60 }
 0xc74   :  { %3179 = vmatpush.bf16.msra.mxu3 %v4930_v8 }
 0xc75   :  { %2899 = vmatpush.bf16.msrb.mxu2 %v2827_v22 }
 0xc78   :  { %4502 = vmatmul.msk.bf16.vlgmr.msrb.gmra.mxu2 %vm2873_vm6, %v4922_v63  ;;  %3180 = vmatpush.bf16.msra.mxu3 %v4929_v44 }
 0xc7c   :  { %3181 = vmatpush.bf16.msra.mxu3 %v4928_v49 }
 0xc80   :  { %3193 = vmatpush.bf16.msrb.mxu3 %v4943_v29 }
 0xc84   :  { %3194 = vmatpush.bf16.msrb.mxu3 %v4942_v11 }
 0xc88   :  { %4503 = vmatmul.msk.bf16.gmra.mxu2 %vm2873_vm6, %v4923_v53  ;;  %3195 = vmatpush.bf16.msrb.mxu3 %v4941_v48 }
 0xc8c   :  { %3196 = vmatpush.bf16.msrb.mxu3 %v4940_v61  ;;  %v5869_v61 = vld [vmem:[%s5939_s9 + $0x8] sm:$0x7] }
 0xc90   :  { %3197 = vmatpush.bf16.msrb.mxu3 %v4939_v19  ;;  %v3029_v19 = vperm.slane %v5869_v61, 0 }
 0xc94   :  { %3198 = vmatpush.bf16.msrb.mxu3 %v4938_v30 }
 0xc98   :  { %4504 = vmatmul.msk.bf16.gmra.mxu2 %vm2873_vm6, %v4924_v18  ;;  %3199 = vmatpush.bf16.msrb.mxu3 %v4937_v46 }
 0xc9c   :  { %3200 = vmatpush.bf16.msrb.mxu3 %v4936_v15 }
 0xca8   :  { %4505 = vmatmul.msk.bf16.gmra.mxu2 %vm2873_vm6, %v4925_v6 }
 0xcb8   :  { %4506 = vmatmul.msk.bf16.gmra.mxu2 %vm2873_vm6, %v4926_v26 }
 0xcc8   :  { %4507 = vmatmul.msk.bf16.gmra.mxu2 %vm2873_vm6, %v4927_v37 }
 0xcfb   :  { %v2901_v3 = vpop.f32.mrf.mxu2 }
 0xcfc   :  { %v2931_v50 = vpack.c.bf16 %v2901_v3, %v2901_v3 }
 0xcfe   :  { %v2947_v23 = vunpack.c.l.b16 %v2931_v50 }
 0xd03   :  { %v2903_v57 = vpop.f32.mrf.mxu2 }
 0xd04   :  { %v2932_v12 = vpack.c.bf16 %v2903_v57, %v2903_v57 }
 0xd06   :  { %v2948_v59 = vunpack.c.l.b16 %v2932_v12 }
 0xd08   :  { %v2951_v52 = vpack.c.b16 %v2948_v59, %v2947_v23 }
 0xd0a   :  { %3182 = vmatmul.bf16.vlgmr.msra.gmra.mxu3 %v2951_v52 }
 0xd0b   :  { %v2906_v45 = vpop.f32.mrf.mxu2  ;;  %3212 = vmatpush.bf16.msra.mxu3 %v4951_v31 }
 0xd0c   :  { %v2933_v27 = vpack.c.bf16 %v2906_v45, %v2906_v45 }
 0xd0e   :  { %v2949_v34 = vunpack.c.l.b16 %v2933_v27 }
 0xd0f   :  { %3213 = vmatpush.bf16.msra.mxu3 %v4950_v9 }
 0xd13   :  { %v2908_v14 = vpop.f32.mrf.mxu2  ;;  %3214 = vmatpush.bf16.msra.mxu3 %v4949_v0 }
 0xd14   :  { %v2934_v54 = vpack.c.bf16 %v2908_v14, %v2908_v14 }
 0xd16   :  { %v2950_v51 = vunpack.c.l.b16 %v2934_v54 }
 0xd17   :  { %3215 = vmatpush.bf16.msra.mxu3 %v4948_v33 }
 0xd18   :  { %v2952_v38 = vpack.c.b16 %v2950_v51, %v2949_v34 }
 0xd1a   :  { %3187 = vmatmul.bf16.gmra.mxu3 %v2952_v38 }
 0xd1b   :  { %v2911_v1 = vpop.f32.mrf.mxu2  ;;  %3216 = vmatpush.bf16.msra.mxu3 %v4947_v4 }
 0xd1c   :  { %v2935_v17 = vpack.c.bf16 %v2911_v1, %v2911_v1 }
 0xd1e   :  { %v2959_v62 = vunpack.c.l.b16 %v2935_v17 }
 0xd1f   :  { %3217 = vmatpush.bf16.msra.mxu3 %v4946_v25 }
 0xd23   :  { %v2913_v2 = vpop.f32.mrf.mxu2  ;;  %3218 = vmatpush.bf16.msra.mxu3 %v4945_v55  ;;  %v4969_v55 = vld [vmem:[#allocation7 + $0x70] sm:$0xff] }
 0xd24   :  { %v2936_v20 = vpack.c.bf16 %v2913_v2, %v2913_v2 }
 0xd26   :  { %v2960_v21 = vunpack.c.l.b16 %v2936_v20 }
 0xd27   :  { %3219 = vmatpush.bf16.msra.mxu3 %v4944_v39 }
 0xd28   :  { %v2963_v35 = vpack.c.b16 %v2960_v21, %v2959_v62  ;;  %v4970_v21 = vld [vmem:[#allocation7 + $0x78] sm:$0xff] }
 0xd29   :  { %3591 = vmatpush.bf16.msrb.mxu0 %v4970_v21  ;;  %v4972_v21 = vld [vmem:[#allocation7 + $0x88] sm:$0xff] }
 0xd2a   :  { %3201 = vmatmul.bf16.vlgmr.msrb.gmra.mxu3 %v2963_v35  ;;  %v4978_v35 = vld [vmem:[#allocation7 + $0xb8] sm:$0xff] }
 0xd2b   :  { %v2916_v40 = vpop.f32.mrf.mxu2  ;;  %3605 = vmatpush.bf16.msrb.mxu1 %v4978_v35  ;;  %v4953_v35 = vld [vmem:[%s5937_s7 + $0x8] sm:$0xff] }
 0xd2c   :  { %v2937_v47 = vpack.c.bf16 %v2916_v40, %v2916_v40  ;;  %v4977_v40 = vld [vmem:[#allocation7 + $0xb0] sm:$0xff] }
 0xd2d   :  { %3592 = vmatpush.bf16.msrb.mxu0 %v4969_v55  ;;  %v4954_v55 = vld [vmem:[%s5937_s7 + $0x10] sm:$0xff] }
 0xd2e   :  { %v2961_v28 = vunpack.c.l.b16 %v2937_v47 }
 0xd2f   :  { %3606 = vmatpush.bf16.msrb.mxu1 %v4977_v40  ;;  %v4962_v40 = vld [vmem:[#allocation7 + $0x38] sm:$0xff] }
 0xd30   :  { %3577 = vmatpush.bf16.msrb.mxu3 %v4962_v40 }
 0xd33   :  { %v2918_v7 = vpop.f32.mrf.mxu2 }
 0xd34   :  { %v2938_v10 = vpack.c.bf16 %v2918_v7, %v2918_v7  ;;  %v4968_v7 = vld [vmem:[#allocation7 + $0x68] sm:$0xff] }
 0xd35   :  { %3593 = vmatpush.bf16.msrb.mxu0 %v4968_v7  ;;  %v4959_v7 = vld [vmem:[#allocation7 + $0x20] sm:$0xff] }
 0xd36   :  { %v2962_v13 = vunpack.c.l.b16 %v2938_v10  ;;  %v4976_v10 = vld [vmem:[#allocation7 + $0xa8] sm:$0xff] }
 0xd37   :  { %3607 = vmatpush.bf16.msrb.mxu1 %v4976_v10  ;;  %v4958_v10 = vld [vmem:[#allocation7 + $0x18] sm:$0xff] }
 0xd38   :  { %v2964_v43 = vpack.c.b16 %v2962_v13, %v2961_v28 }
 0xd3a   :  { %3206 = vmatmul.bf16.gmra.mxu3 %v2964_v43 }
 0xd3b   :  { %v2921_v42 = vpop.f32.mrf.mxu2 }
 0xd3c   :  { %v2939_v32 = vpack.c.bf16 %v2921_v42, %v2921_v42 }
 0xd3e   :  { %v2971_v56 = vunpack.c.l.b16 %v2939_v32 }
 0xd43   :  { %v2923_v60 = vpop.f32.mrf.mxu2 }
 0xd44   :  { %v2940_v5 = vpack.c.bf16 %v2923_v60, %v2923_v60 }
 0xd46   :  { %v2972_v22 = vunpack.c.l.b16 %v2940_v5 }
 0xd48   :  { %v2975_v63 = vpack.c.b16 %v2972_v22, %v2971_v56 }
 0xd4a   :  { %3220 = vmatmul.bf16.vlgmr.msra.gmra.mxu3 %v2975_v63 }
 0xd4b   :  { %v2926_v53 = vpop.f32.mrf.mxu2 }
 0xd4c   :  { %v2941_v18 = vpack.c.bf16 %v2926_v53, %v2926_v53 }
 0xd4e   :  { %v2973_v24 = vunpack.c.l.b16 %v2941_v18 }
 0xd53   :  { %v2928_v6 = vpop.f32.mrf.mxu2 }
 0xd54   :  { %v2942_v41 = vpack.c.bf16 %v2928_v6, %v2928_v6 }
 0xd56   :  { %v2974_v36 = vunpack.c.l.b16 %v2942_v41 }
 0xd58   :  { %v2976_v16 = vpack.c.b16 %v2974_v36, %v2973_v24 }
 0xd5a   :  { %3225 = vmatmul.bf16.gmra.mxu3 %v2976_v16 }
 0xd8d   :  { %v3183_v26 = vpop.f32.mrf.mxu3 }
 0xd8e   :  { %v3184_v30 = vadd.f32 %v3183_v26, %v3029_v19 }
 0xd95   :  { %v3185_v37 = vpop.f32.mrf.mxu3 }
 0xd96   :  { %v3186_v50 = vadd.f32 %v3185_v37, %v3029_v19 }
 0xd9d   :  { %v3188_v58 = vpop.f32.mrf.mxu3 }
 0xd9e   :  { %v3189_v57 = vadd.f32 %v3188_v58, %v3029_v19 }
 0xda5   :  { %v3190_v8 = vpop.f32.mrf.mxu3 }
 0xda6   :  { %v3191_v31 = vadd.f32 %v3190_v8, %v3029_v19 }
 0xdad   :  { %v3202_v44 = vpop.f32.mrf.mxu3 }
 0xdae   :  { %v3203_v59 = vadd.f32 %v3202_v44, %v3184_v30  ;;  %v4967_v44 = vld [vmem:[#allocation7 + $0x60] sm:$0xff] }
 0xdaf   :  { %3594 = vmatpush.bf16.msrb.mxu0 %v4967_v44 }
 0xdb5   :  { %v3204_v49 = vpop.f32.mrf.mxu3 }
 0xdb6   :  { %v3205_v12 = vadd.f32 %v3204_v49, %v3186_v50  ;;  %v4975_v49 = vld [vmem:[#allocation7 + $0xa0] sm:$0xff] }
 0xdb7   :  { %3608 = vmatpush.bf16.msrb.mxu1 %v4975_v49 }
 0xdbd   :  { %v3207_v29 = vpop.f32.mrf.mxu3 }
 0xdbe   :  { %v3208_v52 = vadd.f32 %v3207_v29, %v3189_v57  ;;  %v4966_v29 = vld [vmem:[#allocation7 + $0x58] sm:$0xff] }
 0xdbf   :  { %3595 = vmatpush.bf16.msrb.mxu0 %v4966_v29 }
 0xdc5   :  { %v3209_v11 = vpop.f32.mrf.mxu3 }
 0xdc6   :  { %v3210_v27 = vadd.f32 %v3209_v11, %v3191_v31  ;;  %v4974_v11 = vld [vmem:[#allocation7 + $0x98] sm:$0xff] }
 0xdc7   :  { %3609 = vmatpush.bf16.msrb.mxu1 %v4974_v11 }
 0xdcd   :  { %v3221_v48 = vpop.f32.mrf.mxu3 }
 0xdce   :  { %v3222_v45 = vadd.f32 %v3221_v48, %v3203_v59 }
 0xdd0   :  { %v3231_v14 = vmax.f32 %v3222_v45, 0.0 }
 0xdd5   :  { %v3223_v3 = vpop.f32.mrf.mxu3 }
 0xdd6   :  { %v3224_v46 = vadd.f32 %v3223_v3, %v3205_v12 }
 0xdd8   :  { %v3232_v9 = vmax.f32 %v3224_v46, 0.0 }
 0xdda   :  { %v3235_v51 = vadd.f32 %v3232_v9, %v3231_v14 }
 0xddd   :  { %v3226_v23 = vpop.f32.mrf.mxu3 }
 0xdde   :  { %v3227_v15 = vadd.f32 %v3226_v23, %v3208_v52 }
 0xde0   :  { %v3233_v54 = vmax.f32 %v3227_v15, 0.0 }
 0xde2   :  { %v3236_v0 = vadd.f32 %v3235_v51, %v3233_v54 }
 0xde5   :  { %v3228_v34 = vpop.f32.mrf.mxu3 }
 0xde6   :  { %v3229_v38 = vadd.f32 %v3228_v34, %v3210_v27  ;;  %v3296_v27 = vperm.slane %v5869_v61, 2 }
 0xde8   :  { %v3234_v1 = vmax.f32 %v3229_v38, 0.0 }
 0xdea   :  { %v3237_v33 = vadd.f32 %v3236_v0, %v3234_v1 }
 0xdec   :  { %v3238_v4 = vrot.slane %v3237_v33, 4 }
 0xdee   :  { %v3239_v17 = vadd.f32 %v3238_v4, %v3237_v33 }
 0xdf0   :  { %v3240_v2 = vrot.slane %v3239_v17, 2 }
 0xdf2   :  { %v3241_v25 = vadd.f32 %v3240_v2, %v3239_v17 }
 0xdf4   :  { %v3242_v20 = vrot.slane %v3241_v25, 1 }
 0xdf6   :  { %v3243_v62 = vadd.f32 %v3242_v20, %v3241_v25  ;;  %v4952_v25 = vld [vmem:[%s5937_s7] sm:$0xff]  ;;  %v4973_v20 = vld [vmem:[#allocation7 + $0x90] sm:$0xff] }
 0xdf7   :  { %3610 = vmatpush.bf16.msrb.mxu1 %v4973_v20 }
 0xdf8   :  { %3244 = vrot.lane.b32.xlu2 %v3243_v62, %s5117_s26 }
 0xdfb   :  { %3611 = vmatpush.bf16.msrb.mxu1 %v4972_v21 }
 0xe52   :  { %v3245_v39 = vpop.permute.xlu2 %3244 }
 0xe53   :  { %v3246_v47 = vadd.f32 %v3245_v39, %v3243_v62  ;;  %v4964_v62 = vld [vmem:[#allocation7 + $0x48] sm:$0xff]  ;;  %v4961_v39 = vld [vmem:[#allocation7 + $0x30] sm:$0xff] }
 0xe54   :  { %3578 = vmatpush.bf16.msrb.mxu3 %v4961_v39 }
 0xe55   :  { %3247 = vrot.lane.b32.xlu0 %v3246_v47, %s5110_s16 }
 0xec7   :  { %v3248_v28 = vpop.permute.xlu0 %3247 }
 0xec8   :  { %v3249_v13 = vadd.f32 %v3248_v28, %v3246_v47  ;;  %v4960_v47 = vld [vmem:[#allocation7 + $0x28] sm:$0xff]  ;;  %v4957_v28 = vld [vmem:[#allocation7 + $0x10] sm:$0xff] }
 0xec9   :  { %3579 = vmatpush.bf16.msrb.mxu3 %v4960_v47 }
 0xeca   :  { %v3250_v43 = vmul.f32 0.0078125, %v3249_v13  ;;  %v4956_v13 = vld [vmem:[#allocation7 + $0x8] sm:$0xff] }
 0xecc   :  { %v3251_v42 = vperm.slane %v3250_v43, 0  ;;  %v4955_v43 = vld [vmem:[#allocation7] sm:$0xff] }
 0xecd   :  { %3580 = vmatpush.bf16.msrb.mxu3 %v4959_v7 }
 0xece   :  { %v3252_v32 = vsub.f32 %v3231_v14, %v3251_v42  ;;  %v3253_v60 = vsub.f32 %v3232_v9, %v3251_v42  ;;  %v3254_v5 = vsub.f32 %v3233_v54, %v3251_v42  ;;  %v3255_v56 = vsub.f32 %v3234_v1, %v3251_v42 }
 0xed0   :  { %v3256_v22 = vmul.f32 %v3252_v32, %v3252_v32  ;;  %v3257_v63 = vmul.f32 %v3253_v60, %v3253_v60  ;;  %v3258_v53 = vmul.f32 %v3254_v5, %v3254_v5  ;;  %v3259_v6 = vmul.f32 %v3255_v56, %v3255_v56 }
 0xed1   :  { %3581 = vmatpush.bf16.msrb.mxu3 %v4958_v10 }
 0xed2   :  { %v3260_v18 = vadd.f32 %v3257_v63, %v3256_v22 }
 0xed4   :  { %v3261_v41 = vadd.f32 %v3260_v18, %v3258_v53  ;;  %v4971_v18 = vld [vmem:[#allocation7 + $0x80] sm:$0xff] }
 0xed5   :  { %3582 = vmatpush.bf16.msrb.mxu3 %v4957_v28  ;;  %3612 = vmatpush.bf16.msrb.mxu1 %v4971_v18  ;;  %v4983_v18 = vld [vmem:[%s5941_s11 + $0x20] sm:$0xff] }
 0xed6   :  { %v3262_v24 = vadd.f32 %v3261_v41, %v3259_v6 }
 0xed8   :  { %v3263_v36 = vrot.slane %v3262_v24, 4 }
 0xed9   :  { %3583 = vmatpush.bf16.msrb.mxu3 %v4956_v13 }
 0xeda   :  { %v3264_v16 = vadd.f32 %v3263_v36, %v3262_v24 }
 0xedc   :  { %v3265_v26 = vrot.slane %v3264_v16, 2 }
 0xedd   :  { %3584 = vmatpush.bf16.msrb.mxu3 %v4955_v43 }
 0xede   :  { %v3266_v37 = vadd.f32 %v3265_v26, %v3264_v16 }
 0xee0   :  { %v3267_v58 = vrot.slane %v3266_v37, 1 }
 0xee2   :  { %v3268_v8 = vadd.f32 %v3267_v58, %v3266_v37 }
 0xee4   :  { %3269 = vrot.lane.b32.xlu1 %v3268_v8, %s5117_s26 }
 0xf56   :  { %v3270_v48 = vpop.permute.xlu1 %3269 }
 0xf57   :  { %v3271_v3 = vadd.f32 %v3270_v48, %v3268_v8 }
 0xf59   :  { %3272 = vrot.lane.b32.xlu2 %v3271_v3, %s5110_s16 }
 0xfb3   :  { %v3273_v19 = vpop.permute.xlu2 %3272 }
 0xfb4   :  { %v3274_v50 = vadd.f32 %v3273_v19, %v3271_v3 }
 0xfb6   :  { %v3275_v30 = vmul.f32 0.0078125, %v3274_v50  ;;  %v5890_v50 = vld [vmem:[%s5939_s9 + $0xc] sm:$0x7] }
 0xfb8   :  { %v3276_v57 = vadd.f32 1e-05, %v3275_v30  ;;  %v3432_v30 = vperm.slane %v5890_v50, 0 }
 0xfba   :  { %5002 = vrsqrt.f32 %v3276_v57  ;;  %vm3283_vm8 = vweird.f32 %v3276_v57 }
 0xfc0   :  { %v5003_v12 = vpop.eup %5002 }
 0xfc1   :  { %v3278_v23 = vmul.f32 %v5003_v12, %v3276_v57  ;;  %vm3284_vm7 = vweird.f32 %v5003_v12 }
 0xfc2   :  { %vm3285_vm9 = vmor %vm3283_vm8, %vm3284_vm7 }
 0xfc3   :  { %v3279_v59 = vmul.f32 %v5003_v12, %v3278_v23 }
 0xfc5   :  { %v3280_v52 = vmul.f32 0.5, %v3279_v59 }
 0xfc7   :  { %v3281_v46 = vsub.f32 1.5, %v3280_v52 }
 0xfc9   :  { %v3282_v45 = vmul.f32 %v5003_v12, %v3281_v46 }
 0xfcb   :  { %v3286_v15 = vsel %vm3285_vm9, %v5003_v12, %v3282_v45 }
 0xfcc   :  { %v3288_v31 = vrot.slane %v3286_v15, 7 }
 0xfce   :  { %v3290_v9 = vmul.f32 %v5869_v61, %v3288_v31  ;;  %v4965_v61 = vld [vmem:[#allocation7 + $0x50] sm:$0xff] }
 0xfcf   :  { %3596 = vmatpush.bf16.msrb.mxu0 %v4965_v61 }
 0xfd0   :  { %v3291_v14 = vperm.slane %v3290_v9, 1 }
 0xfd2   :  { %v3294_v54 = vmul.f32 %v3291_v14, %v3254_v5  ;;  %v3295_v34 = vmul.f32 %v3291_v14, %v3255_v56  ;;  %v3292_v51 = vmul.f32 %v3291_v14, %v3252_v32  ;;  %v3293_v38 = vmul.f32 %v3291_v14, %v3253_v60  ;;  %v4963_v32 = vld [vmem:[#allocation7 + $0x40] sm:$0xff] }
 0xfd3   :  { %3597 = vmatpush.bf16.msrb.mxu0 %v4964_v62 }
 0xfd4   :  { %v3299_v0 = vadd.f32 %v3296_v27, %v3294_v54  ;;  %v3300_v1 = vadd.f32 %v3296_v27, %v3295_v34  ;;  %v3297_v4 = vadd.f32 %v3296_v27, %v3292_v51  ;;  %v3298_v17 = vadd.f32 %v3296_v27, %v3293_v38 }
 0xfd6   :  { %v3302_v33 = vpack.c.bf16 %v3300_v1, %v3299_v0  ;;  %v3301_v2 = vpack.c.bf16 %v3298_v17, %v3297_v4 }
 0xfd7   :  { %3598 = vmatpush.bf16.msrb.mxu0 %v4963_v32  ;;  %v4986_v32 = vld [vmem:[%s5941_s11 + $0x38] sm:$0xff] }
 0xfd8   :  { %3340 = vmatpush.bf16.msra.mxu2 %v3302_v33 }
 0xfdc   :  { %3341 = vmatpush.bf16.msra.mxu2 %v3301_v2 }
 0xfdf   :  { %4617 = vmatmul.msk.bf16.vlgmr.msra.gmra.mxu2 %vm3324_vm10, %v4952_v25 }
 0xfe0   :  { %3757 = vmatpush.bf16.msrb.mxu2 %v4986_v32 }
 0xfef   :  { %4618 = vmatmul.msk.bf16.gmra.mxu2 %vm3324_vm10, %v4953_v35 }
 0xfff   :  { %4619 = vmatmul.msk.bf16.gmra.mxu2 %vm3324_vm10, %v4954_v55 }
0x1062   :  { %v3343_v42 = vpop.f32.mrf.mxu2 }
0x1063   :  { %v3358_v60 = vpack.c.bf16 %v3343_v42, %v3343_v42 }
0x1065   :  { %v3366_v22 = vunpack.c.l.b16 %v3358_v60  ;;  %v4985_v60 = vld [vmem:[%s5941_s11 + $0x30] sm:$0xff] }
0x1066   :  { %3758 = vmatpush.bf16.msrb.mxu2 %v4985_v60 }
0x106a   :  { %v3345_v5 = vpop.f32.mrf.mxu2 }
0x106b   :  { %v3359_v56 = vpack.c.bf16 %v3345_v5, %v3345_v5 }
0x106d   :  { %v3367_v63 = vunpack.c.l.b16 %v3359_v56 }
0x106f   :  { %v3368_v53 = vpack.c.b16 %v3367_v63, %v3366_v22  ;;  %v4984_v22 = vld [vmem:[%s5941_s11 + $0x28] sm:$0xff] }
0x1070   :  { %3759 = vmatpush.bf16.msrb.mxu2 %v4984_v22 }
0x1071   :  { %3585 = vmatmul.bf16.vlgmr.msrb.gmra.mxu3 %v3368_v53 }
0x1072   :  { %v3348_v6 = vpop.f32.mrf.mxu2 }
0x1073   :  { %v3360_v41 = vpack.c.bf16 %v3348_v6, %v3348_v6 }
0x1074   :  { %3760 = vmatpush.bf16.msrb.mxu2 %v4983_v18 }
0x1075   :  { %v3372_v16 = vunpack.c.l.b16 %v3360_v41 }
0x107a   :  { %v3350_v24 = vpop.f32.mrf.mxu2 }
0x107b   :  { %v3361_v36 = vpack.c.bf16 %v3350_v24, %v3350_v24  ;;  %v4982_v24 = vld [vmem:[%s5941_s11 + $0x18] sm:$0xff] }
0x107c   :  { %3761 = vmatpush.bf16.msrb.mxu2 %v4982_v24 }
0x107d   :  { %v3373_v26 = vunpack.c.l.b16 %v3361_v36 }
0x107f   :  { %v3374_v37 = vpack.c.b16 %v3373_v26, %v3372_v16  ;;  %v4981_v26 = vld [vmem:[%s5941_s11 + $0x10] sm:$0xff] }
0x1080   :  { %3762 = vmatpush.bf16.msrb.mxu2 %v4981_v26 }
0x1081   :  { %3599 = vmatmul.bf16.vlgmr.msrb.gmra.mxu0 %v3374_v37 }
0x1082   :  { %v3353_v58 = vpop.f32.mrf.mxu2 }
0x1083   :  { %v3362_v8 = vpack.c.bf16 %v3353_v58, %v3353_v58  ;;  %v3666_v58 = vperm.slane %v5890_v50, 2 }
0x1085   :  { %v3378_v29 = vunpack.c.l.b16 %v3362_v8 }
0x108a   :  { %v3355_v44 = vpop.f32.mrf.mxu2 }
0x108b   :  { %v3363_v49 = vpack.c.bf16 %v3355_v44, %v3355_v44  ;;  %v4980_v44 = vld [vmem:[%s5941_s11 + $0x8] sm:$0xff] }
0x108c   :  { %3763 = vmatpush.bf16.msrb.mxu2 %v4980_v44 }
0x108d   :  { %v3379_v11 = vunpack.c.l.b16 %v3363_v49 }
0x108f   :  { %v3380_v48 = vpack.c.b16 %v3379_v11, %v3378_v29 }
0x1091   :  { %3613 = vmatmul.bf16.vlgmr.msrb.gmra.mxu1 %v3380_v48 }
0x10f4   :  { %v3586_v3 = vpop.f32.mrf.mxu3 }
0x10f5   :  { %v3587_v23 = vadd.f32 %v3586_v3, %v3432_v30 }
0x10fc   :  { %v3588_v12 = vpop.f32.mrf.mxu3 }
0x10fd   :  { %v3589_v46 = vadd.f32 %v3588_v12, %v3432_v30 }
0x10fe   :  { %v3600_v19 = vpop.f32.mrf.mxu0 }
0x10ff   :  { %v3601_v52 = vadd.f32 %v3600_v19, %v3587_v23  ;;  %v3670_v19 = vld [vmem:[%s5940_s10] sm:$0xf]  ;;  %s3778_s10 = sshll.u32 %s5943_s13, 4  ;;  %s3779_s10 = int_to_ptr.hbm [resolvable:$true] %s3778_s10 }
0x1100   :  { %v4997_v23 = vld [vmem:[%s5942_s12] ss:$0 sm:$0xff] }
0x1106   :  { %v3602_v59 = vpop.f32.mrf.mxu0 }
0x1107   :  { %v3603_v15 = vadd.f32 %v3602_v59, %v3589_v46 }
0x110e   :  { %v3614_v57 = vpop.f32.mrf.mxu1 }
0x110f   :  { %v3615_v45 = vadd.f32 %v3614_v57, %v3601_v52 }
0x1111   :  { %v3619_v27 = vmax.f32 %v3615_v45, 0.0 }
0x1116   :  { %v3616_v31 = vpop.f32.mrf.mxu1 }
0x1117   :  { %v3617_v9 = vadd.f32 %v3616_v31, %v3603_v15 }
0x1119   :  { %v3620_v14 = vmax.f32 %v3617_v9, 0.0 }
0x111b   :  { %v3621_v54 = vadd.f32 %v3620_v14, %v3619_v27 }
0x111d   :  { %v3622_v34 = vrot.slane %v3621_v54, 4 }
0x111f   :  { %v3623_v51 = vadd.f32 %v3622_v34, %v3621_v54 }
0x1121   :  { %v3624_v38 = vrot.slane %v3623_v51, 2 }
0x1123   :  { %v3625_v0 = vadd.f32 %v3624_v38, %v3623_v51 }
0x1125   :  { %v3626_v1 = vrot.slane %v3625_v0, 1 }
0x1127   :  { %v3627_v33 = vadd.f32 %v3626_v1, %v3625_v0 }
0x1129   :  { %3628 = vrot.lane.b32.xlu0 %v3627_v33, %s5110_s16 }
0x119b   :  { %v3629_v4 = vpop.permute.xlu0 %3628 }
0x119c   :  { %v3630_v17 = vadd.f32 %v3629_v4, %v3627_v33 }
0x119e   :  { %v3631_v2 = vmul.f32 0.03125, %v3630_v17 }
0x11a0   :  { %v3632_v25 = vperm.slane %v3631_v2, 0 }
0x11a2   :  { %v3633_v61 = vsub.f32 %v3619_v27, %v3632_v25  ;;  %v3634_v20 = vsub.f32 %v3620_v14, %v3632_v25 }
0x11a4   :  { %v3635_v62 = vmul.f32 %v3633_v61, %v3633_v61  ;;  %v3636_v21 = vmul.f32 %v3634_v20, %v3634_v20 }
0x11a6   :  { %v3637_v35 = vadd.f32 %v3636_v21, %v3635_v62 }
0x11a8   :  { %v3638_v55 = vrot.slane %v3637_v35, 4 }
0x11aa   :  { %v3639_v40 = vadd.f32 %v3638_v55, %v3637_v35 }
0x11ac   :  { %v3640_v39 = vrot.slane %v3639_v40, 2 }
0x11ae   :  { %v3641_v47 = vadd.f32 %v3640_v39, %v3639_v40 }
0x11b0   :  { %v3642_v7 = vrot.slane %v3641_v47, 1 }
0x11b2   :  { %v3643_v10 = vadd.f32 %v3642_v7, %v3641_v47 }
0x11b4   :  { %3644 = vrot.lane.b32.xlu1 %v3643_v10, %s5110_s16 }
0x1226   :  { %v3645_v28 = vpop.permute.xlu1 %3644 }
0x1227   :  { %v3646_v13 = vadd.f32 %v3645_v28, %v3643_v10 }
0x1229   :  { %v3647_v43 = vmul.f32 0.03125, %v3646_v13 }
0x122b   :  { %v3648_v42 = vadd.f32 1e-05, %v3647_v43 }
0x122d   :  { %5004 = vrsqrt.f32 %v3648_v42  ;;  %vm3655_vm12 = vweird.f32 %v3648_v42 }
0x1233   :  { %v5005_v5 = vpop.eup %5004 }
0x1234   :  { %v3650_v56 = vmul.f32 %v5005_v5, %v3648_v42  ;;  %vm3656_vm11 = vweird.f32 %v5005_v5 }
0x1235   :  { %vm3657_vm13 = vmor %vm3655_vm12, %vm3656_vm11 }
0x1236   :  { %v3651_v63 = vmul.f32 %v5005_v5, %v3650_v56 }
0x1238   :  { %v3652_v53 = vmul.f32 0.5, %v3651_v63 }
0x123a   :  { %v3653_v6 = vsub.f32 1.5, %v3652_v53 }
0x123c   :  { %v3654_v41 = vmul.f32 %v5005_v5, %v3653_v6 }
0x123e   :  { %v3658_v36 = vsel %vm3657_vm13, %v5005_v5, %v3654_v41 }
0x123f   :  { %v3660_v16 = vrot.slane %v3658_v36, 7 }
0x1241   :  { %v3662_v37 = vmul.f32 %v5890_v50, %v3660_v16  ;;  %v4979_v50 = vld [vmem:[%s5941_s11] sm:$0xff] }
0x1242   :  { %3764 = vmatpush.bf16.msrb.mxu2 %v4979_v50 }
0x1243   :  { %v3663_v8 = vperm.slane %v3662_v37, 1 }
0x1245   :  { %v3664_v49 = vmul.f32 %v3663_v8, %v3633_v61  ;;  %v3665_v29 = vmul.f32 %v3663_v8, %v3634_v20 }
0x1247   :  { %v3667_v11 = vadd.f32 %v3666_v58, %v3664_v49  ;;  %v3668_v48 = vadd.f32 %v3666_v58, %v3665_v29 }
0x1249   :  { %v3669_v3 = vpack.c.bf16 %v3668_v48, %v3667_v11 }
0x124b   :  { %3682 = vmatpush.bf16.msra.mxu3 %v3669_v3 }
0x124e   :  { %4717 = vmatmul.msk.bf16.vlgmr.msra.gmra.mxu3 %vm3671_vm14, %v3670_v19 }
0x12d1   :  { %v3684_v30 = vpop.f32.mrf.mxu3 }
0x12d2   :  { %v3688_v57 = vpack.c.bf16 %v3684_v30, %v3684_v30 }
0x12d4   :  { %3765 = vmatmul.bf16.vlgmr.msrb.gmra.mxu2 %v3688_v57 }
0x12d9   :  { %v3686_v12 = vpop.f32.mrf.mxu3 }
0x1357   :  { %v3766_v59 = vpop.f32.mrf.mxu2 }
0x1358   :  { %v3767_v52 = vadd.f32 %v4997_v23, %v3766_v59 }
0x135a   :  { %3770 = vst [vmem:[#allocation8] sm:$0xff] %v3767_v52 }
0x135b   :  { %3781 = dma.vmem_to_hbm [thread:$0]  %s3777_s19, 128, %s3779_s10, [#allocation4]  }
0x135f   :  { %v3768_v46 = vpop.f32.mrf.mxu2 }
0x1360   :  { %5107 = dma.done.wait [#allocation4], 128  }
0x1361   :  { %5108 = vsyncadd [#allocation4], 4294967168 }
0x1362   :  { %3786 = vsyncpa [#allocation3], 1 }
0x1363   :  { %3787 = vsyncpa [#allocation6], 1 }
0x1364   :  { %3788 = vsyncpa [#allocation4], 1 }

</bundles_post_ra>
